<compile_context>
chip_gen: v7x
topology: tpu7x:2x2x1
jax: 0.10.0
libtpu: 0.0.40
codegen_flags: <defaults>
</compile_context>

<pallas_src>
import jax
import jax.numpy as jnp
from jax.experimental import pallas as pl
from jax.experimental.pallas import tpu as pltpu


# ----------------------------- Pallas kernels ------------------------------

def _matmul_shift_relu_kernel(p_ref, w_ref, shift_ref, o_ref):
    """o = relu(patches @ w + shift); BN scale is pre-folded into w."""
    acc = jnp.dot(p_ref[...], w_ref[...], preferred_element_type=jnp.float32)
    acc = acc + shift_ref[...]                       # (1, N) broadcast, f32
    o_ref[...] = jnp.maximum(acc, 0.0).astype(o_ref.dtype)


def _pick_tile_m(m, k):
    """M-tile: large enough to amortize the ~0.35us/grid-step overhead, small
    enough that double-buffered patch+output blocks stay a few MiB (fits the
    default scoped VMEM limit and v7x's 64 MiB physical VMEM)."""
    target = 1024 if k <= 256 else 512   # shallow-K (conv1) vs K~1152 (conv2-4)
    return m if m <= target else target


def matmul_shift_relu(patches, w_mat, shift, out_dtype):
    """patches (M,K) bf16 @ w_mat (K,N) bf16 + shift (1,N) f32 -> relu, (M,N)."""
    m, k = patches.shape
    _, n = w_mat.shape
    tm = _pick_tile_m(m, k)
    return pl.pallas_call(
        _matmul_shift_relu_kernel,
        out_shape=jax.ShapeDtypeStruct((m, n), out_dtype),
        grid=(pl.cdiv(m, tm),),                      # ragged tail handled by Pallas
        in_specs=[
            pl.BlockSpec((tm, k), lambda i: (i, 0)),  # M-tiled -> pipelined DMA
            pl.BlockSpec((k, n), lambda i: (0, 0)),   # weights stay resident
            pl.BlockSpec((1, n), lambda i: (0, 0)),   # folded BN/bias shift
        ],
        out_specs=pl.BlockSpec((tm, n), lambda i: (i, 0)),
        compiler_params=pltpu.CompilerParams(
            dimension_semantics=("parallel",),        # megacore / 2-TC sharding
            vmem_limit_bytes=32 * 1024 * 1024,
        ),
    )(patches, w_mat, shift)


def _maxpool_kernel(x_ref, o_ref):
    """2x2 max pool on a (TM, 2, Wo, 2*C) view -> (TM, Wo, C)."""
    c = o_ref.shape[-1]
    v = x_ref[...]                                   # (TM, 2, Wo, 2*C)
    m = jnp.maximum(v[:, 0], v[:, 1])                # vertical max  (TM, Wo, 2*C)
    o_ref[...] = jnp.maximum(m[..., :c], m[..., c:]).astype(o_ref.dtype)


def maxpool2x2(x):
    """x: (B, H, W, C) NHWC -> (B, H//2, W//2, C).

    Single kernel input: (B,H,W,C) -> (B*Ho, 2, Wo, 2*C) is a contiguous
    (free) reshape, so HBM is read once; the window max happens in-kernel.
    """
    b, h, w, c = x.shape
    ho, wo = h // 2, w // 2
    xv = x.reshape(b * ho, 2, wo, 2 * c)
    rows = b * ho
    tm = rows if rows <= 256 else 256
    out = pl.pallas_call(
        _maxpool_kernel,
        out_shape=jax.ShapeDtypeStruct((rows, wo, c), x.dtype),
        grid=(pl.cdiv(rows, tm),),
        in_specs=[pl.BlockSpec((tm, 2, wo, 2 * c), lambda i: (i, 0, 0, 0))],
        out_specs=pl.BlockSpec((tm, wo, c), lambda i: (i, 0, 0)),
        compiler_params=pltpu.CompilerParams(
            dimension_semantics=("parallel",)),
    )(xv)
    return out.reshape(b, ho, wo, c)


# ------------------------------- glue / model ------------------------------

def im2col(x, k):
    """x: (B, H, W, C) bf16, valid (no-pad) kxk patches.

    Returns ((B*Ho*Wo, k*k*C), (B, Ho, Wo)); feature order is (kh, kw, Cin),
    matching the reordered PyTorch weight (Cout,Cin,kh,kw)->(kh,kw,Cin,Cout).
    Kept in XLA (pure layout); bf16 halves its HBM cost vs the f32 version.
    """
    b, h, w, c = x.shape
    ho, wo = h - k + 1, w - k + 1
    cols = []
    for dh in range(k):
        for dw in range(k):
            cols.append(x[:, dh:dh + ho, dw:dw + wo, :])
    p = jnp.stack(cols, axis=3)                      # (B, Ho, Wo, k*k, C)
    return p.reshape(b * ho * wo, k * k * c), (b, ho, wo)


def conv_block(x, layer, out_dtype=jnp.bfloat16):
    k = layer["k"]
    patches, (b, ho, wo) = im2col(x, k)
    out = matmul_shift_relu(patches, layer["w_mat"], layer["shift"], out_dtype)
    return out.reshape(b, ho, wo, out.shape[-1])


def pointnet_forward(x_nchw, params, out_channels):
    # NCHW -> NHWC once at the boundary; run the network in bf16 activations
    # with f32 accumulation inside the kernels.
    x = jnp.transpose(x_nchw, (0, 2, 3, 1)).astype(jnp.bfloat16)
    x = conv_block(x, params["conv1"])                       # (B,28,28, 32)
    x = maxpool2x2(x)                                        # (B,14,14, 32)
    x = conv_block(x, params["conv2"])                       # (B,12,12,128)
    x = maxpool2x2(x)                                        # (B, 6, 6,128)
    x = conv_block(x, params["conv3"])                       # (B, 4, 4,128)
    x = conv_block(x, params["conv4"])                       # (B, 2, 2,256)
    x = conv_block(x, params["conv5"], out_dtype=jnp.float32)  # (B,1,1,128 pad)
    # .squeeze(2).squeeze(2) on NCHW output == drop the 1x1 spatial dims.
    # conv5's Cout was zero-padded to 128 for a lane-dense store; slice it off.
    return x.reshape(x.shape[0], x.shape[3])[:, :out_channels]


def init_params(key, in_ch=1, out_channels=2):
    # BatchNorm is applied in inference mode (deterministic running stats);
    # its per-channel scale is folded straight into the weight columns and its
    # shift is kept as the kernel-epilogue bias.
    layer_defs = [
        ("conv1", 5, in_ch, 32, False),   # (name, k, cin, cout, has_bn)
        ("conv2", 3, 32, 128, True),
        ("conv3", 3, 128, 128, True),
        ("conv4", 3, 128, 256, True),
        ("conv5", 2, 256, out_channels, False),
    ]
    eps = 1e-5
    params = {}
    for name, k, cin, cout, has_bn in layer_defs:
        key, kw, kb, kg, kbe, km, kv = jax.random.split(key, 7)
        fan_in = cin * k * k
        w = jax.random.normal(kw, (cout, cin, k, k), jnp.float32)
        w = w * (1.0 / jnp.sqrt(jnp.float32(fan_in)))
        # PyTorch (Cout, Cin, kh, kw) -> (kh, kw, Cin, Cout) -> (K, Cout)
        w_mat = jnp.transpose(w, (2, 3, 1, 0)).reshape(k * k * cin, cout)
        if has_bn:
            gamma = jax.random.uniform(kg, (cout,), jnp.float32, 0.5, 1.5)
            beta = jax.random.normal(kbe, (cout,), jnp.float32) * 0.1
            mean = jax.random.normal(km, (cout,), jnp.float32) * 0.1
            var = jax.random.uniform(kv, (cout,), jnp.float32, 0.5, 1.5)
            scale = gamma / jnp.sqrt(var + eps)
            shift = beta - mean * scale
        else:
            scale = jnp.ones((cout,), jnp.float32)
            shift = jax.random.normal(kb, (cout,), jnp.float32) * 0.1
        # Fold BN scale into the weights (compile-time constant transform).
        w_mat = w_mat * scale[None, :]
        n = cout
        if name == "conv5":
            # Pad Cout up to a full 128-lane width so the final store is
            # lane-dense (unmasked); padded columns are zeros (relu(0)=0) and
            # get sliced off in the wrapper.
            n = 128
            w_mat = jnp.pad(w_mat, ((0, 0), (0, n - cout)))
            shift = jnp.pad(shift, (0, n - cout))
        params[name] = dict(
            k=k,
            w_mat=w_mat.astype(jnp.bfloat16),
            shift=shift.reshape(1, n).astype(jnp.float32),
        )
    return params


if __name__ == "__main__":
    key = jax.random.PRNGKey(0)
    kp, kx = jax.random.split(key)
    out_channels = 2
    params = init_params(kp, in_ch=1, out_channels=out_channels)
    # Spatial size 32x32 is required by the architecture to reach 1x1.
    x = jax.random.normal(kx, (2, 1, 32, 32), jnp.float32)

    run = jax.jit(lambda inp: pointnet_forward(inp, params, out_channels))
    out = jax.block_until_ready(run(x))

    assert out.shape == (2, out_channels), out.shape
    assert out.dtype == jnp.float32
    assert bool(jnp.all(jnp.isfinite(out)))
    print("KERNEL_OK")
</pallas_src>

<mosaic_0001>
module attributes {stable_mosaic.version = 11 : i64} {
  func.func @_matmul_shift_relu_kernel(%arg0: i32, %arg1: memref<1024x25xbf16, #tpu.memory_space<vmem>>, %arg2: memref<25x32xbf16, #tpu.memory_space<vmem>>, %arg3: memref<1x32xf32, #tpu.memory_space<vmem>>, %arg4: memref<1024x32xbf16, #tpu.memory_space<vmem>>) attributes {dimension_semantics = [#tpu.dimension_semantics<parallel>], iteration_bounds = array<i64: 2>, scalar_prefetch = 0 : i64, scratch_operands = 0 : i64, tpu.core_type = #tpu.core_type<tc>, window_params = [{transform_indices = @transform_0, window_bounds = array<i64: 1024, 25>}, {pipeline_mode = #tpu.pipeline_mode<synchronous>, transform_indices = @transform_1, window_bounds = array<i64: 25, 32>}, {pipeline_mode = #tpu.pipeline_mode<synchronous>, transform_indices = @transform_2, window_bounds = array<i64: 1, 32>}, {transform_indices = @transform_3, window_bounds = array<i64: 1024, 32>}]} {
    %c0 = arith.constant 0 : index
    %c0_0 = arith.constant 0 : index
    %0 = vector.load %arg1[%c0, %c0_0] : memref<1024x25xbf16, #tpu.memory_space<vmem>>, vector<1024x25xbf16>
    %c0_1 = arith.constant 0 : index
    %c0_2 = arith.constant 0 : index
    %1 = vector.load %arg2[%c0_1, %c0_2] : memref<25x32xbf16, #tpu.memory_space<vmem>>, vector<25x32xbf16>
    %cst = arith.constant dense<0.000000e+00> : vector<1024x32xf32>
    %2 = tpu.matmul %0, %1, %cst {dimension_numbers = #tpu.dot_dimension_numbers<[1], [0], [0], [1], [0, 0, 1, 1], [], []>} : vector<1024x25xbf16>, vector<25x32xbf16>, vector<1024x32xf32> -> vector<1024x32xf32>
    %c0_3 = arith.constant 0 : index
    %c0_4 = arith.constant 0 : index
    %3 = vector.load %arg3[%c0_3, %c0_4] : memref<1x32xf32, #tpu.memory_space<vmem>>, vector<1x32xf32>
    %4 = vector.broadcast %3 : vector<1x32xf32> to vector<1024x32xf32>
    %5 = arith.addf %2, %4 : vector<1024x32xf32>
    %cst_5 = arith.constant 0.000000e+00 : f32
    %6 = vector.broadcast %cst_5 : f32 to vector<1024x32xf32>
    %7 = arith.maximumf %5, %6 : vector<1024x32xf32>
    %8 = arith.truncf %7 : vector<1024x32xf32> to vector<1024x32xbf16>
    %c0_6 = arith.constant 0 : index
    %c0_7 = arith.constant 0 : index
    %9 = vector.load %arg4[%c0_6, %c0_7] : memref<1024x32xbf16, #tpu.memory_space<vmem>>, vector<1024x32xbf16>
    tpu.vector_store %arg4[%c0_6, %c0_7], %8 {strides = array<i32>} : memref<1024x32xbf16, #tpu.memory_space<vmem>>, vector<1024x32xbf16>,
    return
  }
  func.func @transform_0(%arg0: i32) -> (i32, i32) {
    %c0_i32 = arith.constant 0 : i32
    %c0_i32_0 = arith.constant 0 : i32
    return %arg0, %c0_i32 : i32, i32
  }
  func.func @transform_1(%arg0: i32) -> (i32, i32) {
    %c0_i32 = arith.constant 0 : i32
    %c0_i32_0 = arith.constant 0 : i32
    %c0_i32_1 = arith.constant 0 : i32
    return %c0_i32, %c0_i32_0 : i32, i32
  }
  func.func @transform_2(%arg0: i32) -> (i32, i32) {
    %c0_i32 = arith.constant 0 : i32
    %c0_i32_0 = arith.constant 0 : i32
    %c0_i32_1 = arith.constant 0 : i32
    return %c0_i32, %c0_i32_0 : i32, i32
  }
  func.func @transform_3(%arg0: i32) -> (i32, i32) {
    %c0_i32 = arith.constant 0 : i32
    %c0_i32_0 = arith.constant 0 : i32
    return %arg0, %c0_i32 : i32, i32
  }
}

module attributes {stable_mosaic.version = 11 : i64} {
  func.func @_maxpool_kernel(%arg0: i32, %arg1: memref<28x2x14x64xbf16, #tpu.memory_space<vmem>>, %arg2: memref<28x14x32xbf16, #tpu.memory_space<vmem>>) attributes {dimension_semantics = [#tpu.dimension_semantics<parallel>], iteration_bounds = array<i64: 1>, scalar_prefetch = 0 : i64, scratch_operands = 0 : i64, tpu.core_type = #tpu.core_type<tc>, window_params = [{transform_indices = @transform_0, window_bounds = array<i64: 28, 2, 14, 64>}, {transform_indices = @transform_1, window_bounds = array<i64: 28, 14, 32>}]} {
    %c0 = arith.constant 0 : index
    %c0_0 = arith.constant 0 : index
    %c0_1 = arith.constant 0 : index
    %c0_2 = arith.constant 0 : index
    %0 = vector.load %arg1[%c0, %c0_0, %c0_1, %c0_2] : memref<28x2x14x64xbf16, #tpu.memory_space<vmem>>, vector<28x2x14x64xbf16>
    %1 = vector.extract_strided_slice %0 {offsets = [0, 0, 0, 0], sizes = [28, 1, 14, 64], strides = [1, 1, 1, 1]} : vector<28x2x14x64xbf16> to vector<28x1x14x64xbf16>
    %2 = vector.shape_cast %1 : vector<28x1x14x64xbf16> to vector<28x14x64xbf16>
    %3 = vector.extract_strided_slice %0 {offsets = [0, 1, 0, 0], sizes = [28, 1, 14, 64], strides = [1, 1, 1, 1]} : vector<28x2x14x64xbf16> to vector<28x1x14x64xbf16>
    %4 = vector.shape_cast %3 : vector<28x1x14x64xbf16> to vector<28x14x64xbf16>
    %5 = arith.maximumf %2, %4 : vector<28x14x64xbf16>
    %6 = vector.extract_strided_slice %5 {offsets = [0, 0, 0], sizes = [28, 14, 32], strides = [1, 1, 1]} : vector<28x14x64xbf16> to vector<28x14x32xbf16>
    %7 = vector.extract_strided_slice %5 {offsets = [0, 0, 32], sizes = [28, 14, 32], strides = [1, 1, 1]} : vector<28x14x64xbf16> to vector<28x14x32xbf16>
    %8 = arith.maximumf %6, %7 : vector<28x14x32xbf16>
    %c0_3 = arith.constant 0 : index
    %c0_4 = arith.constant 0 : index
    %c0_5 = arith.constant 0 : index
    %9 = vector.load %arg2[%c0_3, %c0_4, %c0_5] : memref<28x14x32xbf16, #tpu.memory_space<vmem>>, vector<28x14x32xbf16>
    tpu.vector_store %arg2[%c0_3, %c0_4, %c0_5], %8 {strides = array<i32>} : memref<28x14x32xbf16, #tpu.memory_space<vmem>>, vector<28x14x32xbf16>,
    return
  }
  func.func @transform_0(%arg0: i32) -> (i32, i32, i32, i32) {
    %c0_i32 = arith.constant 0 : i32
    %c0_i32_0 = arith.constant 0 : i32
    %c0_i32_1 = arith.constant 0 : i32
    %c0_i32_2 = arith.constant 0 : i32
    return %arg0, %c0_i32, %c0_i32_0, %c0_i32_1 : i32, i32, i32, i32
  }
  func.func @transform_1(%arg0: i32) -> (i32, i32, i32) {
    %c0_i32 = arith.constant 0 : i32
    %c0_i32_0 = arith.constant 0 : i32
    %c0_i32_1 = arith.constant 0 : i32
    return %arg0, %c0_i32, %c0_i32_0 : i32, i32, i32
  }
}

module attributes {stable_mosaic.version = 11 : i64} {
  func.func @_matmul_shift_relu_kernel(%arg0: i32, %arg1: memref<288x288xbf16, #tpu.memory_space<vmem>>, %arg2: memref<288x128xbf16, #tpu.memory_space<vmem>>, %arg3: memref<1x128xf32, #tpu.memory_space<vmem>>, %arg4: memref<288x128xbf16, #tpu.memory_space<vmem>>) attributes {dimension_semantics = [#tpu.dimension_semantics<parallel>], iteration_bounds = array<i64: 1>, scalar_prefetch = 0 : i64, scratch_operands = 0 : i64, tpu.core_type = #tpu.core_type<tc>, window_params = [{transform_indices = @transform_0, window_bounds = array<i64: 288, 288>}, {pipeline_mode = #tpu.pipeline_mode<synchronous>, transform_indices = @transform_1, window_bounds = array<i64: 288, 128>}, {pipeline_mode = #tpu.pipeline_mode<synchronous>, transform_indices = @transform_2, window_bounds = array<i64: 1, 128>}, {transform_indices = @transform_3, window_bounds = array<i64: 288, 128>}]} {
    %c0 = arith.constant 0 : index
    %c0_0 = arith.constant 0 : index
    %0 = vector.load %arg1[%c0, %c0_0] : memref<288x288xbf16, #tpu.memory_space<vmem>>, vector<288x288xbf16>
    %c0_1 = arith.constant 0 : index
    %c0_2 = arith.constant 0 : index
    %1 = vector.load %arg2[%c0_1, %c0_2] : memref<288x128xbf16, #tpu.memory_space<vmem>>, vector<288x128xbf16>
    %cst = arith.constant dense<0.000000e+00> : vector<288x128xf32>
    %2 = tpu.matmul %0, %1, %cst {dimension_numbers = #tpu.dot_dimension_numbers<[1], [0], [0], [1], [0, 0, 1, 1], [], []>} : vector<288x288xbf16>, vector<288x128xbf16>, vector<288x128xf32> -> vector<288x128xf32>
    %c0_3 = arith.constant 0 : index
    %c0_4 = arith.constant 0 : index
    %3 = vector.load %arg3[%c0_3, %c0_4] : memref<1x128xf32, #tpu.memory_space<vmem>>, vector<1x128xf32>
    %4 = vector.broadcast %3 : vector<1x128xf32> to vector<288x128xf32>
    %5 = arith.addf %2, %4 : vector<288x128xf32>
    %cst_5 = arith.constant 0.000000e+00 : f32
    %6 = vector.broadcast %cst_5 : f32 to vector<288x128xf32>
    %7 = arith.maximumf %5, %6 : vector<288x128xf32>
    %8 = arith.truncf %7 : vector<288x128xf32> to vector<288x128xbf16>
    %c0_6 = arith.constant 0 : index
    %c0_7 = arith.constant 0 : index
    %9 = vector.load %arg4[%c0_6, %c0_7] : memref<288x128xbf16, #tpu.memory_space<vmem>>, vector<288x128xbf16>
    tpu.vector_store %arg4[%c0_6, %c0_7], %8 {strides = array<i32>} : memref<288x128xbf16, #tpu.memory_space<vmem>>, vector<288x128xbf16>,
    return
  }
  func.func @transform_0(%arg0: i32) -> (i32, i32) {
    %c0_i32 = arith.constant 0 : i32
    %c0_i32_0 = arith.constant 0 : i32
    return %arg0, %c0_i32 : i32, i32
  }
  func.func @transform_1(%arg0: i32) -> (i32, i32) {
    %c0_i32 = arith.constant 0 : i32
    %c0_i32_0 = arith.constant 0 : i32
    %c0_i32_1 = arith.constant 0 : i32
    return %c0_i32, %c0_i32_0 : i32, i32
  }
  func.func @transform_2(%arg0: i32) -> (i32, i32) {
    %c0_i32 = arith.constant 0 : i32
    %c0_i32_0 = arith.constant 0 : i32
    %c0_i32_1 = arith.constant 0 : i32
    return %c0_i32, %c0_i32_0 : i32, i32
  }
  func.func @transform_3(%arg0: i32) -> (i32, i32) {
    %c0_i32 = arith.constant 0 : i32
    %c0_i32_0 = arith.constant 0 : i32
    return %arg0, %c0_i32 : i32, i32
  }
}

module attributes {stable_mosaic.version = 11 : i64} {
  func.func @_maxpool_kernel(%arg0: i32, %arg1: memref<12x2x6x256xbf16, #tpu.memory_space<vmem>>, %arg2: memref<12x6x128xbf16, #tpu.memory_space<vmem>>) attributes {dimension_semantics = [#tpu.dimension_semantics<parallel>], iteration_bounds = array<i64: 1>, scalar_prefetch = 0 : i64, scratch_operands = 0 : i64, tpu.core_type = #tpu.core_type<tc>, window_params = [{transform_indices = @transform_0, window_bounds = array<i64: 12, 2, 6, 256>}, {transform_indices = @transform_1, window_bounds = array<i64: 12, 6, 128>}]} {
    %c0 = arith.constant 0 : index
    %c0_0 = arith.constant 0 : index
    %c0_1 = arith.constant 0 : index
    %c0_2 = arith.constant 0 : index
    %0 = vector.load %arg1[%c0, %c0_0, %c0_1, %c0_2] : memref<12x2x6x256xbf16, #tpu.memory_space<vmem>>, vector<12x2x6x256xbf16>
    %1 = vector.extract_strided_slice %0 {offsets = [0, 0, 0, 0], sizes = [12, 1, 6, 256], strides = [1, 1, 1, 1]} : vector<12x2x6x256xbf16> to vector<12x1x6x256xbf16>
    %2 = vector.shape_cast %1 : vector<12x1x6x256xbf16> to vector<12x6x256xbf16>
    %3 = vector.extract_strided_slice %0 {offsets = [0, 1, 0, 0], sizes = [12, 1, 6, 256], strides = [1, 1, 1, 1]} : vector<12x2x6x256xbf16> to vector<12x1x6x256xbf16>
    %4 = vector.shape_cast %3 : vector<12x1x6x256xbf16> to vector<12x6x256xbf16>
    %5 = arith.maximumf %2, %4 : vector<12x6x256xbf16>
    %6 = vector.extract_strided_slice %5 {offsets = [0, 0, 0], sizes = [12, 6, 128], strides = [1, 1, 1]} : vector<12x6x256xbf16> to vector<12x6x128xbf16>
    %7 = vector.extract_strided_slice %5 {offsets = [0, 0, 128], sizes = [12, 6, 128], strides = [1, 1, 1]} : vector<12x6x256xbf16> to vector<12x6x128xbf16>
    %8 = arith.maximumf %6, %7 : vector<12x6x128xbf16>
    %c0_3 = arith.constant 0 : index
    %c0_4 = arith.constant 0 : index
    %c0_5 = arith.constant 0 : index
    %9 = vector.load %arg2[%c0_3, %c0_4, %c0_5] : memref<12x6x128xbf16, #tpu.memory_space<vmem>>, vector<12x6x128xbf16>
    tpu.vector_store %arg2[%c0_3, %c0_4, %c0_5], %8 {strides = array<i32>} : memref<12x6x128xbf16, #tpu.memory_space<vmem>>, vector<12x6x128xbf16>,
    return
  }
  func.func @transform_0(%arg0: i32) -> (i32, i32, i32, i32) {
    %c0_i32 = arith.constant 0 : i32
    %c0_i32_0 = arith.constant 0 : i32
    %c0_i32_1 = arith.constant 0 : i32
    %c0_i32_2 = arith.constant 0 : i32
    return %arg0, %c0_i32, %c0_i32_0, %c0_i32_1 : i32, i32, i32, i32
  }
  func.func @transform_1(%arg0: i32) -> (i32, i32, i32) {
    %c0_i32 = arith.constant 0 : i32
    %c0_i32_0 = arith.constant 0 : i32
    %c0_i32_1 = arith.constant 0 : i32
    return %arg0, %c0_i32, %c0_i32_0 : i32, i32, i32
  }
}

module attributes {stable_mosaic.version = 11 : i64} {
  func.func @_matmul_shift_relu_kernel(%arg0: i32, %arg1: memref<32x1152xbf16, #tpu.memory_space<vmem>>, %arg2: memref<1152x128xbf16, #tpu.memory_space<vmem>>, %arg3: memref<1x128xf32, #tpu.memory_space<vmem>>, %arg4: memref<32x128xbf16, #tpu.memory_space<vmem>>) attributes {dimension_semantics = [#tpu.dimension_semantics<parallel>], iteration_bounds = array<i64: 1>, scalar_prefetch = 0 : i64, scratch_operands = 0 : i64, tpu.core_type = #tpu.core_type<tc>, window_params = [{transform_indices = @transform_0, window_bounds = array<i64: 32, 1152>}, {pipeline_mode = #tpu.pipeline_mode<synchronous>, transform_indices = @transform_1, window_bounds = array<i64: 1152, 128>}, {pipeline_mode = #tpu.pipeline_mode<synchronous>, transform_indices = @transform_2, window_bounds = array<i64: 1, 128>}, {transform_indices = @transform_3, window_bounds = array<i64: 32, 128>}]} {
    %c0 = arith.constant 0 : index
    %c0_0 = arith.constant 0 : index
    %0 = vector.load %arg1[%c0, %c0_0] : memref<32x1152xbf16, #tpu.memory_space<vmem>>, vector<32x1152xbf16>
    %c0_1 = arith.constant 0 : index
    %c0_2 = arith.constant 0 : index
    %1 = vector.load %arg2[%c0_1, %c0_2] : memref<1152x128xbf16, #tpu.memory_space<vmem>>, vector<1152x128xbf16>
    %cst = arith.constant dense<0.000000e+00> : vector<32x128xf32>
    %2 = tpu.matmul %0, %1, %cst {dimension_numbers = #tpu.dot_dimension_numbers<[1], [0], [0], [1], [0, 0, 1, 1], [], []>} : vector<32x1152xbf16>, vector<1152x128xbf16>, vector<32x128xf32> -> vector<32x128xf32>
    %c0_3 = arith.constant 0 : index
    %c0_4 = arith.constant 0 : index
    %3 = vector.load %arg3[%c0_3, %c0_4] : memref<1x128xf32, #tpu.memory_space<vmem>>, vector<1x128xf32>
    %4 = vector.broadcast %3 : vector<1x128xf32> to vector<32x128xf32>
    %5 = arith.addf %2, %4 : vector<32x128xf32>
    %cst_5 = arith.constant 0.000000e+00 : f32
    %6 = vector.broadcast %cst_5 : f32 to vector<32x128xf32>
    %7 = arith.maximumf %5, %6 : vector<32x128xf32>
    %8 = arith.truncf %7 : vector<32x128xf32> to vector<32x128xbf16>
    %c0_6 = arith.constant 0 : index
    %c0_7 = arith.constant 0 : index
    %9 = vector.load %arg4[%c0_6, %c0_7] : memref<32x128xbf16, #tpu.memory_space<vmem>>, vector<32x128xbf16>
    tpu.vector_store %arg4[%c0_6, %c0_7], %8 {strides = array<i32>} : memref<32x128xbf16, #tpu.memory_space<vmem>>, vector<32x128xbf16>,
    return
  }
  func.func @transform_0(%arg0: i32) -> (i32, i32) {
    %c0_i32 = arith.constant 0 : i32
    %c0_i32_0 = arith.constant 0 : i32
    return %arg0, %c0_i32 : i32, i32
  }
  func.func @transform_1(%arg0: i32) -> (i32, i32) {
    %c0_i32 = arith.constant 0 : i32
    %c0_i32_0 = arith.constant 0 : i32
    %c0_i32_1 = arith.constant 0 : i32
    return %c0_i32, %c0_i32_0 : i32, i32
  }
  func.func @transform_2(%arg0: i32) -> (i32, i32) {
    %c0_i32 = arith.constant 0 : i32
    %c0_i32_0 = arith.constant 0 : i32
    %c0_i32_1 = arith.constant 0 : i32
    return %c0_i32, %c0_i32_0 : i32, i32
  }
  func.func @transform_3(%arg0: i32) -> (i32, i32) {
    %c0_i32 = arith.constant 0 : i32
    %c0_i32_0 = arith.constant 0 : i32
    return %arg0, %c0_i32 : i32, i32
  }
}

module attributes {stable_mosaic.version = 11 : i64} {
  func.func @_matmul_shift_relu_kernel(%arg0: i32, %arg1: memref<8x1152xbf16, #tpu.memory_space<vmem>>, %arg2: memref<1152x256xbf16, #tpu.memory_space<vmem>>, %arg3: memref<1x256xf32, #tpu.memory_space<vmem>>, %arg4: memref<8x256xbf16, #tpu.memory_space<vmem>>) attributes {dimension_semantics = [#tpu.dimension_semantics<parallel>], iteration_bounds = array<i64: 1>, scalar_prefetch = 0 : i64, scratch_operands = 0 : i64, tpu.core_type = #tpu.core_type<tc>, window_params = [{transform_indices = @transform_0, window_bounds = array<i64: 8, 1152>}, {pipeline_mode = #tpu.pipeline_mode<synchronous>, transform_indices = @transform_1, window_bounds = array<i64: 1152, 256>}, {pipeline_mode = #tpu.pipeline_mode<synchronous>, transform_indices = @transform_2, window_bounds = array<i64: 1, 256>}, {transform_indices = @transform_3, window_bounds = array<i64: 8, 256>}]} {
    %c0 = arith.constant 0 : index
    %c0_0 = arith.constant 0 : index
    %0 = vector.load %arg1[%c0, %c0_0] : memref<8x1152xbf16, #tpu.memory_space<vmem>>, vector<8x1152xbf16>
    %c0_1 = arith.constant 0 : index
    %c0_2 = arith.constant 0 : index
    %1 = vector.load %arg2[%c0_1, %c0_2] : memref<1152x256xbf16, #tpu.memory_space<vmem>>, vector<1152x256xbf16>
    %cst = arith.constant dense<0.000000e+00> : vector<8x256xf32>
    %2 = tpu.matmul %0, %1, %cst {dimension_numbers = #tpu.dot_dimension_numbers<[1], [0], [0], [1], [0, 0, 1, 1], [], []>} : vector<8x1152xbf16>, vector<1152x256xbf16>, vector<8x256xf32> -> vector<8x256xf32>
    %c0_3 = arith.constant 0 : index
    %c0_4 = arith.constant 0 : index
    %3 = vector.load %arg3[%c0_3, %c0_4] : memref<1x256xf32, #tpu.memory_space<vmem>>, vector<1x256xf32>
    %4 = vector.broadcast %3 : vector<1x256xf32> to vector<8x256xf32>
    %5 = arith.addf %2, %4 : vector<8x256xf32>
    %cst_5 = arith.constant 0.000000e+00 : f32
    %6 = vector.broadcast %cst_5 : f32 to vector<8x256xf32>
    %7 = arith.maximumf %5, %6 : vector<8x256xf32>
    %8 = arith.truncf %7 : vector<8x256xf32> to vector<8x256xbf16>
    %c0_6 = arith.constant 0 : index
    %c0_7 = arith.constant 0 : index
    %9 = vector.load %arg4[%c0_6, %c0_7] : memref<8x256xbf16, #tpu.memory_space<vmem>>, vector<8x256xbf16>
    tpu.vector_store %arg4[%c0_6, %c0_7], %8 {strides = array<i32>} : memref<8x256xbf16, #tpu.memory_space<vmem>>, vector<8x256xbf16>,
    return
  }
  func.func @transform_0(%arg0: i32) -> (i32, i32) {
    %c0_i32 = arith.constant 0 : i32
    %c0_i32_0 = arith.constant 0 : i32
    return %arg0, %c0_i32 : i32, i32
  }
  func.func @transform_1(%arg0: i32) -> (i32, i32) {
    %c0_i32 = arith.constant 0 : i32
    %c0_i32_0 = arith.constant 0 : i32
    %c0_i32_1 = arith.constant 0 : i32
    return %c0_i32, %c0_i32_0 : i32, i32
  }
  func.func @transform_2(%arg0: i32) -> (i32, i32) {
    %c0_i32 = arith.constant 0 : i32
    %c0_i32_0 = arith.constant 0 : i32
    %c0_i32_1 = arith.constant 0 : i32
    return %c0_i32, %c0_i32_0 : i32, i32
  }
  func.func @transform_3(%arg0: i32) -> (i32, i32) {
    %c0_i32 = arith.constant 0 : i32
    %c0_i32_0 = arith.constant 0 : i32
    return %arg0, %c0_i32 : i32, i32
  }
}

module attributes {stable_mosaic.version = 11 : i64} {
  func.func @_matmul_shift_relu_kernel(%arg0: i32, %arg1: memref<2x1024xbf16, #tpu.memory_space<vmem>>, %arg2: memref<1024x128xbf16, #tpu.memory_space<vmem>>, %arg3: memref<1x128xf32, #tpu.memory_space<vmem>>, %arg4: memref<2x128xf32, #tpu.memory_space<vmem>>) attributes {dimension_semantics = [#tpu.dimension_semantics<parallel>], iteration_bounds = array<i64: 1>, scalar_prefetch = 0 : i64, scratch_operands = 0 : i64, tpu.core_type = #tpu.core_type<tc>, window_params = [{transform_indices = @transform_0, window_bounds = array<i64: 2, 1024>}, {pipeline_mode = #tpu.pipeline_mode<synchronous>, transform_indices = @transform_1, window_bounds = array<i64: 1024, 128>}, {pipeline_mode = #tpu.pipeline_mode<synchronous>, transform_indices = @transform_2, window_bounds = array<i64: 1, 128>}, {transform_indices = @transform_3, window_bounds = array<i64: 2, 128>}]} {
    %c0 = arith.constant 0 : index
    %c0_0 = arith.constant 0 : index
    %0 = vector.load %arg1[%c0, %c0_0] : memref<2x1024xbf16, #tpu.memory_space<vmem>>, vector<2x1024xbf16>
    %c0_1 = arith.constant 0 : index
    %c0_2 = arith.constant 0 : index
    %1 = vector.load %arg2[%c0_1, %c0_2] : memref<1024x128xbf16, #tpu.memory_space<vmem>>, vector<1024x128xbf16>
    %cst = arith.constant dense<0.000000e+00> : vector<2x128xf32>
    %2 = tpu.matmul %0, %1, %cst {dimension_numbers = #tpu.dot_dimension_numbers<[1], [0], [0], [1], [0, 0, 1, 1], [], []>} : vector<2x1024xbf16>, vector<1024x128xbf16>, vector<2x128xf32> -> vector<2x128xf32>
    %c0_3 = arith.constant 0 : index
    %c0_4 = arith.constant 0 : index
    %3 = vector.load %arg3[%c0_3, %c0_4] : memref<1x128xf32, #tpu.memory_space<vmem>>, vector<1x128xf32>
    %4 = vector.broadcast %3 : vector<1x128xf32> to vector<2x128xf32>
    %5 = arith.addf %2, %4 : vector<2x128xf32>
    %cst_5 = arith.constant 0.000000e+00 : f32
    %6 = vector.broadcast %cst_5 : f32 to vector<2x128xf32>
    %7 = arith.maximumf %5, %6 : vector<2x128xf32>
    %c0_6 = arith.constant 0 : index
    %c0_7 = arith.constant 0 : index
    %8 = vector.load %arg4[%c0_6, %c0_7] : memref<2x128xf32, #tpu.memory_space<vmem>>, vector<2x128xf32>
    tpu.vector_store %arg4[%c0_6, %c0_7], %7 {strides = array<i32>} : memref<2x128xf32, #tpu.memory_space<vmem>>, vector<2x128xf32>,
    return
  }
  func.func @transform_0(%arg0: i32) -> (i32, i32) {
    %c0_i32 = arith.constant 0 : i32
    %c0_i32_0 = arith.constant 0 : i32
    return %arg0, %c0_i32 : i32, i32
  }
  func.func @transform_1(%arg0: i32) -> (i32, i32) {
    %c0_i32 = arith.constant 0 : i32
    %c0_i32_0 = arith.constant 0 : i32
    %c0_i32_1 = arith.constant 0 : i32
    return %c0_i32, %c0_i32_0 : i32, i32
  }
  func.func @transform_2(%arg0: i32) -> (i32, i32) {
    %c0_i32 = arith.constant 0 : i32
    %c0_i32_0 = arith.constant 0 : i32
    %c0_i32_1 = arith.constant 0 : i32
    return %c0_i32, %c0_i32_0 : i32, i32
  }
  func.func @transform_3(%arg0: i32) -> (i32, i32) {
    %c0_i32 = arith.constant 0 : i32
    %c0_i32_0 = arith.constant 0 : i32
    return %arg0, %c0_i32 : i32, i32
  }
}

</mosaic_0001>

<bundles_post_ra>
// kernel: _lambda_.7
= control target key start
LH: loop header
LB: loop body
LE: loop exit
PB: predicated region body
PF: predicated region fallthrough
CT: control target
= control target key end

     0   :  { %s3524_s12 = smov 0   ;;  %s3526_s13 = smov 0   ;;  %s4293_s0 = inlined_call_operand.vmem [shape: bf16[1568,25], index: 0, kind: input, shape index: {}]   ;;  %s4294_s1 = inlined_call_operand.vmem [shape: bf16[25,32], index: 1, kind: input, shape index: {}]   ;;  %s4295_s2 = inlined_call_operand.vmem [shape: f32[1,32], index: 2, kind: input, shape index: {}]   ;;  %s4296_s3 = inlined_call_operand.vmem [shape: bf16[1568,32], index: 3, kind: output, shape index: {}]  }
   0x1   :  { %s3528_s14 = smov 0  }
   0x2 LB: > { %s3537_s15 = sadd.s32 4294967295, %s3469_s14   ;;  %s3539_s16 = sadd.s32 1, %s3469_s14   ;;  %s3469_s14 = sphi %s3528_s14, %s4303_s14   ;;  %s3465_s13 = sphi %s3526_s13, %s4302_s13   ;;  %s3461_s12 = sphi %s3524_s12, %s4301_s12  }
   0x3   : > { %s85_s17 = ssub.s32 %s3469_s14, %s3539_s16  ;;  %s88_s18 = sadd.s32 1, %s3465_s13 }
   0x4   : > { %p86_p0 = scmp.eq.s32.totalorder %s85_s17, 0  ;;  %p98_p1 = scmp.ne.s32.totalorder %s3465_s13, %s3461_s12 }
   0x5   : > { %p99_p2 = scmp.eq.s32.totalorder %s3537_s15, 1  ;;  %p2646_p3 = scmp.ge.s32.totalorder %s3469_s14, 1 }
   0x6   : > { %s3547_s19 = scalar_select %p86_p0, %s3465_s13, %s88_s18  }
   0x7   : > { %p3549_p4 = por %p99_p2, %p98_p1  ;;  %p146_p5 = scmp.lt.s32.totalorder %s3469_s14, 3 }
   0x9   : > { %p147_p6 = pnand %p2646_p3, %p146_p5 }
   0xa   : > { %v3348_v0 = vld [vmem:[%s4294_s1] sm:$0xff] (!%p147_p6)   ;;  %vm856_vm0 = vcmask (!%p147_p6), 1043456   ;;  %v3349_v1 = vld [vmem:[%s4294_s1 + $0x8] sm:$0x1f] (!%p147_p6)   ;;  %vm857_vm1 = vcmask (!%p147_p6), 1044480   ;;  %s3560_s25 = sshll.u32 (!%p147_p6), %s3537_s15, 7 }
   0xb   : > { %150 = sbr.rel (%p147_p6) target bundleno = 458 (0x1ca), region = 32  ;;  %3123 = vmatprep.subr.bf16.mxu0 (!%p147_p6), %v3348_v0  ;;  %3255 = vmatprep.subr.bf16.mxu1 (!%p147_p6), %v3348_v0  ;;  %v3503_v2 = vmov (!%p147_p6), 65535   ;;  %p178_p7 = scmp.lt.s32.totalorder (!%p147_p6), %s3560_s25, 195  ;;  %vm663_vm2 = vcmask (!%p147_p6), 203776   ;;  %vm2048_vm3 = vcmask (!%p147_p6), 257024  }
   0xc   : > { %3124 = vmatpush3.bf16.msra.mxu0 (!%p147_p6), %v3348_v0  ;;  %3257 = vmatpush3.bf16.msra.mxu1 (!%p147_p6), %v3348_v0  ;;  %v858_v3 = vsel (!%p147_p6), %vm856_vm0, 4294967295, %v3503_v2  ;;  %s170_s4 = sand.u32 (!%p147_p6), 1, %s3461_s12  }
   0xd   : > { %v859_v4 = vsel (!%p147_p6), %vm857_vm1, %v858_v3, 0  ;;  %s2647_s7 = sshll.u32 (!%p147_p6), %s170_s4, 9 }
   0xe   : > { %v861_v5 = vand.u32 (!%p147_p6), %v3349_v1, %v859_v4  ;;  %s3711_s8 = scalar_lea.vmem (!%p147_p6), [#allocation2], %s2647_s7  }
  0x10   : > { %3125 = vmatprep.subr.bf16.mxu0 (!%p147_p6), %v861_v5  ;;  %3256 = vmatprep.subr.bf16.mxu1 (!%p147_p6), %v861_v5 }
  0x11   : > { %3126 = vmatpush3.bf16.msra.mxu0 (!%p147_p6), %v861_v5  ;;  %3258 = vmatpush3.bf16.msra.mxu1 (!%p147_p6), %v861_v5 }
  0x12   : > { %s179_s26 = scalar_select %p178_p7, %s3560_s25, 195 }
  0x13   : > { %s2185_s11 = ssub.s32 (%p3549_p4), 196, %s3560_s25  ;;  %s3054_s12 = sshll.u32 (%p3549_p4), %s3537_s15, 9 }
  0x14   : > { %s2649_s27 = sshll.u32 %s179_s26, 2  ;;  %p2186_p8 = scmp.lt.s32.totalorder (%p3549_p4), %s2185_s11, 128 }
  0x15   : > { %s3567_s30 = scalar_lea.vmem %s4293_s0, %s2649_s27  ;;  %s4101_s18 = scalar_lea.vmem (%p3549_p4), %s4296_s3, %s3054_s12  }
  0x16   : > { %v3350_v6 = vld [vmem:[%s3567_s30] sm:$0xff]   ;;  %v3352_v8 = vld [vmem:[%s3567_s30 + $0x8] sm:$0xff]   ;;  %v3354_v10 = vld [vmem:[%s3567_s30 + $0x10] sm:$0xff]  }
  0x17   : > { %v3351_v7 = vld [vmem:[%s3567_s30 + $0x100] sm:$0xff]   ;;  %3127 = vmatprep.mubr.msk.bf16.mxu0 %vm663_vm2, %v3350_v6  ;;  %v3353_v9 = vld [vmem:[%s3567_s30 + $0x108] sm:$0xff]   ;;  %v3355_v11 = vld [vmem:[%s3567_s30 + $0x110] sm:$0xff]  }
  0x18   : > { %3191 = vmatprep.mubr.msk.bf16.mxu1 %vm663_vm2, %v3351_v7  ;;  %3128 = vmatmul.mubr.msk.bf16.vlgmr.msra.gmra.mrb[0].mxu0 %vm663_vm2, %v3352_v8  ;;  %v3356_v12 = vld [vmem:[%s3567_s30 + $0x18] sm:$0xff]   ;;  %v3358_v14 = vld [vmem:[%s3567_s30 + $0x20] sm:$0xff]   ;;  %v3360_v16 = vld [vmem:[%s3567_s30 + $0x28] sm:$0xff]  }
  0x19   : > { %3192 = vmatmul.mubr.msk.bf16.vlgmr.msra.gmra.mrb[0].mxu1 %vm663_vm2, %v3353_v9  ;;  %3131 = vmatprep.mubr.msk.bf16.mxu0 %vm663_vm2, %v3354_v10  ;;  %v3357_v13 = vld [vmem:[%s3567_s30 + $0x118] sm:$0xff]   ;;  %v3359_v15 = vld [vmem:[%s3567_s30 + $0x120] sm:$0xff]   ;;  %v3361_v17 = vld [vmem:[%s3567_s30 + $0x128] sm:$0xff]  }
  0x1a   : > { %3195 = vmatprep.mubr.msk.bf16.mxu1 %vm663_vm2, %v3355_v11  ;;  %v3362_v18 = vld [vmem:[%s3567_s30 + $0x30] sm:$0xff]   ;;  %v3364_v20 = vld [vmem:[%s3567_s30 + $0x38] sm:$0xff]   ;;  %v3366_v22 = vld [vmem:[%s3567_s30 + $0x40] sm:$0xff]  }
  0x1b   : > { %v3363_v19 = vld [vmem:[%s3567_s30 + $0x130] sm:$0xff]   ;;  %v3365_v21 = vld [vmem:[%s3567_s30 + $0x138] sm:$0xff]   ;;  %v3367_v23 = vld [vmem:[%s3567_s30 + $0x140] sm:$0xff]  }
  0x1c   : > { %v3368_v24 = vld [vmem:[%s3567_s30 + $0x48] sm:$0xff]   ;;  %v3370_v26 = vld [vmem:[%s3567_s30 + $0x50] sm:$0xff]   ;;  %v3372_v28 = vld [vmem:[%s3567_s30 + $0x58] sm:$0xff]  }
  0x1d   : > { %v3369_v25 = vld [vmem:[%s3567_s30 + $0x148] sm:$0xff]   ;;  %v3371_v27 = vld [vmem:[%s3567_s30 + $0x150] sm:$0xff]   ;;  %v3373_v29 = vld [vmem:[%s3567_s30 + $0x158] sm:$0xff]  }
  0x1e   : > { %v3374_v30 = vld [vmem:[%s3567_s30 + $0x60] sm:$0xff]   ;;  %v3376_v32 = vld [vmem:[%s3567_s30 + $0x68] sm:$0xff]   ;;  %v3378_v34 = vld [vmem:[%s3567_s30 + $0x70] sm:$0xff]  }
  0x1f   : > { %v3375_v31 = vld [vmem:[%s3567_s30 + $0x160] sm:$0xff]   ;;  %v3377_v33 = vld [vmem:[%s3567_s30 + $0x168] sm:$0xff]   ;;  %v3379_v35 = vld [vmem:[%s3567_s30 + $0x170] sm:$0xff]  }
  0x20   : > { %3132 = vmatmul.mubr.msk.bf16.gmra.mrb[4].mxu0 %vm663_vm2, %v3356_v12  ;;  %v3380_v36 = vld [vmem:[%s3567_s30 + $0x78] sm:$0xff]   ;;  %v3382_v38 = vld [vmem:[%s3567_s30 + $0x80] sm:$0xff]   ;;  %v3384_v40 = vld [vmem:[%s3567_s30 + $0x88] sm:$0xff]  }
  0x21   : > { %3196 = vmatmul.mubr.msk.bf16.gmra.mrb[4].mxu1 %vm663_vm2, %v3357_v13  ;;  %3135 = vmatprep.mubr.msk.bf16.mxu0 %vm663_vm2, %v3358_v14  ;;  %v3381_v37 = vld [vmem:[%s3567_s30 + $0x178] sm:$0xff]   ;;  %v3383_v39 = vld [vmem:[%s3567_s30 + $0x180] sm:$0xff]   ;;  %v3385_v41 = vld [vmem:[%s3567_s30 + $0x188] sm:$0xff]  }
  0x22   : > { %3199 = vmatprep.mubr.msk.bf16.mxu1 %vm663_vm2, %v3359_v15  ;;  %v3386_v42 = vld [vmem:[%s3567_s30 + $0x90] sm:$0xff]   ;;  %v3388_v44 = vld [vmem:[%s3567_s30 + $0x98] sm:$0xff]   ;;  %v3390_v46 = vld [vmem:[%s3567_s30 + $0xa0] sm:$0xff]  }
  0x23   : > { %v3387_v43 = vld [vmem:[%s3567_s30 + $0x190] sm:$0xff]   ;;  %v3389_v45 = vld [vmem:[%s3567_s30 + $0x198] sm:$0xff]   ;;  %v3391_v47 = vld [vmem:[%s3567_s30 + $0x1a0] sm:$0xff]  }
  0x24   : > { %v3392_v48 = vld [vmem:[%s3567_s30 + $0xa8] sm:$0xff]   ;;  %v3394_v50 = vld [vmem:[%s3567_s30 + $0xb0] sm:$0xff]   ;;  %v3396_v52 = vld [vmem:[%s3567_s30 + $0xb8] sm:$0xff]  }
  0x25   : > { %v3393_v49 = vld [vmem:[%s3567_s30 + $0x1a8] sm:$0xff]   ;;  %v3395_v51 = vld [vmem:[%s3567_s30 + $0x1b0] sm:$0xff]   ;;  %v3397_v53 = vld [vmem:[%s3567_s30 + $0x1b8] sm:$0xff]  }
  0x26   : > { %v3398_v54 = vld [vmem:[%s3567_s30 + $0xc0] sm:$0xff]   ;;  %v3400_v56 = vld [vmem:[%s3567_s30 + $0xc8] sm:$0xff]   ;;  %v3402_v58 = vld [vmem:[%s3567_s30 + $0xd0] sm:$0xff]  }
  0x27   : > { %v3399_v55 = vld [vmem:[%s3567_s30 + $0x1c0] sm:$0xff]   ;;  %v3401_v57 = vld [vmem:[%s3567_s30 + $0x1c8] sm:$0xff]   ;;  %v3403_v59 = vld [vmem:[%s3567_s30 + $0x1d0] sm:$0xff]  }
  0x28   : > { %3136 = vmatmul.mubr.msk.bf16.gmra.mrb[8].mxu0 %vm663_vm2, %v3360_v16  ;;  %v3404_v60 = vld [vmem:[%s3567_s30 + $0xd8] sm:$0xff]   ;;  %v3406_v62 = vld [vmem:[%s3567_s30 + $0xe0] sm:$0xff]   ;;  %v3408_v0 = vld [vmem:[%s3567_s30 + $0xe8] sm:$0xff]  }
  0x29   : > { %3200 = vmatmul.mubr.msk.bf16.gmra.mrb[8].mxu1 %vm663_vm2, %v3361_v17  ;;  %3139 = vmatprep.mubr.msk.bf16.mxu0 %vm663_vm2, %v3362_v18  ;;  %v3405_v61 = vld [vmem:[%s3567_s30 + $0x1d8] sm:$0xff]   ;;  %v3407_v63 = vld [vmem:[%s3567_s30 + $0x1e0] sm:$0xff]   ;;  %v3409_v1 = vld [vmem:[%s3567_s30 + $0x1e8] sm:$0xff]  }
  0x2a   : > { %3203 = vmatprep.mubr.msk.bf16.mxu1 %vm663_vm2, %v3363_v19  ;;  %v3410_v2 = vld [vmem:[%s3567_s30 + $0xf0] sm:$0xff]   ;;  %v3412_v4 = vld [vmem:[%s3567_s30 + $0xf8] sm:$0xff]   ;;  %v3701_v6 = vld [vmem:[%s4295_s2] ss:$0 sm:$0xff] }
  0x2b   : > { %v3411_v3 = vld [vmem:[%s3567_s30 + $0x1f0] sm:$0xff]   ;;  %v3413_v5 = vld [vmem:[%s3567_s30 + $0x1f8] sm:$0xff]  }
  0x30   : > { %3140 = vmatmul.mubr.msk.bf16.gmra.mrb[12].mxu0 %vm663_vm2, %v3364_v20 }
  0x31   : > { %3204 = vmatmul.mubr.msk.bf16.gmra.mrb[12].mxu1 %vm663_vm2, %v3365_v21  ;;  %3143 = vmatprep.mubr.msk.bf16.mxu0 %vm663_vm2, %v3366_v22 }
  0x32   : > { %3207 = vmatprep.mubr.msk.bf16.mxu1 %vm663_vm2, %v3367_v23 }
  0x38   : > { %3144 = vmatmul.mubr.msk.bf16.gmra.mrb[16].mxu0 %vm663_vm2, %v3368_v24 }
  0x39   : > { %3208 = vmatmul.mubr.msk.bf16.gmra.mrb[16].mxu1 %vm663_vm2, %v3369_v25  ;;  %3147 = vmatprep.mubr.msk.bf16.mxu0 %vm663_vm2, %v3370_v26 }
  0x3a   : > { %3211 = vmatprep.mubr.msk.bf16.mxu1 %vm663_vm2, %v3371_v27 }
  0x40   : > { %3148 = vmatmul.mubr.msk.bf16.gmra.mrb[20].mxu0 %vm663_vm2, %v3372_v28 }
  0x41   : > { %3212 = vmatmul.mubr.msk.bf16.gmra.mrb[20].mxu1 %vm663_vm2, %v3373_v29  ;;  %3151 = vmatprep.mubr.msk.bf16.mxu0 %vm663_vm2, %v3374_v30 }
  0x42   : > { %3215 = vmatprep.mubr.msk.bf16.mxu1 %vm663_vm2, %v3375_v31 }
  0x48   : > { %3152 = vmatmul.mubr.msk.bf16.gmra.mrb[24].mxu0 %vm663_vm2, %v3376_v32 }
  0x49   : > { %3216 = vmatmul.mubr.msk.bf16.gmra.mrb[24].mxu1 %vm663_vm2, %v3377_v33  ;;  %3155 = vmatprep.mubr.msk.bf16.mxu0 %vm663_vm2, %v3378_v34 }
  0x4a   : > { %3219 = vmatprep.mubr.msk.bf16.mxu1 %vm663_vm2, %v3379_v35 }
  0x50   : > { %3156 = vmatmul.mubr.msk.bf16.gmra.mrb[28].mxu0 %vm663_vm2, %v3380_v36 }
  0x51   : > { %3220 = vmatmul.mubr.msk.bf16.gmra.mrb[28].mxu1 %vm663_vm2, %v3381_v37  ;;  %3159 = vmatprep.mubr.msk.bf16.mxu0 %vm663_vm2, %v3382_v38 }
  0x52   : > { %3223 = vmatprep.mubr.msk.bf16.mxu1 %vm663_vm2, %v3383_v39 }
  0x58   : > { %3160 = vmatmul.mubr.msk.bf16.gmra.mrb[32].mxu0 %vm663_vm2, %v3384_v40 }
  0x59   : > { %3224 = vmatmul.mubr.msk.bf16.gmra.mrb[32].mxu1 %vm663_vm2, %v3385_v41  ;;  %3163 = vmatprep.mubr.msk.bf16.mxu0 %vm663_vm2, %v3386_v42 }
  0x5a   : > { %3227 = vmatprep.mubr.msk.bf16.mxu1 %vm663_vm2, %v3387_v43 }
  0x60   : > { %3164 = vmatmul.mubr.msk.bf16.gmra.mrb[36].mxu0 %vm663_vm2, %v3388_v44 }
  0x61   : > { %3228 = vmatmul.mubr.msk.bf16.gmra.mrb[36].mxu1 %vm663_vm2, %v3389_v45  ;;  %3167 = vmatprep.mubr.msk.bf16.mxu0 %vm663_vm2, %v3390_v46 }
  0x62   : > { %3231 = vmatprep.mubr.msk.bf16.mxu1 %vm663_vm2, %v3391_v47 }
  0x68   : > { %3168 = vmatmul.mubr.msk.bf16.gmra.mrb[40].mxu0 %vm663_vm2, %v3392_v48 }
  0x69   : > { %3232 = vmatmul.mubr.msk.bf16.gmra.mrb[40].mxu1 %vm663_vm2, %v3393_v49  ;;  %3171 = vmatprep.mubr.msk.bf16.mxu0 %vm663_vm2, %v3394_v50 }
  0x6a   : > { %3235 = vmatprep.mubr.msk.bf16.mxu1 %vm663_vm2, %v3395_v51 }
  0x70   : > { %3172 = vmatmul.mubr.msk.bf16.gmra.mrb[44].mxu0 %vm663_vm2, %v3396_v52 }
  0x71   : > { %3236 = vmatmul.mubr.msk.bf16.gmra.mrb[44].mxu1 %vm663_vm2, %v3397_v53  ;;  %3175 = vmatprep.mubr.msk.bf16.mxu0 %vm663_vm2, %v3398_v54 }
  0x72   : > { %3239 = vmatprep.mubr.msk.bf16.mxu1 %vm663_vm2, %v3399_v55 }
  0x78   : > { %3176 = vmatmul.mubr.msk.bf16.gmra.mrb[48].mxu0 %vm663_vm2, %v3400_v56 }
  0x79   : > { %3240 = vmatmul.mubr.msk.bf16.gmra.mrb[48].mxu1 %vm663_vm2, %v3401_v57  ;;  %3179 = vmatprep.mubr.msk.bf16.mxu0 %vm663_vm2, %v3402_v58 }
  0x7a   : > { %3243 = vmatprep.mubr.msk.bf16.mxu1 %vm663_vm2, %v3403_v59 }
  0x80   : > { %3180 = vmatmul.mubr.msk.bf16.gmra.mrb[52].mxu0 %vm663_vm2, %v3404_v60 }
  0x81   : > { %3244 = vmatmul.mubr.msk.bf16.gmra.mrb[52].mxu1 %vm663_vm2, %v3405_v61  ;;  %3183 = vmatprep.mubr.msk.bf16.mxu0 %vm663_vm2, %v3406_v62 }
  0x82   : > { %3247 = vmatprep.mubr.msk.bf16.mxu1 %vm663_vm2, %v3407_v63 }
  0x88   : > { %3184 = vmatmul.mubr.msk.bf16.gmra.mrb[56].mxu0 %vm663_vm2, %v3408_v0 }
  0x89   : > { %3248 = vmatmul.mubr.msk.bf16.gmra.mrb[56].mxu1 %vm663_vm2, %v3409_v1  ;;  %3187 = vmatprep.mubr.msk.bf16.mxu0 %vm663_vm2, %v3410_v2 }
  0x8a   : > { %3251 = vmatprep.mubr.msk.bf16.mxu1 %vm663_vm2, %v3411_v3 }
  0x90   : > { %3188 = vmatmul.mubr.msk.bf16.gmra.mrb[60].mxu0 %vm663_vm2, %v3412_v4 }
  0x91   : > { %3252 = vmatmul.mubr.msk.bf16.gmra.mrb[60].mxu1 %vm663_vm2, %v3413_v5 }
  0xeb   : > { %v3129_v7 = vpop.f32.mrb[0].mxu0 }
  0xec   : > { %v906_v8 = vadd.f32 %v3129_v7, %v3701_v6  ;;  %v3193_v9 = vpop.f32.mrb[0].mxu1  ;;  %v897_v10 = vpop.f32.mrb[1].mxu0 }
  0xed   : > { %v1162_v11 = vadd.f32 %v3193_v9, %v3701_v6  ;;  %v898_v12 = vadd.f32 %v3701_v6, %v897_v10  ;;  %v1153_v13 = vpop.f32.mrb[1].mxu1  ;;  %v3130_v14 = vpop.f32.mrb[2].mxu0 }
  0xee   : > { %v1410_v15 = vmax.f32 %v906_v8, 0.0  ;;  %v1154_v16 = vadd.f32 %v3701_v6, %v1153_v13  ;;  %v909_v17 = vadd.f32 %v3130_v14, %v3701_v6  ;;  %v3194_v18 = vpop.f32.mrb[2].mxu1  ;;  %v900_v19 = vpop.f32.mrb[3].mxu0 }
  0xef   : > { %v1474_v20 = vmax.f32 %v1162_v11, 0.0  ;;  %v1408_v21 = vmax.f32 %v898_v12, 0.0  ;;  %v1165_v22 = vadd.f32 %v3194_v18, %v3701_v6  ;;  %v901_v23 = vadd.f32 %v3701_v6, %v900_v19  ;;  %v1156_v24 = vpop.f32.mrb[3].mxu1 }
  0xf0   : > { %v2928_v25 = vpack.c.bf16 %v1410_v15, %v1410_v15  ;;  %v1472_v26 = vmax.f32 %v1154_v16, 0.0  ;;  %v1411_v27 = vmax.f32 %v909_v17, 0.0  ;;  %v1157_v28 = vadd.f32 %v3701_v6, %v1156_v24 }
  0xf1   : > { %v2992_v29 = vpack.c.bf16 %v1474_v20, %v1474_v20  ;;  %v2926_v30 = vpack.c.bf16 %v1408_v21, %v1408_v21  ;;  %v1475_v31 = vmax.f32 %v1165_v22, 0.0  ;;  %v1409_v32 = vmax.f32 %v901_v23, 0.0 }
  0xf2   : > { %2051 = vst.msk [vmem:[%s3711_s8 + $0x8] sm:$0xf] %vm2048_vm3, %v2928_v25  ;;  %v2990_v33 = vpack.c.bf16 %v1472_v26, %v1472_v26  ;;  %v2929_v34 = vpack.c.bf16 %v1411_v27, %v1411_v27  ;;  %v1473_v35 = vmax.f32 %v1157_v28, 0.0 }
  0xf3   : > { %2115 = vst.msk [vmem:[%s3711_s8 + $0x108] sm:$0xf] %vm2048_vm3, %v2992_v29  ;;  %2049 = vst.msk [vmem:[%s3711_s8] sm:$0xf] %vm2048_vm3, %v2926_v30  ;;  %v2993_v36 = vpack.c.bf16 %v1475_v31, %v1475_v31  ;;  %v2927_v37 = vpack.c.bf16 %v1409_v32, %v1409_v32  ;;  %v3133_v38 = vpop.f32.mrb[4].mxu0 }
  0xf4   : > { %2113 = vst.msk [vmem:[%s3711_s8 + $0x100] sm:$0xf] %vm2048_vm3, %v2990_v33  ;;  %2052 = vst.msk [vmem:[%s3711_s8 + $0xc] sm:$0xf] %vm2048_vm3, %v2929_v34  ;;  %v2991_v39 = vpack.c.bf16 %v1473_v35, %v1473_v35  ;;  %v922_v40 = vadd.f32 %v3133_v38, %v3701_v6  ;;  %v3197_v41 = vpop.f32.mrb[4].mxu1  ;;  %v913_v42 = vpop.f32.mrb[5].mxu0 }
  0xf5   : > { %2116 = vst.msk [vmem:[%s3711_s8 + $0x10c] sm:$0xf] %vm2048_vm3, %v2993_v36  ;;  %2050 = vst.msk [vmem:[%s3711_s8 + $0x4] sm:$0xf] %vm2048_vm3, %v2927_v37  ;;  %v1178_v43 = vadd.f32 %v3197_v41, %v3701_v6  ;;  %v914_v44 = vadd.f32 %v3701_v6, %v913_v42  ;;  %v1169_v45 = vpop.f32.mrb[5].mxu1  ;;  %v3134_v46 = vpop.f32.mrb[6].mxu0 }
  0xf6   : > { %2114 = vst.msk [vmem:[%s3711_s8 + $0x104] sm:$0xf] %vm2048_vm3, %v2991_v39  ;;  %v1414_v47 = vmax.f32 %v922_v40, 0.0  ;;  %v1170_v48 = vadd.f32 %v3701_v6, %v1169_v45  ;;  %v925_v49 = vadd.f32 %v3134_v46, %v3701_v6  ;;  %v3198_v50 = vpop.f32.mrb[6].mxu1  ;;  %v916_v51 = vpop.f32.mrb[7].mxu0 }
  0xf7   : > { %v1478_v52 = vmax.f32 %v1178_v43, 0.0  ;;  %v1412_v53 = vmax.f32 %v914_v44, 0.0  ;;  %v1181_v54 = vadd.f32 %v3198_v50, %v3701_v6  ;;  %v917_v55 = vadd.f32 %v3701_v6, %v916_v51  ;;  %v1172_v56 = vpop.f32.mrb[7].mxu1 }
  0xf8   : > { %v2932_v57 = vpack.c.bf16 %v1414_v47, %v1414_v47  ;;  %v1476_v58 = vmax.f32 %v1170_v48, 0.0  ;;  %v1415_v59 = vmax.f32 %v925_v49, 0.0  ;;  %v1173_v60 = vadd.f32 %v3701_v6, %v1172_v56 }
  0xf9   : > { %v2996_v61 = vpack.c.bf16 %v1478_v52, %v1478_v52  ;;  %v2930_v62 = vpack.c.bf16 %v1412_v53, %v1412_v53  ;;  %v1479_v63 = vmax.f32 %v1181_v54, 0.0  ;;  %v1413_v0 = vmax.f32 %v917_v55, 0.0 }
  0xfa   : > { %2055 = vst.msk [vmem:[%s3711_s8 + $0x18] sm:$0xf] %vm2048_vm3, %v2932_v57  ;;  %v2994_v1 = vpack.c.bf16 %v1476_v58, %v1476_v58  ;;  %v2933_v2 = vpack.c.bf16 %v1415_v59, %v1415_v59  ;;  %v1477_v3 = vmax.f32 %v1173_v60, 0.0 }
  0xfb   : > { %2119 = vst.msk [vmem:[%s3711_s8 + $0x118] sm:$0xf] %vm2048_vm3, %v2996_v61  ;;  %2053 = vst.msk [vmem:[%s3711_s8 + $0x10] sm:$0xf] %vm2048_vm3, %v2930_v62  ;;  %v2997_v4 = vpack.c.bf16 %v1479_v63, %v1479_v63  ;;  %v2931_v5 = vpack.c.bf16 %v1413_v0, %v1413_v0  ;;  %v3137_v7 = vpop.f32.mrb[8].mxu0 }
  0xfc   : > { %2117 = vst.msk [vmem:[%s3711_s8 + $0x110] sm:$0xf] %vm2048_vm3, %v2994_v1  ;;  %2056 = vst.msk [vmem:[%s3711_s8 + $0x1c] sm:$0xf] %vm2048_vm3, %v2933_v2  ;;  %v2995_v8 = vpack.c.bf16 %v1477_v3, %v1477_v3  ;;  %v938_v9 = vadd.f32 %v3137_v7, %v3701_v6  ;;  %v3201_v10 = vpop.f32.mrb[8].mxu1  ;;  %v929_v11 = vpop.f32.mrb[9].mxu0 }
  0xfd   : > { %2120 = vst.msk [vmem:[%s3711_s8 + $0x11c] sm:$0xf] %vm2048_vm3, %v2997_v4  ;;  %2054 = vst.msk [vmem:[%s3711_s8 + $0x14] sm:$0xf] %vm2048_vm3, %v2931_v5  ;;  %v1194_v12 = vadd.f32 %v3201_v10, %v3701_v6  ;;  %v930_v13 = vadd.f32 %v3701_v6, %v929_v11  ;;  %v1185_v14 = vpop.f32.mrb[9].mxu1  ;;  %v3138_v15 = vpop.f32.mrb[10].mxu0 }
  0xfe   : > { %2118 = vst.msk [vmem:[%s3711_s8 + $0x114] sm:$0xf] %vm2048_vm3, %v2995_v8  ;;  %v1418_v16 = vmax.f32 %v938_v9, 0.0  ;;  %v1186_v17 = vadd.f32 %v3701_v6, %v1185_v14  ;;  %v941_v18 = vadd.f32 %v3138_v15, %v3701_v6  ;;  %v3202_v19 = vpop.f32.mrb[10].mxu1  ;;  %v932_v20 = vpop.f32.mrb[11].mxu0 }
  0xff   : > { %v1482_v21 = vmax.f32 %v1194_v12, 0.0  ;;  %v1416_v22 = vmax.f32 %v930_v13, 0.0  ;;  %v1197_v23 = vadd.f32 %v3202_v19, %v3701_v6  ;;  %v933_v24 = vadd.f32 %v3701_v6, %v932_v20  ;;  %v1188_v25 = vpop.f32.mrb[11].mxu1 }
 0x100   : > { %v2936_v26 = vpack.c.bf16 %v1418_v16, %v1418_v16  ;;  %v1480_v27 = vmax.f32 %v1186_v17, 0.0  ;;  %v1419_v28 = vmax.f32 %v941_v18, 0.0  ;;  %v1189_v29 = vadd.f32 %v3701_v6, %v1188_v25 }
 0x101   : > { %v3000_v30 = vpack.c.bf16 %v1482_v21, %v1482_v21  ;;  %v2934_v31 = vpack.c.bf16 %v1416_v22, %v1416_v22  ;;  %v1483_v32 = vmax.f32 %v1197_v23, 0.0  ;;  %v1417_v33 = vmax.f32 %v933_v24, 0.0 }
 0x102   : > { %2059 = vst.msk [vmem:[%s3711_s8 + $0x28] sm:$0xf] %vm2048_vm3, %v2936_v26  ;;  %v2998_v34 = vpack.c.bf16 %v1480_v27, %v1480_v27  ;;  %v2937_v35 = vpack.c.bf16 %v1419_v28, %v1419_v28  ;;  %v1481_v36 = vmax.f32 %v1189_v29, 0.0 }
 0x103   : > { %2123 = vst.msk [vmem:[%s3711_s8 + $0x128] sm:$0xf] %vm2048_vm3, %v3000_v30  ;;  %2057 = vst.msk [vmem:[%s3711_s8 + $0x20] sm:$0xf] %vm2048_vm3, %v2934_v31  ;;  %v3001_v37 = vpack.c.bf16 %v1483_v32, %v1483_v32  ;;  %v2935_v38 = vpack.c.bf16 %v1417_v33, %v1417_v33  ;;  %v3141_v39 = vpop.f32.mrb[12].mxu0 }
 0x104   : > { %2121 = vst.msk [vmem:[%s3711_s8 + $0x120] sm:$0xf] %vm2048_vm3, %v2998_v34  ;;  %2060 = vst.msk [vmem:[%s3711_s8 + $0x2c] sm:$0xf] %vm2048_vm3, %v2937_v35  ;;  %v2999_v40 = vpack.c.bf16 %v1481_v36, %v1481_v36  ;;  %v954_v41 = vadd.f32 %v3141_v39, %v3701_v6  ;;  %v3205_v42 = vpop.f32.mrb[12].mxu1  ;;  %v945_v43 = vpop.f32.mrb[13].mxu0 }
 0x105   : > { %2124 = vst.msk [vmem:[%s3711_s8 + $0x12c] sm:$0xf] %vm2048_vm3, %v3001_v37  ;;  %2058 = vst.msk [vmem:[%s3711_s8 + $0x24] sm:$0xf] %vm2048_vm3, %v2935_v38  ;;  %v1210_v44 = vadd.f32 %v3205_v42, %v3701_v6  ;;  %v946_v45 = vadd.f32 %v3701_v6, %v945_v43  ;;  %v1201_v46 = vpop.f32.mrb[13].mxu1  ;;  %v3142_v47 = vpop.f32.mrb[14].mxu0 }
 0x106   : > { %2122 = vst.msk [vmem:[%s3711_s8 + $0x124] sm:$0xf] %vm2048_vm3, %v2999_v40  ;;  %v1422_v48 = vmax.f32 %v954_v41, 0.0  ;;  %v1202_v49 = vadd.f32 %v3701_v6, %v1201_v46  ;;  %v957_v50 = vadd.f32 %v3142_v47, %v3701_v6  ;;  %v3206_v51 = vpop.f32.mrb[14].mxu1  ;;  %v948_v52 = vpop.f32.mrb[15].mxu0 }
 0x107   : > { %v1486_v53 = vmax.f32 %v1210_v44, 0.0  ;;  %v1420_v54 = vmax.f32 %v946_v45, 0.0  ;;  %v1213_v55 = vadd.f32 %v3206_v51, %v3701_v6  ;;  %v949_v56 = vadd.f32 %v3701_v6, %v948_v52  ;;  %v1204_v57 = vpop.f32.mrb[15].mxu1 }
 0x108   : > { %v2940_v58 = vpack.c.bf16 %v1422_v48, %v1422_v48  ;;  %v1484_v59 = vmax.f32 %v1202_v49, 0.0  ;;  %v1423_v60 = vmax.f32 %v957_v50, 0.0  ;;  %v1205_v61 = vadd.f32 %v3701_v6, %v1204_v57 }
 0x109   : > { %v3004_v62 = vpack.c.bf16 %v1486_v53, %v1486_v53  ;;  %v2938_v63 = vpack.c.bf16 %v1420_v54, %v1420_v54  ;;  %v1487_v0 = vmax.f32 %v1213_v55, 0.0  ;;  %v1421_v1 = vmax.f32 %v949_v56, 0.0 }
 0x10a   : > { %2063 = vst.msk [vmem:[%s3711_s8 + $0x38] sm:$0xf] %vm2048_vm3, %v2940_v58  ;;  %v3002_v2 = vpack.c.bf16 %v1484_v59, %v1484_v59  ;;  %v2941_v3 = vpack.c.bf16 %v1423_v60, %v1423_v60  ;;  %v1485_v4 = vmax.f32 %v1205_v61, 0.0 }
 0x10b   : > { %2127 = vst.msk [vmem:[%s3711_s8 + $0x138] sm:$0xf] %vm2048_vm3, %v3004_v62  ;;  %2061 = vst.msk [vmem:[%s3711_s8 + $0x30] sm:$0xf] %vm2048_vm3, %v2938_v63  ;;  %v3005_v5 = vpack.c.bf16 %v1487_v0, %v1487_v0  ;;  %v2939_v7 = vpack.c.bf16 %v1421_v1, %v1421_v1  ;;  %v3145_v8 = vpop.f32.mrb[16].mxu0 }
 0x10c   : > { %2125 = vst.msk [vmem:[%s3711_s8 + $0x130] sm:$0xf] %vm2048_vm3, %v3002_v2  ;;  %2064 = vst.msk [vmem:[%s3711_s8 + $0x3c] sm:$0xf] %vm2048_vm3, %v2941_v3  ;;  %v3003_v9 = vpack.c.bf16 %v1485_v4, %v1485_v4  ;;  %v970_v10 = vadd.f32 %v3145_v8, %v3701_v6  ;;  %v3209_v11 = vpop.f32.mrb[16].mxu1  ;;  %v961_v12 = vpop.f32.mrb[17].mxu0 }
 0x10d   : > { %2128 = vst.msk [vmem:[%s3711_s8 + $0x13c] sm:$0xf] %vm2048_vm3, %v3005_v5  ;;  %2062 = vst.msk [vmem:[%s3711_s8 + $0x34] sm:$0xf] %vm2048_vm3, %v2939_v7  ;;  %v1226_v13 = vadd.f32 %v3209_v11, %v3701_v6  ;;  %v962_v14 = vadd.f32 %v3701_v6, %v961_v12  ;;  %v1217_v15 = vpop.f32.mrb[17].mxu1  ;;  %v3146_v16 = vpop.f32.mrb[18].mxu0 }
 0x10e   : > { %2126 = vst.msk [vmem:[%s3711_s8 + $0x134] sm:$0xf] %vm2048_vm3, %v3003_v9  ;;  %v1426_v17 = vmax.f32 %v970_v10, 0.0  ;;  %v1218_v18 = vadd.f32 %v3701_v6, %v1217_v15  ;;  %v973_v19 = vadd.f32 %v3146_v16, %v3701_v6  ;;  %v3210_v20 = vpop.f32.mrb[18].mxu1  ;;  %v964_v21 = vpop.f32.mrb[19].mxu0 }
 0x10f   : > { %v1490_v22 = vmax.f32 %v1226_v13, 0.0  ;;  %v1424_v23 = vmax.f32 %v962_v14, 0.0  ;;  %v1229_v24 = vadd.f32 %v3210_v20, %v3701_v6  ;;  %v965_v25 = vadd.f32 %v3701_v6, %v964_v21  ;;  %v1220_v26 = vpop.f32.mrb[19].mxu1 }
 0x110   : > { %v2944_v27 = vpack.c.bf16 %v1426_v17, %v1426_v17  ;;  %v1488_v28 = vmax.f32 %v1218_v18, 0.0  ;;  %v1427_v29 = vmax.f32 %v973_v19, 0.0  ;;  %v1221_v30 = vadd.f32 %v3701_v6, %v1220_v26 }
 0x111   : > { %v3008_v31 = vpack.c.bf16 %v1490_v22, %v1490_v22  ;;  %v2942_v32 = vpack.c.bf16 %v1424_v23, %v1424_v23  ;;  %v1491_v33 = vmax.f32 %v1229_v24, 0.0  ;;  %v1425_v34 = vmax.f32 %v965_v25, 0.0 }
 0x112   : > { %2067 = vst.msk [vmem:[%s3711_s8 + $0x48] sm:$0xf] %vm2048_vm3, %v2944_v27  ;;  %v3006_v35 = vpack.c.bf16 %v1488_v28, %v1488_v28  ;;  %v2945_v36 = vpack.c.bf16 %v1427_v29, %v1427_v29  ;;  %v1489_v37 = vmax.f32 %v1221_v30, 0.0 }
 0x113   : > { %2131 = vst.msk [vmem:[%s3711_s8 + $0x148] sm:$0xf] %vm2048_vm3, %v3008_v31  ;;  %2065 = vst.msk [vmem:[%s3711_s8 + $0x40] sm:$0xf] %vm2048_vm3, %v2942_v32  ;;  %v3009_v38 = vpack.c.bf16 %v1491_v33, %v1491_v33  ;;  %v2943_v39 = vpack.c.bf16 %v1425_v34, %v1425_v34  ;;  %v3149_v40 = vpop.f32.mrb[20].mxu0 }
 0x114   : > { %2129 = vst.msk [vmem:[%s3711_s8 + $0x140] sm:$0xf] %vm2048_vm3, %v3006_v35  ;;  %2068 = vst.msk [vmem:[%s3711_s8 + $0x4c] sm:$0xf] %vm2048_vm3, %v2945_v36  ;;  %v3007_v41 = vpack.c.bf16 %v1489_v37, %v1489_v37  ;;  %v986_v42 = vadd.f32 %v3149_v40, %v3701_v6  ;;  %v3213_v43 = vpop.f32.mrb[20].mxu1  ;;  %v977_v44 = vpop.f32.mrb[21].mxu0 }
 0x115   : > { %2132 = vst.msk [vmem:[%s3711_s8 + $0x14c] sm:$0xf] %vm2048_vm3, %v3009_v38  ;;  %2066 = vst.msk [vmem:[%s3711_s8 + $0x44] sm:$0xf] %vm2048_vm3, %v2943_v39  ;;  %v1242_v45 = vadd.f32 %v3213_v43, %v3701_v6  ;;  %v978_v46 = vadd.f32 %v3701_v6, %v977_v44  ;;  %v1233_v47 = vpop.f32.mrb[21].mxu1  ;;  %v3150_v48 = vpop.f32.mrb[22].mxu0 }
 0x116   : > { %2130 = vst.msk [vmem:[%s3711_s8 + $0x144] sm:$0xf] %vm2048_vm3, %v3007_v41  ;;  %v1430_v49 = vmax.f32 %v986_v42, 0.0  ;;  %v1234_v50 = vadd.f32 %v3701_v6, %v1233_v47  ;;  %v989_v51 = vadd.f32 %v3150_v48, %v3701_v6  ;;  %v3214_v52 = vpop.f32.mrb[22].mxu1  ;;  %v980_v53 = vpop.f32.mrb[23].mxu0 }
 0x117   : > { %v1494_v54 = vmax.f32 %v1242_v45, 0.0  ;;  %v1428_v55 = vmax.f32 %v978_v46, 0.0  ;;  %v1245_v56 = vadd.f32 %v3214_v52, %v3701_v6  ;;  %v981_v57 = vadd.f32 %v3701_v6, %v980_v53  ;;  %v1236_v58 = vpop.f32.mrb[23].mxu1 }
 0x118   : > { %v2948_v59 = vpack.c.bf16 %v1430_v49, %v1430_v49  ;;  %v1492_v60 = vmax.f32 %v1234_v50, 0.0  ;;  %v1431_v61 = vmax.f32 %v989_v51, 0.0  ;;  %v1237_v62 = vadd.f32 %v3701_v6, %v1236_v58 }
 0x119   : > { %v3012_v63 = vpack.c.bf16 %v1494_v54, %v1494_v54  ;;  %v2946_v0 = vpack.c.bf16 %v1428_v55, %v1428_v55  ;;  %v1495_v1 = vmax.f32 %v1245_v56, 0.0  ;;  %v1429_v2 = vmax.f32 %v981_v57, 0.0 }
 0x11a   : > { %2071 = vst.msk [vmem:[%s3711_s8 + $0x58] sm:$0xf] %vm2048_vm3, %v2948_v59  ;;  %v3010_v3 = vpack.c.bf16 %v1492_v60, %v1492_v60  ;;  %v2949_v4 = vpack.c.bf16 %v1431_v61, %v1431_v61  ;;  %v1493_v5 = vmax.f32 %v1237_v62, 0.0 }
 0x11b   : > { %2135 = vst.msk [vmem:[%s3711_s8 + $0x158] sm:$0xf] %vm2048_vm3, %v3012_v63  ;;  %2069 = vst.msk [vmem:[%s3711_s8 + $0x50] sm:$0xf] %vm2048_vm3, %v2946_v0  ;;  %v3013_v7 = vpack.c.bf16 %v1495_v1, %v1495_v1  ;;  %v2947_v8 = vpack.c.bf16 %v1429_v2, %v1429_v2  ;;  %v3153_v9 = vpop.f32.mrb[24].mxu0 }
 0x11c   : > { %2133 = vst.msk [vmem:[%s3711_s8 + $0x150] sm:$0xf] %vm2048_vm3, %v3010_v3  ;;  %2072 = vst.msk [vmem:[%s3711_s8 + $0x5c] sm:$0xf] %vm2048_vm3, %v2949_v4  ;;  %v3011_v10 = vpack.c.bf16 %v1493_v5, %v1493_v5  ;;  %v1002_v11 = vadd.f32 %v3153_v9, %v3701_v6  ;;  %v3217_v12 = vpop.f32.mrb[24].mxu1  ;;  %v993_v13 = vpop.f32.mrb[25].mxu0 }
 0x11d   : > { %2136 = vst.msk [vmem:[%s3711_s8 + $0x15c] sm:$0xf] %vm2048_vm3, %v3013_v7  ;;  %2070 = vst.msk [vmem:[%s3711_s8 + $0x54] sm:$0xf] %vm2048_vm3, %v2947_v8  ;;  %v1258_v14 = vadd.f32 %v3217_v12, %v3701_v6  ;;  %v994_v15 = vadd.f32 %v3701_v6, %v993_v13  ;;  %v1249_v16 = vpop.f32.mrb[25].mxu1  ;;  %v3154_v17 = vpop.f32.mrb[26].mxu0 }
 0x11e   : > { %2134 = vst.msk [vmem:[%s3711_s8 + $0x154] sm:$0xf] %vm2048_vm3, %v3011_v10  ;;  %v1434_v18 = vmax.f32 %v1002_v11, 0.0  ;;  %v1250_v19 = vadd.f32 %v3701_v6, %v1249_v16  ;;  %v1005_v20 = vadd.f32 %v3154_v17, %v3701_v6  ;;  %v3218_v21 = vpop.f32.mrb[26].mxu1  ;;  %v996_v22 = vpop.f32.mrb[27].mxu0 }
 0x11f   : > { %v1498_v23 = vmax.f32 %v1258_v14, 0.0  ;;  %v1432_v24 = vmax.f32 %v994_v15, 0.0  ;;  %v1261_v25 = vadd.f32 %v3218_v21, %v3701_v6  ;;  %v997_v26 = vadd.f32 %v3701_v6, %v996_v22  ;;  %v1252_v27 = vpop.f32.mrb[27].mxu1 }
 0x120   : > { %v2952_v28 = vpack.c.bf16 %v1434_v18, %v1434_v18  ;;  %v1496_v29 = vmax.f32 %v1250_v19, 0.0  ;;  %v1435_v30 = vmax.f32 %v1005_v20, 0.0  ;;  %v1253_v31 = vadd.f32 %v3701_v6, %v1252_v27 }
 0x121   : > { %v3016_v32 = vpack.c.bf16 %v1498_v23, %v1498_v23  ;;  %v2950_v33 = vpack.c.bf16 %v1432_v24, %v1432_v24  ;;  %v1499_v34 = vmax.f32 %v1261_v25, 0.0  ;;  %v1433_v35 = vmax.f32 %v997_v26, 0.0 }
 0x122   : > { %2075 = vst.msk [vmem:[%s3711_s8 + $0x68] sm:$0xf] %vm2048_vm3, %v2952_v28  ;;  %v3014_v36 = vpack.c.bf16 %v1496_v29, %v1496_v29  ;;  %v2953_v37 = vpack.c.bf16 %v1435_v30, %v1435_v30  ;;  %v1497_v38 = vmax.f32 %v1253_v31, 0.0 }
 0x123   : > { %2139 = vst.msk [vmem:[%s3711_s8 + $0x168] sm:$0xf] %vm2048_vm3, %v3016_v32  ;;  %2073 = vst.msk [vmem:[%s3711_s8 + $0x60] sm:$0xf] %vm2048_vm3, %v2950_v33  ;;  %v3017_v39 = vpack.c.bf16 %v1499_v34, %v1499_v34  ;;  %v2951_v40 = vpack.c.bf16 %v1433_v35, %v1433_v35  ;;  %v3157_v41 = vpop.f32.mrb[28].mxu0 }
 0x124   : > { %2137 = vst.msk [vmem:[%s3711_s8 + $0x160] sm:$0xf] %vm2048_vm3, %v3014_v36  ;;  %2076 = vst.msk [vmem:[%s3711_s8 + $0x6c] sm:$0xf] %vm2048_vm3, %v2953_v37  ;;  %v3015_v42 = vpack.c.bf16 %v1497_v38, %v1497_v38  ;;  %v1018_v43 = vadd.f32 %v3157_v41, %v3701_v6  ;;  %v3221_v44 = vpop.f32.mrb[28].mxu1  ;;  %v1009_v45 = vpop.f32.mrb[29].mxu0 }
 0x125   : > { %2140 = vst.msk [vmem:[%s3711_s8 + $0x16c] sm:$0xf] %vm2048_vm3, %v3017_v39  ;;  %2074 = vst.msk [vmem:[%s3711_s8 + $0x64] sm:$0xf] %vm2048_vm3, %v2951_v40  ;;  %v1274_v46 = vadd.f32 %v3221_v44, %v3701_v6  ;;  %v1010_v47 = vadd.f32 %v3701_v6, %v1009_v45  ;;  %v1265_v48 = vpop.f32.mrb[29].mxu1  ;;  %v3158_v49 = vpop.f32.mrb[30].mxu0 }
 0x126   : > { %2138 = vst.msk [vmem:[%s3711_s8 + $0x164] sm:$0xf] %vm2048_vm3, %v3015_v42  ;;  %v1438_v50 = vmax.f32 %v1018_v43, 0.0  ;;  %v1266_v51 = vadd.f32 %v3701_v6, %v1265_v48  ;;  %v1021_v52 = vadd.f32 %v3158_v49, %v3701_v6  ;;  %v3222_v53 = vpop.f32.mrb[30].mxu1  ;;  %v1012_v54 = vpop.f32.mrb[31].mxu0 }
 0x127   : > { %v1502_v55 = vmax.f32 %v1274_v46, 0.0  ;;  %v1436_v56 = vmax.f32 %v1010_v47, 0.0  ;;  %v1277_v57 = vadd.f32 %v3222_v53, %v3701_v6  ;;  %v1013_v58 = vadd.f32 %v3701_v6, %v1012_v54  ;;  %v1268_v59 = vpop.f32.mrb[31].mxu1 }
 0x128   : > { %v2956_v60 = vpack.c.bf16 %v1438_v50, %v1438_v50  ;;  %v1500_v61 = vmax.f32 %v1266_v51, 0.0  ;;  %v1439_v62 = vmax.f32 %v1021_v52, 0.0  ;;  %v1269_v63 = vadd.f32 %v3701_v6, %v1268_v59 }
 0x129   : > { %v3020_v0 = vpack.c.bf16 %v1502_v55, %v1502_v55  ;;  %v2954_v1 = vpack.c.bf16 %v1436_v56, %v1436_v56  ;;  %v1503_v2 = vmax.f32 %v1277_v57, 0.0  ;;  %v1437_v3 = vmax.f32 %v1013_v58, 0.0 }
 0x12a   : > { %2079 = vst.msk [vmem:[%s3711_s8 + $0x78] sm:$0xf] %vm2048_vm3, %v2956_v60  ;;  %v3018_v4 = vpack.c.bf16 %v1500_v61, %v1500_v61  ;;  %v2957_v5 = vpack.c.bf16 %v1439_v62, %v1439_v62  ;;  %v1501_v7 = vmax.f32 %v1269_v63, 0.0 }
 0x12b   : > { %2143 = vst.msk [vmem:[%s3711_s8 + $0x178] sm:$0xf] %vm2048_vm3, %v3020_v0  ;;  %2077 = vst.msk [vmem:[%s3711_s8 + $0x70] sm:$0xf] %vm2048_vm3, %v2954_v1  ;;  %v3021_v8 = vpack.c.bf16 %v1503_v2, %v1503_v2  ;;  %v2955_v9 = vpack.c.bf16 %v1437_v3, %v1437_v3  ;;  %v3161_v10 = vpop.f32.mrb[32].mxu0 }
 0x12c   : > { %2141 = vst.msk [vmem:[%s3711_s8 + $0x170] sm:$0xf] %vm2048_vm3, %v3018_v4  ;;  %2080 = vst.msk [vmem:[%s3711_s8 + $0x7c] sm:$0xf] %vm2048_vm3, %v2957_v5  ;;  %v3019_v11 = vpack.c.bf16 %v1501_v7, %v1501_v7  ;;  %v1034_v12 = vadd.f32 %v3161_v10, %v3701_v6  ;;  %v3225_v13 = vpop.f32.mrb[32].mxu1  ;;  %v1025_v14 = vpop.f32.mrb[33].mxu0 }
 0x12d   : > { %2144 = vst.msk [vmem:[%s3711_s8 + $0x17c] sm:$0xf] %vm2048_vm3, %v3021_v8  ;;  %2078 = vst.msk [vmem:[%s3711_s8 + $0x74] sm:$0xf] %vm2048_vm3, %v2955_v9  ;;  %v1290_v15 = vadd.f32 %v3225_v13, %v3701_v6  ;;  %v1026_v16 = vadd.f32 %v3701_v6, %v1025_v14  ;;  %v1281_v17 = vpop.f32.mrb[33].mxu1  ;;  %v3162_v18 = vpop.f32.mrb[34].mxu0 }
 0x12e   : > { %2142 = vst.msk [vmem:[%s3711_s8 + $0x174] sm:$0xf] %vm2048_vm3, %v3019_v11  ;;  %v1442_v19 = vmax.f32 %v1034_v12, 0.0  ;;  %v1282_v20 = vadd.f32 %v3701_v6, %v1281_v17  ;;  %v1037_v21 = vadd.f32 %v3162_v18, %v3701_v6  ;;  %v3226_v22 = vpop.f32.mrb[34].mxu1  ;;  %v1028_v23 = vpop.f32.mrb[35].mxu0 }
 0x12f   : > { %v1506_v24 = vmax.f32 %v1290_v15, 0.0  ;;  %v1440_v25 = vmax.f32 %v1026_v16, 0.0  ;;  %v1293_v26 = vadd.f32 %v3226_v22, %v3701_v6  ;;  %v1029_v27 = vadd.f32 %v3701_v6, %v1028_v23  ;;  %v1284_v28 = vpop.f32.mrb[35].mxu1 }
 0x130   : > { %v2960_v29 = vpack.c.bf16 %v1442_v19, %v1442_v19  ;;  %v1504_v30 = vmax.f32 %v1282_v20, 0.0  ;;  %v1443_v31 = vmax.f32 %v1037_v21, 0.0  ;;  %v1285_v32 = vadd.f32 %v3701_v6, %v1284_v28 }
 0x131   : > { %v3024_v33 = vpack.c.bf16 %v1506_v24, %v1506_v24  ;;  %v2958_v34 = vpack.c.bf16 %v1440_v25, %v1440_v25  ;;  %v1507_v35 = vmax.f32 %v1293_v26, 0.0  ;;  %v1441_v36 = vmax.f32 %v1029_v27, 0.0 }
 0x132   : > { %2083 = vst.msk [vmem:[%s3711_s8 + $0x88] sm:$0xf] %vm2048_vm3, %v2960_v29  ;;  %v3022_v37 = vpack.c.bf16 %v1504_v30, %v1504_v30  ;;  %v2961_v38 = vpack.c.bf16 %v1443_v31, %v1443_v31  ;;  %v1505_v39 = vmax.f32 %v1285_v32, 0.0 }
 0x133   : > { %2147 = vst.msk [vmem:[%s3711_s8 + $0x188] sm:$0xf] %vm2048_vm3, %v3024_v33  ;;  %2081 = vst.msk [vmem:[%s3711_s8 + $0x80] sm:$0xf] %vm2048_vm3, %v2958_v34  ;;  %v3025_v40 = vpack.c.bf16 %v1507_v35, %v1507_v35  ;;  %v2959_v41 = vpack.c.bf16 %v1441_v36, %v1441_v36  ;;  %v3165_v42 = vpop.f32.mrb[36].mxu0 }
 0x134   : > { %2145 = vst.msk [vmem:[%s3711_s8 + $0x180] sm:$0xf] %vm2048_vm3, %v3022_v37  ;;  %2084 = vst.msk [vmem:[%s3711_s8 + $0x8c] sm:$0xf] %vm2048_vm3, %v2961_v38  ;;  %v3023_v43 = vpack.c.bf16 %v1505_v39, %v1505_v39  ;;  %v1050_v44 = vadd.f32 %v3165_v42, %v3701_v6  ;;  %v3229_v45 = vpop.f32.mrb[36].mxu1  ;;  %v1041_v46 = vpop.f32.mrb[37].mxu0 }
 0x135   : > { %2148 = vst.msk [vmem:[%s3711_s8 + $0x18c] sm:$0xf] %vm2048_vm3, %v3025_v40  ;;  %2082 = vst.msk [vmem:[%s3711_s8 + $0x84] sm:$0xf] %vm2048_vm3, %v2959_v41  ;;  %v1306_v47 = vadd.f32 %v3229_v45, %v3701_v6  ;;  %v1042_v48 = vadd.f32 %v3701_v6, %v1041_v46  ;;  %v1297_v49 = vpop.f32.mrb[37].mxu1  ;;  %v3166_v50 = vpop.f32.mrb[38].mxu0 }
 0x136   : > { %2146 = vst.msk [vmem:[%s3711_s8 + $0x184] sm:$0xf] %vm2048_vm3, %v3023_v43  ;;  %v1446_v51 = vmax.f32 %v1050_v44, 0.0  ;;  %v1298_v52 = vadd.f32 %v3701_v6, %v1297_v49  ;;  %v1053_v53 = vadd.f32 %v3166_v50, %v3701_v6  ;;  %v3230_v54 = vpop.f32.mrb[38].mxu1  ;;  %v1044_v55 = vpop.f32.mrb[39].mxu0 }
 0x137   : > { %v1510_v56 = vmax.f32 %v1306_v47, 0.0  ;;  %v1444_v57 = vmax.f32 %v1042_v48, 0.0  ;;  %v1309_v58 = vadd.f32 %v3230_v54, %v3701_v6  ;;  %v1045_v59 = vadd.f32 %v3701_v6, %v1044_v55  ;;  %v1300_v60 = vpop.f32.mrb[39].mxu1 }
 0x138   : > { %v2964_v61 = vpack.c.bf16 %v1446_v51, %v1446_v51  ;;  %v1508_v62 = vmax.f32 %v1298_v52, 0.0  ;;  %v1447_v63 = vmax.f32 %v1053_v53, 0.0  ;;  %v1301_v0 = vadd.f32 %v3701_v6, %v1300_v60 }
 0x139   : > { %v3028_v1 = vpack.c.bf16 %v1510_v56, %v1510_v56  ;;  %v2962_v2 = vpack.c.bf16 %v1444_v57, %v1444_v57  ;;  %v1511_v3 = vmax.f32 %v1309_v58, 0.0  ;;  %v1445_v4 = vmax.f32 %v1045_v59, 0.0 }
 0x13a   : > { %2087 = vst.msk [vmem:[%s3711_s8 + $0x98] sm:$0xf] %vm2048_vm3, %v2964_v61  ;;  %v3026_v5 = vpack.c.bf16 %v1508_v62, %v1508_v62  ;;  %v2965_v7 = vpack.c.bf16 %v1447_v63, %v1447_v63  ;;  %v1509_v8 = vmax.f32 %v1301_v0, 0.0 }
 0x13b   : > { %2151 = vst.msk [vmem:[%s3711_s8 + $0x198] sm:$0xf] %vm2048_vm3, %v3028_v1  ;;  %2085 = vst.msk [vmem:[%s3711_s8 + $0x90] sm:$0xf] %vm2048_vm3, %v2962_v2  ;;  %v3029_v9 = vpack.c.bf16 %v1511_v3, %v1511_v3  ;;  %v2963_v10 = vpack.c.bf16 %v1445_v4, %v1445_v4  ;;  %v3169_v11 = vpop.f32.mrb[40].mxu0 }
 0x13c   : > { %2149 = vst.msk [vmem:[%s3711_s8 + $0x190] sm:$0xf] %vm2048_vm3, %v3026_v5  ;;  %2088 = vst.msk [vmem:[%s3711_s8 + $0x9c] sm:$0xf] %vm2048_vm3, %v2965_v7  ;;  %v3027_v12 = vpack.c.bf16 %v1509_v8, %v1509_v8  ;;  %v1066_v13 = vadd.f32 %v3169_v11, %v3701_v6  ;;  %v3233_v14 = vpop.f32.mrb[40].mxu1  ;;  %v1057_v15 = vpop.f32.mrb[41].mxu0 }
 0x13d   : > { %2152 = vst.msk [vmem:[%s3711_s8 + $0x19c] sm:$0xf] %vm2048_vm3, %v3029_v9  ;;  %2086 = vst.msk [vmem:[%s3711_s8 + $0x94] sm:$0xf] %vm2048_vm3, %v2963_v10  ;;  %v1322_v16 = vadd.f32 %v3233_v14, %v3701_v6  ;;  %v1058_v17 = vadd.f32 %v3701_v6, %v1057_v15  ;;  %v1313_v18 = vpop.f32.mrb[41].mxu1  ;;  %v3170_v19 = vpop.f32.mrb[42].mxu0 }
 0x13e   : > { %2150 = vst.msk [vmem:[%s3711_s8 + $0x194] sm:$0xf] %vm2048_vm3, %v3027_v12  ;;  %v1450_v20 = vmax.f32 %v1066_v13, 0.0  ;;  %v1314_v21 = vadd.f32 %v3701_v6, %v1313_v18  ;;  %v1069_v22 = vadd.f32 %v3170_v19, %v3701_v6  ;;  %v3234_v23 = vpop.f32.mrb[42].mxu1  ;;  %v1060_v24 = vpop.f32.mrb[43].mxu0 }
 0x13f   : > { %v1514_v25 = vmax.f32 %v1322_v16, 0.0  ;;  %v1448_v26 = vmax.f32 %v1058_v17, 0.0  ;;  %v1325_v27 = vadd.f32 %v3234_v23, %v3701_v6  ;;  %v1061_v28 = vadd.f32 %v3701_v6, %v1060_v24  ;;  %v1316_v29 = vpop.f32.mrb[43].mxu1 }
 0x140   : > { %v2968_v30 = vpack.c.bf16 %v1450_v20, %v1450_v20  ;;  %v1512_v31 = vmax.f32 %v1314_v21, 0.0  ;;  %v1451_v32 = vmax.f32 %v1069_v22, 0.0  ;;  %v1317_v33 = vadd.f32 %v3701_v6, %v1316_v29 }
 0x141   : > { %v3032_v34 = vpack.c.bf16 %v1514_v25, %v1514_v25  ;;  %v2966_v35 = vpack.c.bf16 %v1448_v26, %v1448_v26  ;;  %v1515_v36 = vmax.f32 %v1325_v27, 0.0  ;;  %v1449_v37 = vmax.f32 %v1061_v28, 0.0 }
 0x142   : > { %2091 = vst.msk [vmem:[%s3711_s8 + $0xa8] sm:$0xf] %vm2048_vm3, %v2968_v30  ;;  %v3030_v38 = vpack.c.bf16 %v1512_v31, %v1512_v31  ;;  %v2969_v39 = vpack.c.bf16 %v1451_v32, %v1451_v32  ;;  %v1513_v40 = vmax.f32 %v1317_v33, 0.0 }
 0x143   : > { %2155 = vst.msk [vmem:[%s3711_s8 + $0x1a8] sm:$0xf] %vm2048_vm3, %v3032_v34  ;;  %2089 = vst.msk [vmem:[%s3711_s8 + $0xa0] sm:$0xf] %vm2048_vm3, %v2966_v35  ;;  %v3033_v41 = vpack.c.bf16 %v1515_v36, %v1515_v36  ;;  %v2967_v42 = vpack.c.bf16 %v1449_v37, %v1449_v37  ;;  %v3173_v43 = vpop.f32.mrb[44].mxu0 }
 0x144   : > { %2153 = vst.msk [vmem:[%s3711_s8 + $0x1a0] sm:$0xf] %vm2048_vm3, %v3030_v38  ;;  %2092 = vst.msk [vmem:[%s3711_s8 + $0xac] sm:$0xf] %vm2048_vm3, %v2969_v39  ;;  %v3031_v44 = vpack.c.bf16 %v1513_v40, %v1513_v40  ;;  %v1082_v45 = vadd.f32 %v3173_v43, %v3701_v6  ;;  %v3237_v46 = vpop.f32.mrb[44].mxu1  ;;  %v1073_v47 = vpop.f32.mrb[45].mxu0 }
 0x145   : > { %2156 = vst.msk [vmem:[%s3711_s8 + $0x1ac] sm:$0xf] %vm2048_vm3, %v3033_v41  ;;  %2090 = vst.msk [vmem:[%s3711_s8 + $0xa4] sm:$0xf] %vm2048_vm3, %v2967_v42  ;;  %v1338_v48 = vadd.f32 %v3237_v46, %v3701_v6  ;;  %v1074_v49 = vadd.f32 %v3701_v6, %v1073_v47  ;;  %v1329_v50 = vpop.f32.mrb[45].mxu1  ;;  %v3174_v51 = vpop.f32.mrb[46].mxu0 }
 0x146   : > { %2154 = vst.msk [vmem:[%s3711_s8 + $0x1a4] sm:$0xf] %vm2048_vm3, %v3031_v44  ;;  %v1454_v52 = vmax.f32 %v1082_v45, 0.0  ;;  %v1330_v53 = vadd.f32 %v3701_v6, %v1329_v50  ;;  %v1085_v54 = vadd.f32 %v3174_v51, %v3701_v6  ;;  %v3238_v55 = vpop.f32.mrb[46].mxu1  ;;  %v1076_v56 = vpop.f32.mrb[47].mxu0 }
 0x147   : > { %v1518_v57 = vmax.f32 %v1338_v48, 0.0  ;;  %v1452_v58 = vmax.f32 %v1074_v49, 0.0  ;;  %v1341_v59 = vadd.f32 %v3238_v55, %v3701_v6  ;;  %v1077_v60 = vadd.f32 %v3701_v6, %v1076_v56  ;;  %v1332_v61 = vpop.f32.mrb[47].mxu1  ;;  %v4014_v45 = vld [vmem:[%s4295_s2] ss:$0 sm:$0xff] }
 0x148   : > { %v2972_v62 = vpack.c.bf16 %v1454_v52, %v1454_v52  ;;  %v1516_v63 = vmax.f32 %v1330_v53, 0.0  ;;  %v1455_v0 = vmax.f32 %v1085_v54, 0.0  ;;  %v1333_v1 = vadd.f32 %v3701_v6, %v1332_v61 }
 0x149   : > { %v3036_v2 = vpack.c.bf16 %v1518_v57, %v1518_v57  ;;  %v2970_v3 = vpack.c.bf16 %v1452_v58, %v1452_v58  ;;  %v1519_v4 = vmax.f32 %v1341_v59, 0.0  ;;  %v1453_v5 = vmax.f32 %v1077_v60, 0.0 }
 0x14a   : > { %2095 = vst.msk [vmem:[%s3711_s8 + $0xb8] sm:$0xf] %vm2048_vm3, %v2972_v62  ;;  %v3034_v7 = vpack.c.bf16 %v1516_v63, %v1516_v63  ;;  %v2973_v8 = vpack.c.bf16 %v1455_v0, %v1455_v0  ;;  %v1517_v9 = vmax.f32 %v1333_v1, 0.0 }
 0x14b   : > { %2159 = vst.msk [vmem:[%s3711_s8 + $0x1b8] sm:$0xf] %vm2048_vm3, %v3036_v2  ;;  %2093 = vst.msk [vmem:[%s3711_s8 + $0xb0] sm:$0xf] %vm2048_vm3, %v2970_v3  ;;  %v3037_v10 = vpack.c.bf16 %v1519_v4, %v1519_v4  ;;  %v2971_v11 = vpack.c.bf16 %v1453_v5, %v1453_v5  ;;  %v3177_v12 = vpop.f32.mrb[48].mxu0 }
 0x14c   : > { %2157 = vst.msk [vmem:[%s3711_s8 + $0x1b0] sm:$0xf] %vm2048_vm3, %v3034_v7  ;;  %2096 = vst.msk [vmem:[%s3711_s8 + $0xbc] sm:$0xf] %vm2048_vm3, %v2973_v8  ;;  %v3035_v13 = vpack.c.bf16 %v1517_v9, %v1517_v9  ;;  %v1098_v14 = vadd.f32 %v3177_v12, %v3701_v6  ;;  %v3241_v15 = vpop.f32.mrb[48].mxu1  ;;  %v1089_v16 = vpop.f32.mrb[49].mxu0 }
 0x14d   : > { %2160 = vst.msk [vmem:[%s3711_s8 + $0x1bc] sm:$0xf] %vm2048_vm3, %v3037_v10  ;;  %2094 = vst.msk [vmem:[%s3711_s8 + $0xb4] sm:$0xf] %vm2048_vm3, %v2971_v11  ;;  %v1354_v17 = vadd.f32 %v3241_v15, %v3701_v6  ;;  %v1090_v18 = vadd.f32 %v3701_v6, %v1089_v16  ;;  %v1345_v19 = vpop.f32.mrb[49].mxu1  ;;  %v3178_v20 = vpop.f32.mrb[50].mxu0 }
 0x14e   : > { %2158 = vst.msk [vmem:[%s3711_s8 + $0x1b4] sm:$0xf] %vm2048_vm3, %v3035_v13  ;;  %v1458_v21 = vmax.f32 %v1098_v14, 0.0  ;;  %v1346_v22 = vadd.f32 %v3701_v6, %v1345_v19  ;;  %v1101_v23 = vadd.f32 %v3178_v20, %v3701_v6  ;;  %v3242_v24 = vpop.f32.mrb[50].mxu1  ;;  %v1092_v25 = vpop.f32.mrb[51].mxu0 }
 0x14f   : > { %v1522_v26 = vmax.f32 %v1354_v17, 0.0  ;;  %v1456_v27 = vmax.f32 %v1090_v18, 0.0  ;;  %v1357_v28 = vadd.f32 %v3242_v24, %v3701_v6  ;;  %v1093_v29 = vadd.f32 %v3701_v6, %v1092_v25  ;;  %v1348_v30 = vpop.f32.mrb[51].mxu1 }
 0x150   : > { %v2976_v31 = vpack.c.bf16 %v1458_v21, %v1458_v21  ;;  %v1520_v32 = vmax.f32 %v1346_v22, 0.0  ;;  %v1459_v33 = vmax.f32 %v1101_v23, 0.0  ;;  %v1349_v34 = vadd.f32 %v3701_v6, %v1348_v30 }
 0x151   : > { %v3040_v35 = vpack.c.bf16 %v1522_v26, %v1522_v26  ;;  %v2974_v36 = vpack.c.bf16 %v1456_v27, %v1456_v27  ;;  %v1523_v37 = vmax.f32 %v1357_v28, 0.0  ;;  %v1457_v38 = vmax.f32 %v1093_v29, 0.0 }
 0x152   : > { %2099 = vst.msk [vmem:[%s3711_s8 + $0xc8] sm:$0xf] %vm2048_vm3, %v2976_v31  ;;  %v3038_v39 = vpack.c.bf16 %v1520_v32, %v1520_v32  ;;  %v2977_v40 = vpack.c.bf16 %v1459_v33, %v1459_v33  ;;  %v1521_v41 = vmax.f32 %v1349_v34, 0.0 }
 0x153   : > { %2163 = vst.msk [vmem:[%s3711_s8 + $0x1c8] sm:$0xf] %vm2048_vm3, %v3040_v35  ;;  %2097 = vst.msk [vmem:[%s3711_s8 + $0xc0] sm:$0xf] %vm2048_vm3, %v2974_v36  ;;  %v3041_v42 = vpack.c.bf16 %v1523_v37, %v1523_v37  ;;  %v2975_v43 = vpack.c.bf16 %v1457_v38, %v1457_v38  ;;  %v3181_v44 = vpop.f32.mrb[52].mxu0 }
 0x154   : > { %2161 = vst.msk [vmem:[%s3711_s8 + $0x1c0] sm:$0xf] %vm2048_vm3, %v3038_v39  ;;  %2100 = vst.msk [vmem:[%s3711_s8 + $0xcc] sm:$0xf] %vm2048_vm3, %v2977_v40  ;;  %v3039_v6 = vpack.c.bf16 %v1521_v41, %v1521_v41  ;;  %v1114_v46 = vadd.f32 %v4014_v45, %v3181_v44  ;;  %v3245_v47 = vpop.f32.mrb[52].mxu1  ;;  %v1105_v48 = vpop.f32.mrb[53].mxu0 }
 0x155   : > { %2164 = vst.msk [vmem:[%s3711_s8 + $0x1cc] sm:$0xf] %vm2048_vm3, %v3041_v42  ;;  %2098 = vst.msk [vmem:[%s3711_s8 + $0xc4] sm:$0xf] %vm2048_vm3, %v2975_v43  ;;  %v1370_v49 = vadd.f32 %v4014_v45, %v3245_v47  ;;  %v1106_v50 = vadd.f32 %v4014_v45, %v1105_v48  ;;  %v1361_v51 = vpop.f32.mrb[53].mxu1  ;;  %v3182_v52 = vpop.f32.mrb[54].mxu0 }
 0x156   : > { %2162 = vst.msk [vmem:[%s3711_s8 + $0x1c4] sm:$0xf] %vm2048_vm3, %v3039_v6  ;;  %v1462_v53 = vmax.f32 %v1114_v46, 0.0  ;;  %v1362_v54 = vadd.f32 %v4014_v45, %v1361_v51  ;;  %v1117_v55 = vadd.f32 %v4014_v45, %v3182_v52  ;;  %v3246_v56 = vpop.f32.mrb[54].mxu1  ;;  %v1108_v57 = vpop.f32.mrb[55].mxu0 }
 0x157   : > { %v1526_v58 = vmax.f32 %v1370_v49, 0.0  ;;  %v1460_v59 = vmax.f32 %v1106_v50, 0.0  ;;  %v1373_v60 = vadd.f32 %v4014_v45, %v3246_v56  ;;  %v1109_v61 = vadd.f32 %v4014_v45, %v1108_v57  ;;  %v1364_v62 = vpop.f32.mrb[55].mxu1 }
 0x158   : > { %v2980_v63 = vpack.c.bf16 %v1462_v53, %v1462_v53  ;;  %v1524_v0 = vmax.f32 %v1362_v54, 0.0  ;;  %v1463_v1 = vmax.f32 %v1117_v55, 0.0  ;;  %v1365_v2 = vadd.f32 %v4014_v45, %v1364_v62 }
 0x159   : > { %v3044_v3 = vpack.c.bf16 %v1526_v58, %v1526_v58  ;;  %v2978_v4 = vpack.c.bf16 %v1460_v59, %v1460_v59  ;;  %v1527_v5 = vmax.f32 %v1373_v60, 0.0  ;;  %v1461_v7 = vmax.f32 %v1109_v61, 0.0 }
 0x15a   : > { %2103 = vst.msk [vmem:[%s3711_s8 + $0xd8] sm:$0xf] %vm2048_vm3, %v2980_v63  ;;  %v3042_v8 = vpack.c.bf16 %v1524_v0, %v1524_v0  ;;  %v2981_v9 = vpack.c.bf16 %v1463_v1, %v1463_v1  ;;  %v1525_v10 = vmax.f32 %v1365_v2, 0.0 }
 0x15b   : > { %2167 = vst.msk [vmem:[%s3711_s8 + $0x1d8] sm:$0xf] %vm2048_vm3, %v3044_v3  ;;  %2101 = vst.msk [vmem:[%s3711_s8 + $0xd0] sm:$0xf] %vm2048_vm3, %v2978_v4  ;;  %v3045_v11 = vpack.c.bf16 %v1527_v5, %v1527_v5  ;;  %v2979_v12 = vpack.c.bf16 %v1461_v7, %v1461_v7  ;;  %v3185_v13 = vpop.f32.mrb[56].mxu0 }
 0x15c   : > { %2165 = vst.msk [vmem:[%s3711_s8 + $0x1d0] sm:$0xf] %vm2048_vm3, %v3042_v8  ;;  %2104 = vst.msk [vmem:[%s3711_s8 + $0xdc] sm:$0xf] %vm2048_vm3, %v2981_v9  ;;  %v3043_v14 = vpack.c.bf16 %v1525_v10, %v1525_v10  ;;  %v1130_v15 = vadd.f32 %v4014_v45, %v3185_v13  ;;  %v3249_v16 = vpop.f32.mrb[56].mxu1  ;;  %v1121_v17 = vpop.f32.mrb[57].mxu0 }
 0x15d   : > { %2168 = vst.msk [vmem:[%s3711_s8 + $0x1dc] sm:$0xf] %vm2048_vm3, %v3045_v11  ;;  %2102 = vst.msk [vmem:[%s3711_s8 + $0xd4] sm:$0xf] %vm2048_vm3, %v2979_v12  ;;  %v1386_v18 = vadd.f32 %v4014_v45, %v3249_v16  ;;  %v1122_v19 = vadd.f32 %v4014_v45, %v1121_v17  ;;  %v1377_v20 = vpop.f32.mrb[57].mxu1  ;;  %v3186_v21 = vpop.f32.mrb[58].mxu0 }
 0x15e   : > { %2166 = vst.msk [vmem:[%s3711_s8 + $0x1d4] sm:$0xf] %vm2048_vm3, %v3043_v14  ;;  %v1466_v22 = vmax.f32 %v1130_v15, 0.0  ;;  %v1378_v23 = vadd.f32 %v4014_v45, %v1377_v20  ;;  %v1133_v24 = vadd.f32 %v4014_v45, %v3186_v21  ;;  %v3250_v25 = vpop.f32.mrb[58].mxu1  ;;  %v1124_v26 = vpop.f32.mrb[59].mxu0 }
 0x15f   : > { %v1530_v27 = vmax.f32 %v1386_v18, 0.0  ;;  %v1464_v28 = vmax.f32 %v1122_v19, 0.0  ;;  %v1389_v29 = vadd.f32 %v4014_v45, %v3250_v25  ;;  %v1125_v30 = vadd.f32 %v4014_v45, %v1124_v26  ;;  %v1380_v31 = vpop.f32.mrb[59].mxu1 }
 0x160   : > { %v2984_v32 = vpack.c.bf16 %v1466_v22, %v1466_v22  ;;  %v1528_v33 = vmax.f32 %v1378_v23, 0.0  ;;  %v1467_v34 = vmax.f32 %v1133_v24, 0.0  ;;  %v1381_v35 = vadd.f32 %v4014_v45, %v1380_v31 }
 0x161   : > { %v3048_v36 = vpack.c.bf16 %v1530_v27, %v1530_v27  ;;  %v2982_v37 = vpack.c.bf16 %v1464_v28, %v1464_v28  ;;  %v1531_v38 = vmax.f32 %v1389_v29, 0.0  ;;  %v1465_v39 = vmax.f32 %v1125_v30, 0.0 }
 0x162   : > { %2107 = vst.msk [vmem:[%s3711_s8 + $0xe8] sm:$0xf] %vm2048_vm3, %v2984_v32  ;;  %v3046_v40 = vpack.c.bf16 %v1528_v33, %v1528_v33  ;;  %v2985_v41 = vpack.c.bf16 %v1467_v34, %v1467_v34  ;;  %v1529_v42 = vmax.f32 %v1381_v35, 0.0 }
 0x163   : > { %2171 = vst.msk [vmem:[%s3711_s8 + $0x1e8] sm:$0xf] %vm2048_vm3, %v3048_v36  ;;  %2105 = vst.msk [vmem:[%s3711_s8 + $0xe0] sm:$0xf] %vm2048_vm3, %v2982_v37  ;;  %v3049_v43 = vpack.c.bf16 %v1531_v38, %v1531_v38  ;;  %v2983_v44 = vpack.c.bf16 %v1465_v39, %v1465_v39  ;;  %v3189_v6 = vpop.f32.mrb[60].mxu0 }
 0x164   : > { %2169 = vst.msk [vmem:[%s3711_s8 + $0x1e0] sm:$0xf] %vm2048_vm3, %v3046_v40  ;;  %2108 = vst.msk [vmem:[%s3711_s8 + $0xec] sm:$0xf] %vm2048_vm3, %v2985_v41  ;;  %v3047_v46 = vpack.c.bf16 %v1529_v42, %v1529_v42  ;;  %v1146_v47 = vadd.f32 %v4014_v45, %v3189_v6  ;;  %v3253_v48 = vpop.f32.mrb[60].mxu1  ;;  %v1137_v49 = vpop.f32.mrb[61].mxu0 }
 0x165   : > { %2172 = vst.msk [vmem:[%s3711_s8 + $0x1ec] sm:$0xf] %vm2048_vm3, %v3049_v43  ;;  %2106 = vst.msk [vmem:[%s3711_s8 + $0xe4] sm:$0xf] %vm2048_vm3, %v2983_v44  ;;  %v1402_v50 = vadd.f32 %v4014_v45, %v3253_v48  ;;  %v1138_v51 = vadd.f32 %v4014_v45, %v1137_v49  ;;  %v1393_v52 = vpop.f32.mrb[61].mxu1  ;;  %v3190_v53 = vpop.f32.mrb[62].mxu0 }
 0x166   : > { %2170 = vst.msk [vmem:[%s3711_s8 + $0x1e4] sm:$0xf] %vm2048_vm3, %v3047_v46  ;;  %v1470_v54 = vmax.f32 %v1146_v47, 0.0  ;;  %v1394_v55 = vadd.f32 %v4014_v45, %v1393_v52  ;;  %v1149_v56 = vadd.f32 %v4014_v45, %v3190_v53  ;;  %v3254_v57 = vpop.f32.mrb[62].mxu1  ;;  %v1140_v58 = vpop.f32.mrb[63].mxu0 }
 0x167   : > { %v1534_v59 = vmax.f32 %v1402_v50, 0.0  ;;  %v1468_v60 = vmax.f32 %v1138_v51, 0.0  ;;  %v1405_v61 = vadd.f32 %v4014_v45, %v3254_v57  ;;  %v1141_v62 = vadd.f32 %v4014_v45, %v1140_v58  ;;  %v1396_v63 = vpop.f32.mrb[63].mxu1 }
 0x168   : > { %v2988_v0 = vpack.c.bf16 %v1470_v54, %v1470_v54  ;;  %v1532_v1 = vmax.f32 %v1394_v55, 0.0  ;;  %v1471_v2 = vmax.f32 %v1149_v56, 0.0  ;;  %v1397_v3 = vadd.f32 %v4014_v45, %v1396_v63  ;;  %2183 = sbr.rel (!%p3549_p4) target bundleno = 458 (0x1ca), region = 36 }
 0x169   : > { %v3052_v4 = vpack.c.bf16 %v1534_v59, %v1534_v59  ;;  %v2986_v5 = vpack.c.bf16 %v1468_v60, %v1468_v60  ;;  %v1535_v7 = vmax.f32 %v1405_v61, 0.0  ;;  %v1469_v8 = vmax.f32 %v1141_v62, 0.0 }
 0x16a   : > { %2111 = vst.msk [vmem:[%s3711_s8 + $0xf8] sm:$0xf] %vm2048_vm3, %v2988_v0  ;;  %v3050_v9 = vpack.c.bf16 %v1532_v1, %v1532_v1  ;;  %v2989_v10 = vpack.c.bf16 %v1471_v2, %v1471_v2  ;;  %v1533_v11 = vmax.f32 %v1397_v3, 0.0 }
 0x16b   : > { %2175 = vst.msk [vmem:[%s3711_s8 + $0x1f8] sm:$0xf] %vm2048_vm3, %v3052_v4  ;;  %2109 = vst.msk [vmem:[%s3711_s8 + $0xf0] sm:$0xf] %vm2048_vm3, %v2986_v5  ;;  %v3053_v12 = vpack.c.bf16 %v1535_v7, %v1535_v7  ;;  %v2987_v13 = vpack.c.bf16 %v1469_v8, %v1469_v8 }
 0x16c   : > { %2173 = vst.msk [vmem:[%s3711_s8 + $0x1f0] sm:$0xf] %vm2048_vm3, %v3050_v9  ;;  %2112 = vst.msk [vmem:[%s3711_s8 + $0xfc] sm:$0xf] %vm2048_vm3, %v2989_v10  ;;  %v3051_v45 = vpack.c.bf16 %v1533_v11, %v1533_v11 }
 0x16d   : > { %2176 = vst.msk [vmem:[%s3711_s8 + $0x1fc] sm:$0xf] %vm2048_vm3, %v3053_v12  ;;  %2110 = vst.msk [vmem:[%s3711_s8 + $0xf4] sm:$0xf] %vm2048_vm3, %v2987_v13 }
 0x16e   : > { %2174 = vst.msk [vmem:[%s3711_s8 + $0x1f4] sm:$0xf] %vm2048_vm3, %v3051_v45 }
 0x16f   : > { %s4305_s11 = smov (!%p2186_p8, %s2185_s11), 128 }
 0x170   : > { %s2911_s21 = sshll.u32 %s4305_s11, 6 }
 0x171   : > { %p2914_p9 = scmp.eq.s32.totalorder %s2911_s21, 0 }
 0x172   : > { %s4107_s22 = sshrl.u32 (!%p2914_p9), %s4305_s11, 6 }
 0x173   : > { %2194 = sbr.rel (%p2914_p9) target bundleno = 458 (0x1ca), region = 40  ;;  %p2915_p10 = scmp.le.s32.totalorder (!%p2914_p9), %s4107_s22, 0 }
 0x17a   : > { %2599 = sbr.rel (%p2915_p10) target bundleno = 437 (0x1b5), region = 112  ;;  %s4298_s15 = smov (!%p2915_p10), %s4101_s18 }
 0x17b   : > { %s4299_s20 = smov (!%p2915_p10), %s3711_s8  ;;  %s4116_s23 = smov (!%p2915_p10), 0  }
 0x17c   : > { %s4118_s24 = smov (!%p2915_p10), 0  }
 0x181 LB: >> { %v2210_v14 = vld [vmem:[%s3477_s20] sm:$0xf]  ;;  %v2212_v15 = vld [vmem:[%s3477_s20 + $0x4] sm:$0xf]  ;;  %v2214_v16 = vld [vmem:[%s3477_s20 + $0x8] sm:$0xf]  ;;  %s3485_s24 = sphi %s4118_s24, %s2204_s24   ;;  %s3481_s23 = sphi %s4116_s23, %s4300_s23   ;;  %s3477_s20 = sphi %s4299_s20, %s2343_s20   ;;  %s3473_s15 = sphi %s4298_s15, %s2344_s15  }
 0x182   : >> { %2211 = vst [vmem:[%s3473_s15] sm:$0xf] %v2210_v14  ;;  %2213 = vst [vmem:[%s3473_s15 + $0x4] sm:$0xf] %v2212_v15  ;;  %v2216_v17 = vld [vmem:[%s3477_s20 + $0xc] sm:$0xf]  ;;  %s2338_s25 = sadd.s32 1, %s3481_s23 }
 0x183   : >> { %2215 = vst [vmem:[%s3473_s15 + $0x8] sm:$0xf] %v2214_v16  ;;  %v2218_v18 = vld [vmem:[%s3477_s20 + $0x10] sm:$0xf]  ;;  %v2220_v19 = vld [vmem:[%s3477_s20 + $0x14] sm:$0xf]  ;;  %p2339_p11 = scmp.ge.s32.totalorder %s2338_s25, %s4107_s22 }
 0x184   : >> { %2217 = vst [vmem:[%s3473_s15 + $0xc] sm:$0xf] %v2216_v17  ;;  %2219 = vst [vmem:[%s3473_s15 + $0x10] sm:$0xf] %v2218_v18  ;;  %v2222_v20 = vld [vmem:[%s3477_s20 + $0x18] sm:$0xf] }
 0x185   : >> { %2221 = vst [vmem:[%s3473_s15 + $0x14] sm:$0xf] %v2220_v19  ;;  %v2224_v21 = vld [vmem:[%s3477_s20 + $0x1c] sm:$0xf]  ;;  %v2226_v22 = vld [vmem:[%s3477_s20 + $0x20] sm:$0xf] }
 0x186   : >> { %2223 = vst [vmem:[%s3473_s15 + $0x18] sm:$0xf] %v2222_v20  ;;  %2225 = vst [vmem:[%s3473_s15 + $0x1c] sm:$0xf] %v2224_v21  ;;  %v2228_v23 = vld [vmem:[%s3477_s20 + $0x24] sm:$0xf] }
 0x187   : >> { %2227 = vst [vmem:[%s3473_s15 + $0x20] sm:$0xf] %v2226_v22  ;;  %v2230_v24 = vld [vmem:[%s3477_s20 + $0x28] sm:$0xf]  ;;  %v2232_v25 = vld [vmem:[%s3477_s20 + $0x2c] sm:$0xf] }
 0x188   : >> { %2229 = vst [vmem:[%s3473_s15 + $0x24] sm:$0xf] %v2228_v23  ;;  %2231 = vst [vmem:[%s3473_s15 + $0x28] sm:$0xf] %v2230_v24  ;;  %v2234_v26 = vld [vmem:[%s3477_s20 + $0x30] sm:$0xf] }
 0x189   : >> { %2233 = vst [vmem:[%s3473_s15 + $0x2c] sm:$0xf] %v2232_v25  ;;  %v2236_v27 = vld [vmem:[%s3477_s20 + $0x34] sm:$0xf]  ;;  %v2238_v28 = vld [vmem:[%s3477_s20 + $0x38] sm:$0xf] }
 0x18a   : >> { %2235 = vst [vmem:[%s3473_s15 + $0x30] sm:$0xf] %v2234_v26  ;;  %2237 = vst [vmem:[%s3473_s15 + $0x34] sm:$0xf] %v2236_v27  ;;  %v2240_v29 = vld [vmem:[%s3477_s20 + $0x3c] sm:$0xf] }
 0x18b   : >> { %2239 = vst [vmem:[%s3473_s15 + $0x38] sm:$0xf] %v2238_v28  ;;  %v2242_v30 = vld [vmem:[%s3477_s20 + $0x40] sm:$0xf]  ;;  %v2244_v31 = vld [vmem:[%s3477_s20 + $0x44] sm:$0xf] }
 0x18c   : >> { %2241 = vst [vmem:[%s3473_s15 + $0x3c] sm:$0xf] %v2240_v29  ;;  %2243 = vst [vmem:[%s3473_s15 + $0x40] sm:$0xf] %v2242_v30  ;;  %v2246_v32 = vld [vmem:[%s3477_s20 + $0x48] sm:$0xf] }
 0x18d   : >> { %2245 = vst [vmem:[%s3473_s15 + $0x44] sm:$0xf] %v2244_v31  ;;  %v2248_v33 = vld [vmem:[%s3477_s20 + $0x4c] sm:$0xf]  ;;  %v2250_v34 = vld [vmem:[%s3477_s20 + $0x50] sm:$0xf] }
 0x18e   : >> { %2247 = vst [vmem:[%s3473_s15 + $0x48] sm:$0xf] %v2246_v32  ;;  %2249 = vst [vmem:[%s3473_s15 + $0x4c] sm:$0xf] %v2248_v33  ;;  %v2252_v35 = vld [vmem:[%s3477_s20 + $0x54] sm:$0xf] }
 0x18f   : >> { %2251 = vst [vmem:[%s3473_s15 + $0x50] sm:$0xf] %v2250_v34  ;;  %v2254_v36 = vld [vmem:[%s3477_s20 + $0x58] sm:$0xf]  ;;  %v2256_v37 = vld [vmem:[%s3477_s20 + $0x5c] sm:$0xf] }
 0x190   : >> { %2253 = vst [vmem:[%s3473_s15 + $0x54] sm:$0xf] %v2252_v35  ;;  %2255 = vst [vmem:[%s3473_s15 + $0x58] sm:$0xf] %v2254_v36  ;;  %v2258_v38 = vld [vmem:[%s3477_s20 + $0x60] sm:$0xf] }
 0x191   : >> { %2257 = vst [vmem:[%s3473_s15 + $0x5c] sm:$0xf] %v2256_v37  ;;  %v2260_v39 = vld [vmem:[%s3477_s20 + $0x64] sm:$0xf]  ;;  %v2262_v40 = vld [vmem:[%s3477_s20 + $0x68] sm:$0xf] }
 0x192   : >> { %2259 = vst [vmem:[%s3473_s15 + $0x60] sm:$0xf] %v2258_v38  ;;  %2261 = vst [vmem:[%s3473_s15 + $0x64] sm:$0xf] %v2260_v39  ;;  %v2264_v41 = vld [vmem:[%s3477_s20 + $0x6c] sm:$0xf] }
 0x193   : >> { %2263 = vst [vmem:[%s3473_s15 + $0x68] sm:$0xf] %v2262_v40  ;;  %v2266_v42 = vld [vmem:[%s3477_s20 + $0x70] sm:$0xf]  ;;  %v2268_v43 = vld [vmem:[%s3477_s20 + $0x74] sm:$0xf] }
 0x194   : >> { %2265 = vst [vmem:[%s3473_s15 + $0x6c] sm:$0xf] %v2264_v41  ;;  %2267 = vst [vmem:[%s3473_s15 + $0x70] sm:$0xf] %v2266_v42  ;;  %v2270_v44 = vld [vmem:[%s3477_s20 + $0x78] sm:$0xf] }
 0x195   : >> { %2269 = vst [vmem:[%s3473_s15 + $0x74] sm:$0xf] %v2268_v43  ;;  %v2272_v6 = vld [vmem:[%s3477_s20 + $0x7c] sm:$0xf]  ;;  %v2274_v46 = vld [vmem:[%s3477_s20 + $0x80] sm:$0xf] }
 0x196   : >> { %2271 = vst [vmem:[%s3473_s15 + $0x78] sm:$0xf] %v2270_v44  ;;  %2273 = vst [vmem:[%s3473_s15 + $0x7c] sm:$0xf] %v2272_v6  ;;  %v2276_v47 = vld [vmem:[%s3477_s20 + $0x84] sm:$0xf] }
 0x197   : >> { %2275 = vst [vmem:[%s3473_s15 + $0x80] sm:$0xf] %v2274_v46  ;;  %v2278_v48 = vld [vmem:[%s3477_s20 + $0x88] sm:$0xf]  ;;  %v2280_v49 = vld [vmem:[%s3477_s20 + $0x8c] sm:$0xf] }
 0x198   : >> { %2277 = vst [vmem:[%s3473_s15 + $0x84] sm:$0xf] %v2276_v47  ;;  %2279 = vst [vmem:[%s3473_s15 + $0x88] sm:$0xf] %v2278_v48  ;;  %v2282_v50 = vld [vmem:[%s3477_s20 + $0x90] sm:$0xf] }
 0x199   : >> { %2281 = vst [vmem:[%s3473_s15 + $0x8c] sm:$0xf] %v2280_v49  ;;  %v2284_v51 = vld [vmem:[%s3477_s20 + $0x94] sm:$0xf]  ;;  %v2286_v52 = vld [vmem:[%s3477_s20 + $0x98] sm:$0xf] }
 0x19a   : >> { %2283 = vst [vmem:[%s3473_s15 + $0x90] sm:$0xf] %v2282_v50  ;;  %2285 = vst [vmem:[%s3473_s15 + $0x94] sm:$0xf] %v2284_v51  ;;  %v2288_v53 = vld [vmem:[%s3477_s20 + $0x9c] sm:$0xf] }
 0x19b   : >> { %2287 = vst [vmem:[%s3473_s15 + $0x98] sm:$0xf] %v2286_v52  ;;  %v2290_v54 = vld [vmem:[%s3477_s20 + $0xa0] sm:$0xf]  ;;  %v2292_v55 = vld [vmem:[%s3477_s20 + $0xa4] sm:$0xf] }
 0x19c   : >> { %2289 = vst [vmem:[%s3473_s15 + $0x9c] sm:$0xf] %v2288_v53  ;;  %2291 = vst [vmem:[%s3473_s15 + $0xa0] sm:$0xf] %v2290_v54  ;;  %v2294_v56 = vld [vmem:[%s3477_s20 + $0xa8] sm:$0xf] }
 0x19d   : >> { %2293 = vst [vmem:[%s3473_s15 + $0xa4] sm:$0xf] %v2292_v55  ;;  %v2296_v57 = vld [vmem:[%s3477_s20 + $0xac] sm:$0xf]  ;;  %v2298_v58 = vld [vmem:[%s3477_s20 + $0xb0] sm:$0xf] }
 0x19e   : >> { %2295 = vst [vmem:[%s3473_s15 + $0xa8] sm:$0xf] %v2294_v56  ;;  %2297 = vst [vmem:[%s3473_s15 + $0xac] sm:$0xf] %v2296_v57  ;;  %v2300_v59 = vld [vmem:[%s3477_s20 + $0xb4] sm:$0xf] }
 0x19f   : >> { %2299 = vst [vmem:[%s3473_s15 + $0xb0] sm:$0xf] %v2298_v58  ;;  %v2302_v60 = vld [vmem:[%s3477_s20 + $0xb8] sm:$0xf]  ;;  %v2304_v61 = vld [vmem:[%s3477_s20 + $0xbc] sm:$0xf] }
 0x1a0   : >> { %2301 = vst [vmem:[%s3473_s15 + $0xb4] sm:$0xf] %v2300_v59  ;;  %2303 = vst [vmem:[%s3473_s15 + $0xb8] sm:$0xf] %v2302_v60  ;;  %v2306_v62 = vld [vmem:[%s3477_s20 + $0xc0] sm:$0xf] }
 0x1a1   : >> { %2305 = vst [vmem:[%s3473_s15 + $0xbc] sm:$0xf] %v2304_v61  ;;  %v2308_v63 = vld [vmem:[%s3477_s20 + $0xc4] sm:$0xf]  ;;  %v2310_v0 = vld [vmem:[%s3477_s20 + $0xc8] sm:$0xf] }
 0x1a2   : >> { %2307 = vst [vmem:[%s3473_s15 + $0xc0] sm:$0xf] %v2306_v62  ;;  %2309 = vst [vmem:[%s3473_s15 + $0xc4] sm:$0xf] %v2308_v63  ;;  %v2312_v1 = vld [vmem:[%s3477_s20 + $0xcc] sm:$0xf] }
 0x1a3   : >> { %2311 = vst [vmem:[%s3473_s15 + $0xc8] sm:$0xf] %v2310_v0  ;;  %v2314_v2 = vld [vmem:[%s3477_s20 + $0xd0] sm:$0xf]  ;;  %v2316_v3 = vld [vmem:[%s3477_s20 + $0xd4] sm:$0xf] }
 0x1a4   : >> { %2313 = vst [vmem:[%s3473_s15 + $0xcc] sm:$0xf] %v2312_v1  ;;  %2315 = vst [vmem:[%s3473_s15 + $0xd0] sm:$0xf] %v2314_v2  ;;  %v2318_v4 = vld [vmem:[%s3477_s20 + $0xd8] sm:$0xf] }
 0x1a5   : >> { %2317 = vst [vmem:[%s3473_s15 + $0xd4] sm:$0xf] %v2316_v3  ;;  %v2320_v5 = vld [vmem:[%s3477_s20 + $0xdc] sm:$0xf]  ;;  %v2322_v7 = vld [vmem:[%s3477_s20 + $0xe0] sm:$0xf] }
 0x1a6   : >> { %2319 = vst [vmem:[%s3473_s15 + $0xd8] sm:$0xf] %v2318_v4  ;;  %2321 = vst [vmem:[%s3473_s15 + $0xdc] sm:$0xf] %v2320_v5  ;;  %v2324_v8 = vld [vmem:[%s3477_s20 + $0xe4] sm:$0xf] }
 0x1a7   : >> { %2323 = vst [vmem:[%s3473_s15 + $0xe0] sm:$0xf] %v2322_v7  ;;  %v2326_v9 = vld [vmem:[%s3477_s20 + $0xe8] sm:$0xf]  ;;  %v2328_v10 = vld [vmem:[%s3477_s20 + $0xec] sm:$0xf] }
 0x1a8   : >> { %2325 = vst [vmem:[%s3473_s15 + $0xe4] sm:$0xf] %v2324_v8  ;;  %2327 = vst [vmem:[%s3473_s15 + $0xe8] sm:$0xf] %v2326_v9  ;;  %v2330_v11 = vld [vmem:[%s3477_s20 + $0xf0] sm:$0xf] }
 0x1a9   : >> { %2329 = vst [vmem:[%s3473_s15 + $0xec] sm:$0xf] %v2328_v10  ;;  %v2332_v12 = vld [vmem:[%s3477_s20 + $0xf4] sm:$0xf]  ;;  %v2334_v13 = vld [vmem:[%s3477_s20 + $0xf8] sm:$0xf] }
 0x1aa   : >> { %2331 = vst [vmem:[%s3473_s15 + $0xf0] sm:$0xf] %v2330_v11  ;;  %2333 = vst [vmem:[%s3473_s15 + $0xf4] sm:$0xf] %v2332_v12  ;;  %v2336_v45 = vld [vmem:[%s3477_s20 + $0xfc] sm:$0xf] }
 0x1ab   : >> { %2335 = vst [vmem:[%s3473_s15 + $0xf8] sm:$0xf] %v2334_v13  ;;  %2337 = vst [vmem:[%s3473_s15 + $0xfc] sm:$0xf] %v2336_v45  ;;  %s4307_s25 = smov (%p2339_p11, %s2338_s25), 0  ;;  %s2204_s24 = sadd.s32 1, %s3485_s24  }
 0x1ac   : >> { %s2916_s26 = sshll.u32 %s4307_s25, 8  ;;  %p2203_p12 = scmp.ge.s32.totalorder %s2204_s24, %s4107_s22 }
 0x1ad   : >> { %s2343_s20 = scalar_lea.vmem %s3711_s8, %s2916_s26 [#allocation2]   ;;  %s2344_s15 = scalar_lea.vmem %s4101_s18, %s2916_s26  }
 0x1ae   : >> { %s4300_s23 = smov %s4307_s25  ;;  %2206 = sbr.rel (!%p2203_p12) target bundleno = 385 (0x181), region = 118 }
 0x1b5 PF: > { %s4275_s27 = sand.u32 63, %s4305_s11   ;;  %s3055_s28 = sshll.u32 %s4107_s22, 8 }
 0x1b6   : > { %s2349_s29 = scalar_lea.vmem %s3711_s8, %s3055_s28 [#allocation2]   ;;  %s2351_s30 = scalar_lea.vmem %s4101_s18, %s3055_s28  }
 0x1b7   : > { %p2921_p13 = scmp.le.s32.totalorder %s4275_s27, 0 }
 0x1b8   : > { %s3487_s4 = smov (!%p2921_p13), %s2351_s30   ;;  %s3491_s5 = smov (!%p2921_p13), %s2349_s29  }
 0x1b9   : > { %2613 = sbr.rel (%p2921_p13) target bundleno = 458 (0x1ca), region = 123  ;;  %s3495_s6 = smov (!%p2921_p13), 0  }
 0x1ba   : > { %s3499_s7 = smov (!%p2921_p13), 0  }
 0x1c0 LB: >> { %v2361_v14 = vld [vmem:[%s3493_s5] sm:$0xf]  ;;  %s2363_s9 = sadd.s32 1, %s3497_s6  ;;  %s2355_s7 = sadd.s32 1, %s3501_s7   ;;  %s3501_s7 = sphi %s3499_s7, %s2355_s7   ;;  %s3497_s6 = sphi %s3495_s6, %s3496_s6   ;;  %s3493_s5 = sphi %s3491_s5, %s2368_s5   ;;  %s3489_s4 = sphi %s3487_s4, %s2369_s4  }
 0x1c1   : >> { %2362 = vst [vmem:[%s3489_s4] sm:$0xf] %v2361_v14  ;;  %p2364_p0 = scmp.ge.s32.totalorder %s2363_s9, %s4275_s27  ;;  %p2354_p1 = scmp.ge.s32.totalorder %s2355_s7, %s4275_s27 }
 0x1c3   : >> { %s4309_s9 = smov (%p2364_p0, %s2363_s9), 0  ;;  %2357 = sbr.rel (!%p2354_p1) target bundleno = 448 (0x1c0), region = 129 }
 0x1c4   : >> { %s2922_s8 = sshll.u32 %s4309_s9, 2  ;;  %s3496_s6 = smov %s4309_s9  }
 0x1c5   : >> { %s2368_s5 = scalar_lea.vmem %s2349_s29, %s2922_s8 [#allocation2]   ;;  %s2369_s4 = scalar_lea.vmem %s2351_s30, %s2922_s8  }
 0x1ca PF: > { %p10_p2 = scmp.ge.s32.totalorder %s3539_s16, 4   ;;  %s4301_s12 = smov %s3465_s13 }
 0x1cb   : > { %s4302_s13 = smov %s3547_s19  ;;  %s4303_s14 = smov %s3539_s16 }
 0x1cc   :  { %12 = sbr.rel (!%p10_p2) target bundleno = 2 (0x2), region = 140 }

// kernel: _lambda_.8
= control target key start
LH: loop header
LB: loop body
LE: loop exit
PB: predicated region body
PF: predicated region fallthrough
CT: control target
= control target key end

     0   :  { %s519_s22 = smov 96   ;;  %vm456_vm0 = vcmask 257024   ;;  %vm458_vm1 = vcmask 256000   ;;  %s1370_s0 = inlined_call_operand.vmem [shape: bf16[28,2,14,64], index: 0, kind: input, shape index: {}]   ;;  %s1371_s1 = inlined_call_operand.vmem [shape: bf16[28,14,32], index: 1, kind: output, shape index: {}]  }
   0x1   :  { %v12_v0 = vld [vmem:[%s1370_s0 + $0x10] sm:$0xf]  ;;  %v14_v1 = vld [vmem:[%s1370_s0 + $0x18] sm:$0xf]  ;;  %v8_v2 = vld [vmem:[%s1370_s0] sm:$0xf] }
   0x2   :  { %v539_v3 = vmax.bf16 %v14_v1, %v12_v0  ;;  %v10_v4 = vld [vmem:[%s1370_s0 + $0x8] sm:$0xf]  ;;  %v13_v5 = vld [vmem:[%s1370_s0 + $0x14] sm:$0x7]  ;;  %v15_v6 = vld [vmem:[%s1370_s0 + $0x1c] sm:$0x7] }
   0x3   :  { %v550_v7 = vmax.bf16 %v10_v4, %v8_v2  ;;  %v9_v8 = vld [vmem:[%s1370_s0 + $0x4] sm:$0x7]  ;;  %v11_v9 = vld [vmem:[%s1370_s0 + $0xc] sm:$0x7]  ;;  %v560_v10 = vmax.bf16 %v15_v6, %v13_v5  ;;  %v16_v14 = vld [vmem:[%s1370_s0 + $0x20] sm:$0xf] }
   0x4   :  { %236 = vrot.lane.b32.xlu1 %v539_v3, %s519_s22  ;;  %v564_v11 = vmax.bf16 %v11_v9, %v9_v8  ;;  %v17_v12 = vld [vmem:[%s1370_s0 + $0x24] sm:$0x7]  ;;  %v19_v13 = vld [vmem:[%s1370_s0 + $0x2c] sm:$0x7]  ;;  %v18_v15 = vld [vmem:[%s1370_s0 + $0x28] sm:$0xf] }
   0x5   :  { %232 = vrot.lane.b32.xlu0 %v550_v7, %s519_s22  ;;  %v580_v16 = vmax.bf16 %v19_v13, %v17_v12  ;;  %v584_v17 = vmax.bf16 %v18_v15, %v16_v14  ;;  %v21_v18 = vld [vmem:[%s1370_s0 + $0x34] sm:$0x7]  ;;  %v23_v19 = vld [vmem:[%s1370_s0 + $0x3c] sm:$0x7]  ;;  %v20_v20 = vld [vmem:[%s1370_s0 + $0x30] sm:$0xf] }
   0x6   :  { %v22_v21 = vld [vmem:[%s1370_s0 + $0x38] sm:$0xf]  ;;  %v600_v22 = vmax.bf16 %v23_v19, %v21_v18  ;;  %v25_v24 = vld [vmem:[%s1370_s0 + $0x44] sm:$0x7]  ;;  %v27_v25 = vld [vmem:[%s1370_s0 + $0x4c] sm:$0x7] }
   0x7   :  { %v604_v23 = vmax.bf16 %v22_v21, %v20_v20  ;;  %v24_v26 = vld [vmem:[%s1370_s0 + $0x40] sm:$0xf]  ;;  %v26_v27 = vld [vmem:[%s1370_s0 + $0x48] sm:$0xf]  ;;  %v620_v28 = vmax.bf16 %v27_v25, %v25_v24  ;;  %v29_v30 = vld [vmem:[%s1370_s0 + $0x54] sm:$0x7] }
   0x8   :  { %238 = vrot.lane.b32.xlu1 %v560_v10, %s519_s22  ;;  %v624_v29 = vmax.bf16 %v26_v27, %v24_v26  ;;  %v31_v31 = vld [vmem:[%s1370_s0 + $0x5c] sm:$0x7]  ;;  %v28_v32 = vld [vmem:[%s1370_s0 + $0x50] sm:$0xf]  ;;  %v30_v33 = vld [vmem:[%s1370_s0 + $0x58] sm:$0xf] }
   0x9   :  { %234 = vrot.lane.b32.xlu0 %v564_v11, %s519_s22  ;;  %v640_v34 = vmax.bf16 %v31_v31, %v29_v30  ;;  %v644_v35 = vmax.bf16 %v30_v33, %v28_v32  ;;  %v33_v36 = vld [vmem:[%s1370_s0 + $0x64] sm:$0x7]  ;;  %v35_v37 = vld [vmem:[%s1370_s0 + $0x6c] sm:$0x7]  ;;  %v32_v38 = vld [vmem:[%s1370_s0 + $0x60] sm:$0xf] }
   0xa   :  { %v34_v39 = vld [vmem:[%s1370_s0 + $0x68] sm:$0xf]  ;;  %v660_v40 = vmax.bf16 %v35_v37, %v33_v36  ;;  %v37_v42 = vld [vmem:[%s1370_s0 + $0x74] sm:$0x7]  ;;  %v39_v43 = vld [vmem:[%s1370_s0 + $0x7c] sm:$0x7] }
   0xb   :  { %v664_v41 = vmax.bf16 %v34_v39, %v32_v38  ;;  %v36_v44 = vld [vmem:[%s1370_s0 + $0x70] sm:$0xf]  ;;  %v38_v45 = vld [vmem:[%s1370_s0 + $0x78] sm:$0xf]  ;;  %v680_v46 = vmax.bf16 %v39_v43, %v37_v42  ;;  %v41_v48 = vld [vmem:[%s1370_s0 + $0x84] sm:$0x7] }
   0xc   :  { %242 = vrot.lane.b32.xlu1 %v580_v16, %s519_s22  ;;  %v684_v47 = vmax.bf16 %v38_v45, %v36_v44  ;;  %v43_v49 = vld [vmem:[%s1370_s0 + $0x8c] sm:$0x7]  ;;  %v40_v50 = vld [vmem:[%s1370_s0 + $0x80] sm:$0xf]  ;;  %v42_v51 = vld [vmem:[%s1370_s0 + $0x88] sm:$0xf] }
   0xd   :  { %240 = vrot.lane.b32.xlu0 %v584_v17, %s519_s22  ;;  %v700_v52 = vmax.bf16 %v43_v49, %v41_v48  ;;  %v704_v53 = vmax.bf16 %v42_v51, %v40_v50  ;;  %v45_v54 = vld [vmem:[%s1370_s0 + $0x94] sm:$0x7]  ;;  %v47_v55 = vld [vmem:[%s1370_s0 + $0x9c] sm:$0x7]  ;;  %v44_v56 = vld [vmem:[%s1370_s0 + $0x90] sm:$0xf] }
   0xe   :  { %v46_v57 = vld [vmem:[%s1370_s0 + $0x98] sm:$0xf]  ;;  %v720_v58 = vmax.bf16 %v47_v55, %v45_v54  ;;  %v49_v60 = vld [vmem:[%s1370_s0 + $0xa4] sm:$0x7]  ;;  %v51_v61 = vld [vmem:[%s1370_s0 + $0xac] sm:$0x7] }
   0xf   :  { %v724_v59 = vmax.bf16 %v46_v57, %v44_v56  ;;  %v48_v62 = vld [vmem:[%s1370_s0 + $0xa0] sm:$0xf]  ;;  %v50_v63 = vld [vmem:[%s1370_s0 + $0xa8] sm:$0xf]  ;;  %v740_v0 = vmax.bf16 %v51_v61, %v49_v60  ;;  %v53_v2 = vld [vmem:[%s1370_s0 + $0xb4] sm:$0x7] }
  0x10   :  { %246 = vrot.lane.b32.xlu1 %v600_v22, %s519_s22  ;;  %v744_v1 = vmax.bf16 %v50_v63, %v48_v62  ;;  %v55_v4 = vld [vmem:[%s1370_s0 + $0xbc] sm:$0x7]  ;;  %v52_v5 = vld [vmem:[%s1370_s0 + $0xb0] sm:$0xf]  ;;  %v54_v6 = vld [vmem:[%s1370_s0 + $0xb8] sm:$0xf] }
  0x11   :  { %244 = vrot.lane.b32.xlu0 %v604_v23, %s519_s22  ;;  %v760_v8 = vmax.bf16 %v55_v4, %v53_v2  ;;  %v764_v9 = vmax.bf16 %v54_v6, %v52_v5  ;;  %v57_v12 = vld [vmem:[%s1370_s0 + $0xc4] sm:$0x7]  ;;  %v59_v13 = vld [vmem:[%s1370_s0 + $0xcc] sm:$0x7]  ;;  %v56_v14 = vld [vmem:[%s1370_s0 + $0xc0] sm:$0xf] }
  0x12   :  { %v58_v15 = vld [vmem:[%s1370_s0 + $0xc8] sm:$0xf]  ;;  %v780_v18 = vmax.bf16 %v59_v13, %v57_v12  ;;  %v61_v20 = vld [vmem:[%s1370_s0 + $0xd4] sm:$0x7]  ;;  %v63_v21 = vld [vmem:[%s1370_s0 + $0xdc] sm:$0x7] }
  0x13   :  { %v784_v19 = vmax.bf16 %v58_v15, %v56_v14  ;;  %v60_v24 = vld [vmem:[%s1370_s0 + $0xd0] sm:$0xf]  ;;  %v62_v25 = vld [vmem:[%s1370_s0 + $0xd8] sm:$0xf]  ;;  %v800_v26 = vmax.bf16 %v63_v21, %v61_v20  ;;  %v65_v30 = vld [vmem:[%s1370_s0 + $0xe4] sm:$0x7] }
  0x14   :  { %250 = vrot.lane.b32.xlu1 %v620_v28, %s519_s22  ;;  %v804_v27 = vmax.bf16 %v62_v25, %v60_v24  ;;  %v67_v31 = vld [vmem:[%s1370_s0 + $0xec] sm:$0x7]  ;;  %v64_v32 = vld [vmem:[%s1370_s0 + $0xe0] sm:$0xf]  ;;  %v66_v33 = vld [vmem:[%s1370_s0 + $0xe8] sm:$0xf] }
  0x15   :  { %248 = vrot.lane.b32.xlu0 %v624_v29, %s519_s22  ;;  %v820_v36 = vmax.bf16 %v67_v31, %v65_v30  ;;  %v824_v37 = vmax.bf16 %v66_v33, %v64_v32  ;;  %v69_v38 = vld [vmem:[%s1370_s0 + $0xf4] sm:$0x7]  ;;  %v71_v39 = vld [vmem:[%s1370_s0 + $0xfc] sm:$0x7]  ;;  %v68_v42 = vld [vmem:[%s1370_s0 + $0xf0] sm:$0xf] }
  0x16   :  { %v70_v43 = vld [vmem:[%s1370_s0 + $0xf8] sm:$0xf]  ;;  %v840_v44 = vmax.bf16 %v71_v39, %v69_v38  ;;  %v73_v48 = vld [vmem:[%s1370_s0 + $0x104] sm:$0x7]  ;;  %v75_v49 = vld [vmem:[%s1370_s0 + $0x10c] sm:$0x7] }
  0x17   :  { %v844_v45 = vmax.bf16 %v70_v43, %v68_v42  ;;  %v72_v50 = vld [vmem:[%s1370_s0 + $0x100] sm:$0xf]  ;;  %v74_v51 = vld [vmem:[%s1370_s0 + $0x108] sm:$0xf]  ;;  %v860_v54 = vmax.bf16 %v75_v49, %v73_v48  ;;  %v77_v56 = vld [vmem:[%s1370_s0 + $0x114] sm:$0x7] }
  0x18   :  { %254 = vrot.lane.b32.xlu1 %v640_v34, %s519_s22  ;;  %v864_v55 = vmax.bf16 %v74_v51, %v72_v50  ;;  %v79_v57 = vld [vmem:[%s1370_s0 + $0x11c] sm:$0x7]  ;;  %v76_v60 = vld [vmem:[%s1370_s0 + $0x110] sm:$0xf]  ;;  %v78_v61 = vld [vmem:[%s1370_s0 + $0x118] sm:$0xf] }
  0x19   :  { %252 = vrot.lane.b32.xlu0 %v644_v35, %s519_s22  ;;  %v880_v62 = vmax.bf16 %v79_v57, %v77_v56  ;;  %v884_v63 = vmax.bf16 %v78_v61, %v76_v60  ;;  %v81_v2 = vld [vmem:[%s1370_s0 + $0x124] sm:$0x7]  ;;  %v83_v4 = vld [vmem:[%s1370_s0 + $0x12c] sm:$0x7]  ;;  %v80_v5 = vld [vmem:[%s1370_s0 + $0x120] sm:$0xf] }
  0x1a   :  { %v82_v6 = vld [vmem:[%s1370_s0 + $0x128] sm:$0xf]  ;;  %v900_v12 = vmax.bf16 %v83_v4, %v81_v2  ;;  %v85_v14 = vld [vmem:[%s1370_s0 + $0x134] sm:$0x7]  ;;  %v87_v15 = vld [vmem:[%s1370_s0 + $0x13c] sm:$0x7] }
  0x1b   :  { %v904_v13 = vmax.bf16 %v82_v6, %v80_v5  ;;  %v84_v20 = vld [vmem:[%s1370_s0 + $0x130] sm:$0xf]  ;;  %v86_v21 = vld [vmem:[%s1370_s0 + $0x138] sm:$0xf]  ;;  %v920_v24 = vmax.bf16 %v87_v15, %v85_v14  ;;  %v89_v30 = vld [vmem:[%s1370_s0 + $0x144] sm:$0x7] }
  0x1c   :  { %258 = vrot.lane.b32.xlu1 %v660_v40, %s519_s22  ;;  %v924_v25 = vmax.bf16 %v86_v21, %v84_v20  ;;  %v91_v31 = vld [vmem:[%s1370_s0 + $0x14c] sm:$0x7]  ;;  %v88_v32 = vld [vmem:[%s1370_s0 + $0x140] sm:$0xf]  ;;  %v90_v33 = vld [vmem:[%s1370_s0 + $0x148] sm:$0xf] }
  0x1d   :  { %256 = vrot.lane.b32.xlu0 %v664_v41, %s519_s22  ;;  %v940_v38 = vmax.bf16 %v91_v31, %v89_v30  ;;  %v944_v39 = vmax.bf16 %v90_v33, %v88_v32  ;;  %v93_v42 = vld [vmem:[%s1370_s0 + $0x154] sm:$0x7]  ;;  %v95_v43 = vld [vmem:[%s1370_s0 + $0x15c] sm:$0x7]  ;;  %v92_v48 = vld [vmem:[%s1370_s0 + $0x150] sm:$0xf] }
  0x1e   :  { %v94_v49 = vld [vmem:[%s1370_s0 + $0x158] sm:$0xf]  ;;  %v960_v50 = vmax.bf16 %v95_v43, %v93_v42  ;;  %v97_v56 = vld [vmem:[%s1370_s0 + $0x164] sm:$0x7]  ;;  %v99_v57 = vld [vmem:[%s1370_s0 + $0x16c] sm:$0x7] }
  0x1f   :  { %v964_v51 = vmax.bf16 %v94_v49, %v92_v48  ;;  %v96_v60 = vld [vmem:[%s1370_s0 + $0x160] sm:$0xf]  ;;  %v98_v61 = vld [vmem:[%s1370_s0 + $0x168] sm:$0xf]  ;;  %v980_v2 = vmax.bf16 %v99_v57, %v97_v56  ;;  %v101_v5 = vld [vmem:[%s1370_s0 + $0x174] sm:$0x7] }
  0x20   :  { %262 = vrot.lane.b32.xlu1 %v680_v46, %s519_s22  ;;  %v984_v4 = vmax.bf16 %v98_v61, %v96_v60  ;;  %v103_v6 = vld [vmem:[%s1370_s0 + $0x17c] sm:$0x7]  ;;  %v100_v14 = vld [vmem:[%s1370_s0 + $0x170] sm:$0xf]  ;;  %v102_v15 = vld [vmem:[%s1370_s0 + $0x178] sm:$0xf] }
  0x21   :  { %260 = vrot.lane.b32.xlu0 %v684_v47, %s519_s22  ;;  %v1000_v20 = vmax.bf16 %v103_v6, %v101_v5  ;;  %v1004_v21 = vmax.bf16 %v102_v15, %v100_v14  ;;  %v105_v30 = vld [vmem:[%s1370_s0 + $0x184] sm:$0x7]  ;;  %v107_v31 = vld [vmem:[%s1370_s0 + $0x18c] sm:$0x7]  ;;  %v104_v32 = vld [vmem:[%s1370_s0 + $0x180] sm:$0xf] }
  0x22   :  { %v106_v33 = vld [vmem:[%s1370_s0 + $0x188] sm:$0xf]  ;;  %v1020_v42 = vmax.bf16 %v107_v31, %v105_v30  ;;  %v109_v48 = vld [vmem:[%s1370_s0 + $0x194] sm:$0x7]  ;;  %v111_v49 = vld [vmem:[%s1370_s0 + $0x19c] sm:$0x7] }
  0x23   :  { %v1024_v43 = vmax.bf16 %v106_v33, %v104_v32  ;;  %v108_v56 = vld [vmem:[%s1370_s0 + $0x190] sm:$0xf]  ;;  %v110_v57 = vld [vmem:[%s1370_s0 + $0x198] sm:$0xf]  ;;  %v1040_v60 = vmax.bf16 %v111_v49, %v109_v48  ;;  %v113_v5 = vld [vmem:[%s1370_s0 + $0x1a4] sm:$0x7] }
  0x24   :  { %266 = vrot.lane.b32.xlu1 %v700_v52, %s519_s22  ;;  %v1044_v61 = vmax.bf16 %v110_v57, %v108_v56  ;;  %v115_v6 = vld [vmem:[%s1370_s0 + $0x1ac] sm:$0x7]  ;;  %v112_v14 = vld [vmem:[%s1370_s0 + $0x1a0] sm:$0xf]  ;;  %v114_v15 = vld [vmem:[%s1370_s0 + $0x1a8] sm:$0xf] }
  0x25   :  { %264 = vrot.lane.b32.xlu0 %v704_v53, %s519_s22  ;;  %v1060_v30 = vmax.bf16 %v115_v6, %v113_v5  ;;  %v1064_v31 = vmax.bf16 %v114_v15, %v112_v14  ;;  %v117_v32 = vld [vmem:[%s1370_s0 + $0x1b4] sm:$0x7]  ;;  %v119_v33 = vld [vmem:[%s1370_s0 + $0x1bc] sm:$0x7]  ;;  %v116_v48 = vld [vmem:[%s1370_s0 + $0x1b0] sm:$0xf] }
  0x26   :  { %v118_v49 = vld [vmem:[%s1370_s0 + $0x1b8] sm:$0xf]  ;;  %v1080_v56 = vmax.bf16 %v119_v33, %v117_v32 }
  0x27   :  { %v1084_v57 = vmax.bf16 %v118_v49, %v116_v48 }
  0x28   :  { %270 = vrot.lane.b32.xlu1 %v720_v58, %s519_s22 }
  0x29   :  { %268 = vrot.lane.b32.xlu0 %v724_v59, %s519_s22 }
  0x2c   :  { %274 = vrot.lane.b32.xlu1 %v740_v0, %s519_s22 }
  0x2d   :  { %272 = vrot.lane.b32.xlu0 %v744_v1, %s519_s22 }
  0x30   :  { %278 = vrot.lane.b32.xlu1 %v760_v8, %s519_s22 }
  0x31   :  { %276 = vrot.lane.b32.xlu0 %v764_v9, %s519_s22 }
  0x34   :  { %282 = vrot.lane.b32.xlu1 %v780_v18, %s519_s22 }
  0x35   :  { %280 = vrot.lane.b32.xlu0 %v784_v19, %s519_s22 }
  0x38   :  { %286 = vrot.lane.b32.xlu1 %v800_v26, %s519_s22 }
  0x39   :  { %284 = vrot.lane.b32.xlu0 %v804_v27, %s519_s22 }
  0x3c   :  { %290 = vrot.lane.b32.xlu1 %v820_v36, %s519_s22 }
  0x3d   :  { %288 = vrot.lane.b32.xlu0 %v824_v37, %s519_s22 }
  0x40   :  { %294 = vrot.lane.b32.xlu1 %v840_v44, %s519_s22 }
  0x41   :  { %292 = vrot.lane.b32.xlu0 %v844_v45, %s519_s22 }
  0x44   :  { %298 = vrot.lane.b32.xlu1 %v860_v54, %s519_s22 }
  0x45   :  { %296 = vrot.lane.b32.xlu0 %v864_v55, %s519_s22 }
  0x48   :  { %302 = vrot.lane.b32.xlu1 %v880_v62, %s519_s22 }
  0x49   :  { %300 = vrot.lane.b32.xlu0 %v884_v63, %s519_s22 }
  0x4c   :  { %306 = vrot.lane.b32.xlu1 %v900_v12, %s519_s22 }
  0x4d   :  { %304 = vrot.lane.b32.xlu0 %v904_v13, %s519_s22 }
  0x50   :  { %310 = vrot.lane.b32.xlu1 %v920_v24, %s519_s22 }
  0x51   :  { %308 = vrot.lane.b32.xlu0 %v924_v25, %s519_s22 }
  0x54   :  { %314 = vrot.lane.b32.xlu1 %v940_v38, %s519_s22 }
  0x55   :  { %312 = vrot.lane.b32.xlu0 %v944_v39, %s519_s22 }
  0x58   :  { %318 = vrot.lane.b32.xlu1 %v960_v50, %s519_s22 }
  0x59   :  { %316 = vrot.lane.b32.xlu0 %v964_v51, %s519_s22 }
  0x5c   :  { %322 = vrot.lane.b32.xlu1 %v980_v2, %s519_s22 }
  0x5d   :  { %320 = vrot.lane.b32.xlu0 %v984_v4, %s519_s22 }
  0x60   :  { %326 = vrot.lane.b32.xlu1 %v1000_v20, %s519_s22 }
  0x61   :  { %324 = vrot.lane.b32.xlu0 %v1004_v21, %s519_s22 }
  0x64   :  { %330 = vrot.lane.b32.xlu1 %v1020_v42, %s519_s22 }
  0x65   :  { %328 = vrot.lane.b32.xlu0 %v1024_v43, %s519_s22 }
  0x68   :  { %334 = vrot.lane.b32.xlu1 %v1040_v60, %s519_s22 }
  0x69   :  { %332 = vrot.lane.b32.xlu0 %v1044_v61, %s519_s22 }
  0x6c   :  { %338 = vrot.lane.b32.xlu1 %v1060_v30, %s519_s22 }
  0x6d   :  { %336 = vrot.lane.b32.xlu0 %v1064_v31, %s519_s22 }
  0x70   :  { %342 = vrot.lane.b32.xlu1 %v1080_v56, %s519_s22 }
  0x71   :  { %340 = vrot.lane.b32.xlu0 %v1084_v57, %s519_s22 }
  0x76   :  { %v237_v5 = vpop.permute.xlu1 %236 }
  0x77   :  { %v402_v6 = vmax.bf16 %v237_v5, %v539_v3  ;;  %v233_v14 = vpop.permute.xlu0 %232 }
  0x78   :  { %v400_v15 = vmax.bf16 %v233_v14, %v550_v7 }
  0x79   :  { %460 = vst.msk [vmem:[%s1371_s1 + $0x8] sm:$0xf] %vm456_vm0, %v402_v6 }
  0x7a   :  { %457 = vst.msk [vmem:[%s1371_s1] sm:$0xf] %vm456_vm0, %v400_v15  ;;  %v239_v32 = vpop.permute.xlu1 %238 }
  0x7b   :  { %v403_v33 = vmax.bf16 %v239_v32, %v560_v10  ;;  %v235_v48 = vpop.permute.xlu0 %234 }
  0x7c   :  { %v401_v3 = vmax.bf16 %v235_v48, %v564_v11 }
  0x7d   :  { %461 = vst.msk [vmem:[%s1371_s1 + $0xc] sm:$0x7] %vm458_vm1, %v403_v33 }
  0x7e   :  { %459 = vst.msk [vmem:[%s1371_s1 + $0x4] sm:$0x7] %vm458_vm1, %v401_v3  ;;  %v243_v7 = vpop.permute.xlu1 %242 }
  0x7f   :  { %v405_v49 = vmax.bf16 %v243_v7, %v580_v16  ;;  %v241_v5 = vpop.permute.xlu0 %240 }
  0x80   :  { %v404_v6 = vmax.bf16 %v241_v5, %v584_v17 }
  0x81   :  { %463 = vst.msk [vmem:[%s1371_s1 + $0x14] sm:$0x7] %vm458_vm1, %v405_v49 }
  0x82   :  { %462 = vst.msk [vmem:[%s1371_s1 + $0x10] sm:$0xf] %vm456_vm0, %v404_v6  ;;  %v247_v10 = vpop.permute.xlu1 %246 }
  0x83   :  { %v407_v11 = vmax.bf16 %v247_v10, %v600_v22  ;;  %v245_v14 = vpop.permute.xlu0 %244 }
  0x84   :  { %v406_v15 = vmax.bf16 %v245_v14, %v604_v23 }
  0x85   :  { %465 = vst.msk [vmem:[%s1371_s1 + $0x1c] sm:$0x7] %vm458_vm1, %v407_v11 }
  0x86   :  { %464 = vst.msk [vmem:[%s1371_s1 + $0x18] sm:$0xf] %vm456_vm0, %v406_v15  ;;  %v251_v16 = vpop.permute.xlu1 %250 }
  0x87   :  { %v409_v17 = vmax.bf16 %v251_v16, %v620_v28  ;;  %v249_v32 = vpop.permute.xlu0 %248 }
  0x88   :  { %v408_v33 = vmax.bf16 %v249_v32, %v624_v29 }
  0x89   :  { %467 = vst.msk [vmem:[%s1371_s1 + $0x24] sm:$0x7] %vm458_vm1, %v409_v17 }
  0x8a   :  { %466 = vst.msk [vmem:[%s1371_s1 + $0x20] sm:$0xf] %vm456_vm0, %v408_v33  ;;  %v255_v22 = vpop.permute.xlu1 %254 }
  0x8b   :  { %v411_v23 = vmax.bf16 %v255_v22, %v640_v34  ;;  %v253_v48 = vpop.permute.xlu0 %252 }
  0x8c   :  { %v410_v3 = vmax.bf16 %v253_v48, %v644_v35 }
  0x8d   :  { %469 = vst.msk [vmem:[%s1371_s1 + $0x2c] sm:$0x7] %vm458_vm1, %v411_v23 }
  0x8e   :  { %468 = vst.msk [vmem:[%s1371_s1 + $0x28] sm:$0xf] %vm456_vm0, %v410_v3  ;;  %v259_v28 = vpop.permute.xlu1 %258 }
  0x8f   :  { %v413_v29 = vmax.bf16 %v259_v28, %v660_v40  ;;  %v257_v7 = vpop.permute.xlu0 %256 }
  0x90   :  { %v412_v49 = vmax.bf16 %v257_v7, %v664_v41 }
  0x91   :  { %471 = vst.msk [vmem:[%s1371_s1 + $0x34] sm:$0x7] %vm458_vm1, %v413_v29 }
  0x92   :  { %470 = vst.msk [vmem:[%s1371_s1 + $0x30] sm:$0xf] %vm456_vm0, %v412_v49  ;;  %v263_v34 = vpop.permute.xlu1 %262 }
  0x93   :  { %v415_v35 = vmax.bf16 %v263_v34, %v680_v46  ;;  %v261_v5 = vpop.permute.xlu0 %260 }
  0x94   :  { %v414_v6 = vmax.bf16 %v261_v5, %v684_v47 }
  0x95   :  { %473 = vst.msk [vmem:[%s1371_s1 + $0x3c] sm:$0x7] %vm458_vm1, %v415_v35 }
  0x96   :  { %472 = vst.msk [vmem:[%s1371_s1 + $0x38] sm:$0xf] %vm456_vm0, %v414_v6  ;;  %v267_v40 = vpop.permute.xlu1 %266 }
  0x97   :  { %v417_v41 = vmax.bf16 %v267_v40, %v700_v52  ;;  %v265_v10 = vpop.permute.xlu0 %264 }
  0x98   :  { %v416_v11 = vmax.bf16 %v265_v10, %v704_v53 }
  0x99   :  { %475 = vst.msk [vmem:[%s1371_s1 + $0x44] sm:$0x7] %vm458_vm1, %v417_v41 }
  0x9a   :  { %474 = vst.msk [vmem:[%s1371_s1 + $0x40] sm:$0xf] %vm456_vm0, %v416_v11  ;;  %v271_v46 = vpop.permute.xlu1 %270 }
  0x9b   :  { %v419_v47 = vmax.bf16 %v271_v46, %v720_v58  ;;  %v269_v14 = vpop.permute.xlu0 %268 }
  0x9c   :  { %v418_v15 = vmax.bf16 %v269_v14, %v724_v59 }
  0x9d   :  { %477 = vst.msk [vmem:[%s1371_s1 + $0x4c] sm:$0x7] %vm458_vm1, %v419_v47 }
  0x9e   :  { %476 = vst.msk [vmem:[%s1371_s1 + $0x48] sm:$0xf] %vm456_vm0, %v418_v15  ;;  %v275_v52 = vpop.permute.xlu1 %274 }
  0x9f   :  { %v421_v53 = vmax.bf16 %v275_v52, %v740_v0  ;;  %v273_v16 = vpop.permute.xlu0 %272 }
  0xa0   :  { %v420_v17 = vmax.bf16 %v273_v16, %v744_v1 }
  0xa1   :  { %479 = vst.msk [vmem:[%s1371_s1 + $0x54] sm:$0x7] %vm458_vm1, %v421_v53 }
  0xa2   :  { %478 = vst.msk [vmem:[%s1371_s1 + $0x50] sm:$0xf] %vm456_vm0, %v420_v17  ;;  %v279_v58 = vpop.permute.xlu1 %278 }
  0xa3   :  { %v423_v59 = vmax.bf16 %v279_v58, %v760_v8  ;;  %v277_v32 = vpop.permute.xlu0 %276 }
  0xa4   :  { %v422_v33 = vmax.bf16 %v277_v32, %v764_v9 }
  0xa5   :  { %481 = vst.msk [vmem:[%s1371_s1 + $0x5c] sm:$0x7] %vm458_vm1, %v423_v59 }
  0xa6   :  { %480 = vst.msk [vmem:[%s1371_s1 + $0x58] sm:$0xf] %vm456_vm0, %v422_v33  ;;  %v283_v0 = vpop.permute.xlu1 %282 }
  0xa7   :  { %v425_v1 = vmax.bf16 %v283_v0, %v780_v18  ;;  %v281_v22 = vpop.permute.xlu0 %280 }
  0xa8   :  { %v424_v23 = vmax.bf16 %v281_v22, %v784_v19 }
  0xa9   :  { %483 = vst.msk [vmem:[%s1371_s1 + $0x64] sm:$0x7] %vm458_vm1, %v425_v1 }
  0xaa   :  { %482 = vst.msk [vmem:[%s1371_s1 + $0x60] sm:$0xf] %vm456_vm0, %v424_v23  ;;  %v287_v8 = vpop.permute.xlu1 %286 }
  0xab   :  { %v427_v9 = vmax.bf16 %v287_v8, %v800_v26  ;;  %v285_v48 = vpop.permute.xlu0 %284 }
  0xac   :  { %v426_v3 = vmax.bf16 %v285_v48, %v804_v27 }
  0xad   :  { %485 = vst.msk [vmem:[%s1371_s1 + $0x6c] sm:$0x7] %vm458_vm1, %v427_v9 }
  0xae   :  { %484 = vst.msk [vmem:[%s1371_s1 + $0x68] sm:$0xf] %vm456_vm0, %v426_v3  ;;  %v291_v18 = vpop.permute.xlu1 %290 }
  0xaf   :  { %v429_v19 = vmax.bf16 %v291_v18, %v820_v36  ;;  %v289_v28 = vpop.permute.xlu0 %288 }
  0xb0   :  { %v428_v29 = vmax.bf16 %v289_v28, %v824_v37 }
  0xb1   :  { %487 = vst.msk [vmem:[%s1371_s1 + $0x74] sm:$0x7] %vm458_vm1, %v429_v19 }
  0xb2   :  { %486 = vst.msk [vmem:[%s1371_s1 + $0x70] sm:$0xf] %vm456_vm0, %v428_v29  ;;  %v295_v26 = vpop.permute.xlu1 %294 }
  0xb3   :  { %v431_v27 = vmax.bf16 %v295_v26, %v840_v44  ;;  %v293_v7 = vpop.permute.xlu0 %292 }
  0xb4   :  { %v430_v49 = vmax.bf16 %v293_v7, %v844_v45 }
  0xb5   :  { %489 = vst.msk [vmem:[%s1371_s1 + $0x7c] sm:$0x7] %vm458_vm1, %v431_v27 }
  0xb6   :  { %488 = vst.msk [vmem:[%s1371_s1 + $0x78] sm:$0xf] %vm456_vm0, %v430_v49  ;;  %v299_v36 = vpop.permute.xlu1 %298 }
  0xb7   :  { %v433_v37 = vmax.bf16 %v299_v36, %v860_v54  ;;  %v297_v34 = vpop.permute.xlu0 %296 }
  0xb8   :  { %v432_v35 = vmax.bf16 %v297_v34, %v864_v55 }
  0xb9   :  { %491 = vst.msk [vmem:[%s1371_s1 + $0x84] sm:$0x7] %vm458_vm1, %v433_v37 }
  0xba   :  { %490 = vst.msk [vmem:[%s1371_s1 + $0x80] sm:$0xf] %vm456_vm0, %v432_v35  ;;  %v303_v44 = vpop.permute.xlu1 %302 }
  0xbb   :  { %v435_v45 = vmax.bf16 %v303_v44, %v880_v62  ;;  %v301_v5 = vpop.permute.xlu0 %300 }
  0xbc   :  { %v434_v6 = vmax.bf16 %v301_v5, %v884_v63 }
  0xbd   :  { %493 = vst.msk [vmem:[%s1371_s1 + $0x8c] sm:$0x7] %vm458_vm1, %v435_v45 }
  0xbe   :  { %492 = vst.msk [vmem:[%s1371_s1 + $0x88] sm:$0xf] %vm456_vm0, %v434_v6  ;;  %v307_v54 = vpop.permute.xlu1 %306 }
  0xbf   :  { %v437_v55 = vmax.bf16 %v307_v54, %v900_v12  ;;  %v305_v40 = vpop.permute.xlu0 %304 }
  0xc0   :  { %v436_v41 = vmax.bf16 %v305_v40, %v904_v13 }
  0xc1   :  { %495 = vst.msk [vmem:[%s1371_s1 + $0x94] sm:$0x7] %vm458_vm1, %v437_v55 }
  0xc2   :  { %494 = vst.msk [vmem:[%s1371_s1 + $0x90] sm:$0xf] %vm456_vm0, %v436_v41  ;;  %v311_v62 = vpop.permute.xlu1 %310 }
  0xc3   :  { %v439_v63 = vmax.bf16 %v311_v62, %v920_v24  ;;  %v309_v10 = vpop.permute.xlu0 %308 }
  0xc4   :  { %v438_v11 = vmax.bf16 %v309_v10, %v924_v25 }
  0xc5   :  { %497 = vst.msk [vmem:[%s1371_s1 + $0x9c] sm:$0x7] %vm458_vm1, %v439_v63 }
  0xc6   :  { %496 = vst.msk [vmem:[%s1371_s1 + $0x98] sm:$0xf] %vm456_vm0, %v438_v11  ;;  %v315_v12 = vpop.permute.xlu1 %314 }
  0xc7   :  { %v441_v13 = vmax.bf16 %v315_v12, %v940_v38  ;;  %v313_v46 = vpop.permute.xlu0 %312 }
  0xc8   :  { %v440_v47 = vmax.bf16 %v313_v46, %v944_v39 }
  0xc9   :  { %499 = vst.msk [vmem:[%s1371_s1 + $0xa4] sm:$0x7] %vm458_vm1, %v441_v13 }
  0xca   :  { %498 = vst.msk [vmem:[%s1371_s1 + $0xa0] sm:$0xf] %vm456_vm0, %v440_v47  ;;  %v319_v24 = vpop.permute.xlu1 %318 }
  0xcb   :  { %v443_v25 = vmax.bf16 %v319_v24, %v960_v50  ;;  %v317_v14 = vpop.permute.xlu0 %316 }
  0xcc   :  { %v442_v15 = vmax.bf16 %v317_v14, %v964_v51 }
  0xcd   :  { %501 = vst.msk [vmem:[%s1371_s1 + $0xac] sm:$0x7] %vm458_vm1, %v443_v25 }
  0xce   :  { %500 = vst.msk [vmem:[%s1371_s1 + $0xa8] sm:$0xf] %vm456_vm0, %v442_v15  ;;  %v323_v38 = vpop.permute.xlu1 %322 }
  0xcf   :  { %v445_v39 = vmax.bf16 %v323_v38, %v980_v2  ;;  %v321_v52 = vpop.permute.xlu0 %320 }
  0xd0   :  { %v444_v53 = vmax.bf16 %v321_v52, %v984_v4 }
  0xd1   :  { %503 = vst.msk [vmem:[%s1371_s1 + $0xb4] sm:$0x7] %vm458_vm1, %v445_v39 }
  0xd2   :  { %502 = vst.msk [vmem:[%s1371_s1 + $0xb0] sm:$0xf] %vm456_vm0, %v444_v53  ;;  %v327_v50 = vpop.permute.xlu1 %326 }
  0xd3   :  { %v447_v51 = vmax.bf16 %v327_v50, %v1000_v20  ;;  %v325_v16 = vpop.permute.xlu0 %324 }
  0xd4   :  { %v446_v17 = vmax.bf16 %v325_v16, %v1004_v21 }
  0xd5   :  { %505 = vst.msk [vmem:[%s1371_s1 + $0xbc] sm:$0x7] %vm458_vm1, %v447_v51 }
  0xd6   :  { %504 = vst.msk [vmem:[%s1371_s1 + $0xb8] sm:$0xf] %vm456_vm0, %v446_v17  ;;  %v331_v2 = vpop.permute.xlu1 %330 }
  0xd7   :  { %v449_v4 = vmax.bf16 %v331_v2, %v1020_v42  ;;  %v329_v58 = vpop.permute.xlu0 %328 }
  0xd8   :  { %v448_v59 = vmax.bf16 %v329_v58, %v1024_v43 }
  0xd9   :  { %507 = vst.msk [vmem:[%s1371_s1 + $0xc4] sm:$0x7] %vm458_vm1, %v449_v4 }
  0xda   :  { %506 = vst.msk [vmem:[%s1371_s1 + $0xc0] sm:$0xf] %vm456_vm0, %v448_v59  ;;  %v335_v20 = vpop.permute.xlu1 %334 }
  0xdb   :  { %v451_v21 = vmax.bf16 %v335_v20, %v1040_v60  ;;  %v333_v32 = vpop.permute.xlu0 %332 }
  0xdc   :  { %v450_v33 = vmax.bf16 %v333_v32, %v1044_v61 }
  0xdd   :  { %509 = vst.msk [vmem:[%s1371_s1 + $0xcc] sm:$0x7] %vm458_vm1, %v451_v21 }
  0xde   :  { %508 = vst.msk [vmem:[%s1371_s1 + $0xc8] sm:$0xf] %vm456_vm0, %v450_v33  ;;  %v339_v42 = vpop.permute.xlu1 %338 }
  0xdf   :  { %v453_v43 = vmax.bf16 %v339_v42, %v1060_v30  ;;  %v337_v0 = vpop.permute.xlu0 %336 }
  0xe0   :  { %v452_v1 = vmax.bf16 %v337_v0, %v1064_v31 }
  0xe1   :  { %511 = vst.msk [vmem:[%s1371_s1 + $0xd4] sm:$0x7] %vm458_vm1, %v453_v43 }
  0xe2   :  { %510 = vst.msk [vmem:[%s1371_s1 + $0xd0] sm:$0xf] %vm456_vm0, %v452_v1  ;;  %v343_v60 = vpop.permute.xlu1 %342 }
  0xe3   :  { %v455_v61 = vmax.bf16 %v343_v60, %v1080_v56  ;;  %v341_v22 = vpop.permute.xlu0 %340 }
  0xe4   :  { %v454_v23 = vmax.bf16 %v341_v22, %v1084_v57 }
  0xe5   :  { %513 = vst.msk [vmem:[%s1371_s1 + $0xdc] sm:$0x7] %vm458_vm1, %v455_v61 }
  0xe6   :  { %512 = vst.msk [vmem:[%s1371_s1 + $0xd8] sm:$0xf] %vm456_vm0, %v454_v23 }

// kernel: _lambda_.10
= control target key start
LH: loop header
LB: loop body
LE: loop exit
PB: predicated region body
PF: predicated region fallthrough
CT: control target
= control target key end

     0   :  { %s226_s0 = inlined_call_operand.vmem [shape: bf16[12,2,6,256], index: 0, kind: input, shape index: {}]   ;;  %s227_s1 = inlined_call_operand.vmem [shape: bf16[12,6,128], index: 1, kind: output, shape index: {}]  }
   0x1   :  { %v8_v0 = vld [vmem:[%s226_s0] sm:$0x77]  ;;  %v9_v1 = vld [vmem:[%s226_s0 + $0x8] sm:$0x77]  ;;  %v10_v2 = vld [vmem:[%s226_s0 + $0x10] sm:$0x77] }
   0x2   :  { %v32_v3 = vmax.bf16 %v9_v1, %v8_v0  ;;  %v11_v4 = vld [vmem:[%s226_s0 + $0x18] sm:$0x77]  ;;  %v12_v5 = vld [vmem:[%s226_s0 + $0x20] sm:$0x77]  ;;  %v13_v6 = vld [vmem:[%s226_s0 + $0x28] sm:$0x77] }
   0x3   :  { %v33_v7 = vmax.bf16 %v11_v4, %v10_v2  ;;  %v34_v8 = vmax.bf16 %v13_v6, %v12_v5  ;;  %v14_v9 = vld [vmem:[%s226_s0 + $0x30] sm:$0x77]  ;;  %v15_v10 = vld [vmem:[%s226_s0 + $0x38] sm:$0x77]  ;;  %v16_v11 = vld [vmem:[%s226_s0 + $0x40] sm:$0x77] }
   0x4   :  { %v56_v12 = vrot.slane %v32_v3, 4  ;;  %v35_v13 = vmax.bf16 %v15_v10, %v14_v9  ;;  %v17_v14 = vld [vmem:[%s226_s0 + $0x48] sm:$0x77]  ;;  %v18_v15 = vld [vmem:[%s226_s0 + $0x50] sm:$0x77] }
   0x5   :  { %v57_v16 = vrot.slane %v33_v7, 4  ;;  %v58_v17 = vrot.slane %v34_v8, 4  ;;  %v36_v18 = vmax.bf16 %v17_v14, %v16_v11  ;;  %v19_v19 = vld [vmem:[%s226_s0 + $0x58] sm:$0x77]  ;;  %v20_v20 = vld [vmem:[%s226_s0 + $0x60] sm:$0x77] }
   0x6   :  { %v80_v21 = vmax.bf16 %v56_v12, %v32_v3  ;;  %v59_v22 = vrot.slane %v35_v13, 4  ;;  %v37_v23 = vmax.bf16 %v19_v19, %v18_v15  ;;  %v21_v24 = vld [vmem:[%s226_s0 + $0x68] sm:$0x77]  ;;  %v22_v25 = vld [vmem:[%s226_s0 + $0x70] sm:$0x77] }
   0x7   :  { %v81_v26 = vmax.bf16 %v57_v16, %v33_v7  ;;  %v82_v27 = vmax.bf16 %v58_v17, %v34_v8  ;;  %v60_v28 = vrot.slane %v36_v18, 4  ;;  %v38_v29 = vmax.bf16 %v21_v24, %v20_v20  ;;  %v23_v30 = vld [vmem:[%s226_s0 + $0x78] sm:$0x77]  ;;  %v24_v31 = vld [vmem:[%s226_s0 + $0x80] sm:$0x77] }
   0x8   :  { %92 = vst [vmem:[%s227_s1] sm:$0x7] %v80_v21  ;;  %v83_v32 = vmax.bf16 %v59_v22, %v35_v13  ;;  %v61_v33 = vrot.slane %v37_v23, 4  ;;  %v39_v34 = vmax.bf16 %v23_v30, %v22_v25  ;;  %v25_v35 = vld [vmem:[%s226_s0 + $0x88] sm:$0x77]  ;;  %v26_v36 = vld [vmem:[%s226_s0 + $0x90] sm:$0x77] }
   0x9   :  { %93 = vst [vmem:[%s227_s1 + $0x4] sm:$0x7] %v81_v26  ;;  %94 = vst [vmem:[%s227_s1 + $0x8] sm:$0x7] %v82_v27  ;;  %v84_v37 = vmax.bf16 %v60_v28, %v36_v18  ;;  %v62_v38 = vrot.slane %v38_v29, 4  ;;  %v40_v39 = vmax.bf16 %v25_v35, %v24_v31 }
   0xa   :  { %v27_v40 = vld [vmem:[%s226_s0 + $0x98] sm:$0x77]  ;;  %v28_v41 = vld [vmem:[%s226_s0 + $0xa0] sm:$0x77]  ;;  %95 = vst [vmem:[%s227_s1 + $0xc] sm:$0x7] %v83_v32  ;;  %v85_v42 = vmax.bf16 %v61_v33, %v37_v23 }
   0xb   :  { %v63_v43 = vrot.slane %v39_v34, 4  ;;  %v41_v44 = vmax.bf16 %v27_v40, %v26_v36  ;;  %v29_v45 = vld [vmem:[%s226_s0 + $0xa8] sm:$0x77]  ;;  %v30_v46 = vld [vmem:[%s226_s0 + $0xb0] sm:$0x77]  ;;  %v86_v47 = vmax.bf16 %v62_v38, %v38_v29  ;;  %v64_v48 = vrot.slane %v40_v39, 4 }
   0xc   :  { %96 = vst [vmem:[%s227_s1 + $0x10] sm:$0x7] %v84_v37  ;;  %v42_v49 = vmax.bf16 %v29_v45, %v28_v41  ;;  %v31_v50 = vld [vmem:[%s226_s0 + $0xb8] sm:$0x77]  ;;  %97 = vst [vmem:[%s227_s1 + $0x14] sm:$0x7] %v85_v42 }
   0xd   :  { %v87_v51 = vmax.bf16 %v63_v43, %v39_v34  ;;  %v65_v52 = vrot.slane %v41_v44, 4  ;;  %v43_v53 = vmax.bf16 %v31_v50, %v30_v46  ;;  %98 = vst [vmem:[%s227_s1 + $0x18] sm:$0x7] %v86_v47  ;;  %v88_v54 = vmax.bf16 %v64_v48, %v40_v39 }
   0xe   :  { %v66_v55 = vrot.slane %v42_v49, 4 }
   0xf   :  { %99 = vst [vmem:[%s227_s1 + $0x1c] sm:$0x7] %v87_v51  ;;  %v89_v56 = vmax.bf16 %v65_v52, %v41_v44  ;;  %v67_v57 = vrot.slane %v43_v53, 4  ;;  %100 = vst [vmem:[%s227_s1 + $0x20] sm:$0x7] %v88_v54 }
  0x10   :  { %v90_v58 = vmax.bf16 %v66_v55, %v42_v49 }
  0x11   :  { %101 = vst [vmem:[%s227_s1 + $0x24] sm:$0x7] %v89_v56  ;;  %v91_v59 = vmax.bf16 %v67_v57, %v43_v53 }
  0x12   :  { %102 = vst [vmem:[%s227_s1 + $0x28] sm:$0x7] %v90_v58 }
  0x13   :  { %103 = vst [vmem:[%s227_s1 + $0x2c] sm:$0x7] %v91_v59 }

// kernel: _lambda_.9
= control target key start
LH: loop header
LB: loop body
LE: loop exit
PB: predicated region body
PF: predicated region fallthrough
CT: control target
= control target key end

     0   :  { %v1590_v0 = vmov 0   ;;  %vm508_vm0 = vcmask 261120   ;;  %s2002_s1 = inlined_call_operand.vmem [shape: bf16[288,128], index: 1, kind: input, shape index: {}]   ;;  %s2003_s0 = inlined_call_operand.vmem [shape: bf16[288,288], index: 0, kind: input, shape index: {}]   ;;  %s2004_s2 = inlined_call_operand.vmem [shape: f32[1,128], index: 2, kind: input, shape index: {}]   ;;  %s2005_s3 = inlined_call_operand.vmem [shape: bf16[288,128], index: 3, kind: output, shape index: {}]  }
   0x1   :  { %563 = vmatprep.subr.bf16.mxu0 %v1590_v0  ;;  %1467 = vmatprep.subr.bf16.mxu1 %v1590_v0  ;;  %v1500_v1 = vld [vmem:[%s2002_s1] sm:$0xff]   ;;  %v1501_v2 = vld [vmem:[%s2002_s1 + $0x8] sm:$0xff]   ;;  %v1502_v3 = vld [vmem:[%s2002_s1 + $0x10] sm:$0xff]  }
   0x2   :  { %564 = vmatpush1.bf16.msra.mxu0 %v1500_v1  ;;  %1483 = vmatpush1.bf16.msra.mxu1 %v1500_v1  ;;  %v1503_v4 = vld [vmem:[%s2002_s1 + $0x18] sm:$0xff]   ;;  %v1504_v5 = vld [vmem:[%s2002_s1 + $0x20] sm:$0xff]   ;;  %v1505_v7 = vld [vmem:[%s2002_s1 + $0x28] sm:$0xff]  }
   0x3   :  { %565 = vmatprep.subr.bf16.mxu0 %v1590_v0  ;;  %1468 = vmatprep.subr.bf16.mxu1 %v1590_v0  ;;  %v1518_v6 = vld [vmem:[%s2003_s0 + $0x4] ss:$12 sps:$4 sm:$0xff]   ;;  %v1521_v8 = vld [vmem:[%s2003_s0 + $0x154] ss:$12 sps:$4 sm:$0xff]   ;;  %v1507_v10 = vld [vmem:[%s2002_s1 + $0x38] sm:$0xff]  }
   0x4   :  { %595 = vmatprep.mubr.bf16.mxu0 %v1518_v6  ;;  %707 = vmatprep.mubr.bf16.mxu1 %v1521_v8  ;;  %v1506_v9 = vld [vmem:[%s2002_s1 + $0x30] sm:$0xff]   ;;  %v1508_v11 = vld [vmem:[%s2002_s1 + $0x40] sm:$0xff]   ;;  %v1509_v12 = vld [vmem:[%s2002_s1 + $0x48] sm:$0xff]  }
   0x5   :  { %v1510_v13 = vld [vmem:[%s2002_s1 + $0x50] sm:$0xff]   ;;  %v1511_v14 = vld [vmem:[%s2002_s1 + $0x58] sm:$0xff]   ;;  %v1512_v15 = vld [vmem:[%s2002_s1 + $0x60] sm:$0xff]  }
   0x6   :  { %566 = vmatpush1.bf16.msra.mxu0 %v1501_v2  ;;  %1484 = vmatpush1.bf16.msra.mxu1 %v1501_v2  ;;  %v1513_v16 = vld [vmem:[%s2002_s1 + $0x68] sm:$0xff]   ;;  %v1514_v17 = vld [vmem:[%s2002_s1 + $0x70] sm:$0xff]   ;;  %v1515_v18 = vld [vmem:[%s2002_s1 + $0x78] sm:$0xff]  }
   0x7   :  { %567 = vmatprep.subr.bf16.mxu0 %v1590_v0  ;;  %1469 = vmatprep.subr.bf16.mxu1 %v1590_v0  ;;  %v1528_v19 = vld [vmem:[%s2002_s1 + $0x80] sm:$0xff]   ;;  %v1519_v21 = vld [vmem:[%s2003_s0 + $0x150] ss:$12 sps:$4 sm:$0xff]   ;;  %v1524_v23 = vld [vmem:[%s2003_s0 + $0x16c] ss:$12 sps:$4 sm:$0xff]  }
   0x8   :  { %v1516_v20 = vld [vmem:[%s2003_s0] ss:$12 sps:$4 sm:$0xff]   ;;  %v1522_v22 = vld [vmem:[%s2003_s0 + $0x1c] ss:$12 sps:$4 sm:$0xff]   ;;  %v1526_v25 = vld [vmem:[%s2003_s0 + $0x18] ss:$12 sps:$4 sm:$0xff]  }
   0x9   :  { %v1541_v24 = vld [vmem:[%s2002_s1 + $0x88] sm:$0xff]   ;;  %v1529_v27 = vld [vmem:[%s2003_s0 + $0x34] ss:$12 sps:$4 sm:$0xff]   ;;  %v1531_v28 = vld [vmem:[%s2003_s0 + $0x184] ss:$12 sps:$4 sm:$0xff]  }
   0xa   :  { %568 = vmatpush1.bf16.msra.mxu0 %v1502_v3  ;;  %1485 = vmatpush1.bf16.msra.mxu1 %v1502_v3  ;;  %v1527_v26 = vld [vmem:[%s2003_s0 + $0x168] ss:$12 sps:$4 sm:$0xff]   ;;  %v1533_v29 = vld [vmem:[%s2003_s0 + $0x30] ss:$12 sps:$4 sm:$0xff]   ;;  %v1534_v30 = vld [vmem:[%s2003_s0 + $0x180] ss:$12 sps:$4 sm:$0xff]  }
   0xb   :  { %569 = vmatprep.subr.bf16.mxu0 %v1590_v0  ;;  %1470 = vmatprep.subr.bf16.mxu1 %v1590_v0  ;;  %v1535_v31 = vld [vmem:[%s2003_s0 + $0x4c] ss:$12 sps:$4 sm:$0xff]   ;;  %v1537_v32 = vld [vmem:[%s2003_s0 + $0x19c] ss:$12 sps:$4 sm:$0xff]   ;;  %v1542_v35 = vld [vmem:[%s2003_s0 + $0x64] ss:$12 sps:$4 sm:$0xff]  }
   0xc   :  { %v1539_v33 = vld [vmem:[%s2003_s0 + $0x48] ss:$12 sps:$4 sm:$0xff]   ;;  %v1540_v34 = vld [vmem:[%s2003_s0 + $0x198] ss:$12 sps:$4 sm:$0xff]   ;;  %v1545_v37 = vld [vmem:[%s2003_s0 + $0x60] ss:$12 sps:$4 sm:$0xff]  }
   0xd   :  { %v1544_v36 = vld [vmem:[%s2003_s0 + $0x8] ss:$12 sps:$4 sm:$0xff]   ;;  %v1546_v38 = vld [vmem:[%s2003_s0 + $0x20] ss:$12 sps:$4 sm:$0xff]   ;;  %v1549_v40 = vld [vmem:[%s2003_s0 + $0x38] ss:$12 sps:$4 sm:$0xff]  }
   0xe   :  { %570 = vmatpush1.bf16.msra.mxu0 %v1503_v4  ;;  %1486 = vmatpush1.bf16.msra.mxu1 %v1503_v4  ;;  %v1547_v39 = vld [vmem:[%s2003_s0 + $0x7c] ss:$12 sps:$4 sm:$0xff]   ;;  %v1550_v41 = vld [vmem:[%s2003_s0 + $0x78] ss:$12 sps:$4 sm:$0xff]   ;;  %v1552_v43 = vld [vmem:[%s2003_s0 + $0x94] ss:$12 sps:$4 sm:$0xff]  }
   0xf   :  { %571 = vmatprep.subr.bf16.mxu0 %v1590_v0  ;;  %1471 = vmatprep.subr.bf16.mxu1 %v1590_v0  ;;  %v1551_v42 = vld [vmem:[%s2003_s0 + $0x50] ss:$12 sps:$4 sm:$0xff]   ;;  %v1554_v44 = vld [vmem:[%s2003_s0 + $0x68] ss:$12 sps:$4 sm:$0xff]   ;;  %v1556_v46 = vld [vmem:[%s2003_s0 + $0x80] ss:$12 sps:$4 sm:$0xff]  }
  0x10   :  { %v1555_v45 = vld [vmem:[%s2003_s0 + $0x90] ss:$12 sps:$4 sm:$0xff]   ;;  %v1557_v47 = vld [vmem:[%s2003_s0 + $0xac] ss:$12 sps:$4 sm:$0xff]   ;;  %v1560_v49 = vld [vmem:[%s2003_s0 + $0xa8] ss:$12 sps:$4 sm:$0xff]  }
  0x11   :  { %v1559_v48 = vld [vmem:[%s2003_s0 + $0x98] ss:$12 sps:$4 sm:$0xff]   ;;  %v1561_v50 = vld [vmem:[%s2003_s0 + $0xb0] ss:$12 sps:$4 sm:$0xff]   ;;  %v1564_v52 = vld [vmem:[%s2003_s0 + $0xc8] ss:$12 sps:$4 sm:$0xff]  }
  0x12   :  { %572 = vmatpush1.bf16.msra.mxu0 %v1504_v5  ;;  %1487 = vmatpush1.bf16.msra.mxu1 %v1504_v5  ;;  %v1562_v51 = vld [vmem:[%s2003_s0 + $0xc4] ss:$12 sps:$4 sm:$0xff]   ;;  %v1565_v53 = vld [vmem:[%s2003_s0 + $0xc0] ss:$12 sps:$4 sm:$0xff]   ;;  %v1567_v55 = vld [vmem:[%s2003_s0 + $0xdc] ss:$12 sps:$4 sm:$0xff]  }
  0x13   :  { %573 = vmatprep.subr.bf16.mxu0 %v1590_v0  ;;  %1472 = vmatprep.subr.bf16.mxu1 %v1590_v0  ;;  %v1566_v54 = vld [vmem:[%s2003_s0 + $0xe0] ss:$12 sps:$4 sm:$0xff]   ;;  %v1569_v56 = vld [vmem:[%s2003_s0 + $0xf8] ss:$12 sps:$4 sm:$0xff]   ;;  %v1571_v58 = vld [vmem:[%s2003_s0 + $0x110] ss:$12 sps:$4 sm:$0xff]  }
  0x14   :  { %v1570_v57 = vld [vmem:[%s2003_s0 + $0xd8] ss:$12 sps:$4 sm:$0xff]   ;;  %v1572_v59 = vld [vmem:[%s2003_s0 + $0xf4] ss:$12 sps:$4 sm:$0xff]   ;;  %v1575_v61 = vld [vmem:[%s2003_s0 + $0xf0] ss:$12 sps:$4 sm:$0xff]  }
  0x15   :  { %v1574_v60 = vld [vmem:[%s2003_s0 + $0x128] ss:$12 sps:$4 sm:$0xff]   ;;  %v1576_v62 = vld [vmem:[%s2003_s0 + $0x140] ss:$12 sps:$4 sm:$0xff]   ;;  %v1581_v2 = vld [vmem:[%s2003_s0 + $0x170] ss:$12 sps:$4 sm:$0xff]  }
  0x16   :  { %574 = vmatpush1.bf16.msra.mxu0 %v1505_v7  ;;  %1488 = vmatpush1.bf16.msra.mxu1 %v1505_v7  ;;  %v1577_v63 = vld [vmem:[%s2003_s0 + $0x10c] ss:$12 sps:$4 sm:$0xff]   ;;  %v1580_v1 = vld [vmem:[%s2003_s0 + $0x108] ss:$12 sps:$4 sm:$0xff]   ;;  %v1582_v3 = vld [vmem:[%s2003_s0 + $0x124] ss:$12 sps:$4 sm:$0xff]  }
  0x17   :  { %575 = vmatprep.subr.bf16.mxu0 %v1590_v0  ;;  %1473 = vmatprep.subr.bf16.mxu1 %v1590_v0  ;;  %v1584_v4 = vld [vmem:[%s2003_s0 + $0x188] ss:$12 sps:$4 sm:$0xff]   ;;  %v1585_v5 = vld [vmem:[%s2003_s0 + $0x120] ss:$12 sps:$4 sm:$0xff]   ;;  %v1589_v8 = vld [vmem:[%s2003_s0 + $0x138] ss:$12 sps:$4 sm:$0xff]  }
  0x18   :  { %v1586_v6 = vld [vmem:[%s2003_s0 + $0x1a0] ss:$12 sps:$4 sm:$0xff]   ;;  %v1587_v7 = vld [vmem:[%s2003_s0 + $0x13c] ss:$12 sps:$4 sm:$0xff]  }
  0x1a   :  { %576 = vmatpush1.bf16.msra.mxu0 %v1506_v9  ;;  %1489 = vmatpush1.bf16.msra.mxu1 %v1506_v9 }
  0x1b   :  { %577 = vmatprep.subr.bf16.mxu0 %v1590_v0  ;;  %1474 = vmatprep.subr.bf16.mxu1 %v1590_v0 }
  0x1e   :  { %578 = vmatpush1.bf16.msra.mxu0 %v1507_v10  ;;  %1490 = vmatpush1.bf16.msra.mxu1 %v1507_v10 }
  0x1f   :  { %579 = vmatprep.subr.bf16.mxu0 %v1590_v0  ;;  %1475 = vmatprep.subr.bf16.mxu1 %v1590_v0 }
  0x22   :  { %580 = vmatpush1.bf16.msra.mxu0 %v1508_v11  ;;  %1491 = vmatpush1.bf16.msra.mxu1 %v1508_v11 }
  0x23   :  { %581 = vmatprep.subr.bf16.mxu0 %v1590_v0  ;;  %1476 = vmatprep.subr.bf16.mxu1 %v1590_v0 }
  0x26   :  { %582 = vmatpush1.bf16.msra.mxu0 %v1509_v12  ;;  %1492 = vmatpush1.bf16.msra.mxu1 %v1509_v12 }
  0x27   :  { %583 = vmatprep.subr.bf16.mxu0 %v1590_v0  ;;  %1477 = vmatprep.subr.bf16.mxu1 %v1590_v0 }
  0x2a   :  { %584 = vmatpush1.bf16.msra.mxu0 %v1510_v13  ;;  %1493 = vmatpush1.bf16.msra.mxu1 %v1510_v13 }
  0x2b   :  { %585 = vmatprep.subr.bf16.mxu0 %v1590_v0  ;;  %1478 = vmatprep.subr.bf16.mxu1 %v1590_v0 }
  0x2e   :  { %586 = vmatpush1.bf16.msra.mxu0 %v1511_v14  ;;  %1494 = vmatpush1.bf16.msra.mxu1 %v1511_v14 }
  0x2f   :  { %587 = vmatprep.subr.bf16.mxu0 %v1590_v0  ;;  %1479 = vmatprep.subr.bf16.mxu1 %v1590_v0 }
  0x32   :  { %588 = vmatpush1.bf16.msra.mxu0 %v1512_v15  ;;  %1495 = vmatpush1.bf16.msra.mxu1 %v1512_v15 }
  0x33   :  { %589 = vmatprep.subr.bf16.mxu0 %v1590_v0  ;;  %1480 = vmatprep.subr.bf16.mxu1 %v1590_v0 }
  0x36   :  { %590 = vmatpush1.bf16.msra.mxu0 %v1513_v16  ;;  %1496 = vmatpush1.bf16.msra.mxu1 %v1513_v16 }
  0x37   :  { %591 = vmatprep.subr.bf16.mxu0 %v1590_v0  ;;  %1481 = vmatprep.subr.bf16.mxu1 %v1590_v0 }
  0x3a   :  { %592 = vmatpush1.bf16.msra.mxu0 %v1514_v17  ;;  %1497 = vmatpush1.bf16.msra.mxu1 %v1514_v17 }
  0x3b   :  { %593 = vmatprep.subr.bf16.mxu0 %v1590_v0  ;;  %1482 = vmatprep.subr.bf16.mxu1 %v1590_v0  ;;  %v1579_v0 = vld [vmem:[%s2003_s0 + $0x158] ss:$12 sps:$4 sm:$0xff]  }
  0x3e   :  { %594 = vmatpush1.bf16.msra.mxu0 %v1515_v18  ;;  %1498 = vmatpush1.bf16.msra.mxu1 %v1515_v18 }
  0x3f   :  { %1427 = vmatprep.subr.bf16.mxu1 %v1528_v19 }
  0x41   :  { %596 = vmatmul.mubr.bf16.vlgmr.msra.gmra.mrb[0].mxu0 %v1516_v20  ;;  %708 = vmatmul.mubr.bf16.vlgmr.msra.gmra.mrb[0].mxu1 %v1519_v21 }
  0x42   :  { %603 = vmatprep.mubr.bf16.mxu0 %v1522_v22  ;;  %715 = vmatprep.mubr.bf16.mxu1 %v1524_v23 }
  0x43   :  { %1428 = vmatpush3.bf16.msra.mxu1 %v1528_v19 }
  0x44   :  { %1429 = vmatprep.subr.bf16.mxu1 %v1541_v24 }
  0x47   :  { %1430 = vmatpush3.bf16.msra.mxu1 %v1541_v24 }
  0x49   :  { %604 = vmatmul.mubr.bf16.gmra.mrb[4].mxu0 %v1526_v25  ;;  %716 = vmatmul.mubr.bf16.gmra.mrb[4].mxu1 %v1527_v26 }
  0x4a   :  { %611 = vmatprep.mubr.bf16.mxu0 %v1529_v27  ;;  %723 = vmatprep.mubr.bf16.mxu1 %v1531_v28 }
  0x51   :  { %612 = vmatmul.mubr.bf16.gmra.mrb[8].mxu0 %v1533_v29  ;;  %724 = vmatmul.mubr.bf16.gmra.mrb[8].mxu1 %v1534_v30 }
  0x52   :  { %619 = vmatprep.mubr.bf16.mxu0 %v1535_v31  ;;  %731 = vmatprep.mubr.bf16.mxu1 %v1537_v32 }
  0x59   :  { %620 = vmatmul.mubr.bf16.gmra.mrb[12].mxu0 %v1539_v33  ;;  %732 = vmatmul.mubr.bf16.gmra.mrb[12].mxu1 %v1540_v34 }
  0x5a   :  { %627 = vmatprep.mubr.bf16.mxu0 %v1542_v35  ;;  %1431 = vmatprep.mubr.msk.bf16.mxu1 %vm508_vm0, %v1544_v36 }
  0x61   :  { %628 = vmatmul.mubr.bf16.gmra.mrb[16].mxu0 %v1545_v37  ;;  %1432 = vmatmul.mubr.msk.bf16.vlgmr.msra.gmra.mrb[16].mxu1 %vm508_vm0, %v1546_v38 }
  0x62   :  { %635 = vmatprep.mubr.bf16.mxu0 %v1547_v39  ;;  %1435 = vmatprep.mubr.msk.bf16.mxu1 %vm508_vm0, %v1549_v40 }
  0x69   :  { %636 = vmatmul.mubr.bf16.gmra.mrb[20].mxu0 %v1550_v41  ;;  %1436 = vmatmul.mubr.msk.bf16.gmra.mrb[20].mxu1 %vm508_vm0, %v1551_v42  ;;  %v1896_v41 = vld [vmem:[%s2004_s2] ss:$0 sm:$0xff] }
  0x6a   :  { %643 = vmatprep.mubr.bf16.mxu0 %v1552_v43  ;;  %1439 = vmatprep.mubr.msk.bf16.mxu1 %vm508_vm0, %v1554_v44 }
  0x71   :  { %644 = vmatmul.mubr.bf16.gmra.mrb[24].mxu0 %v1555_v45  ;;  %1440 = vmatmul.mubr.msk.bf16.gmra.mrb[24].mxu1 %vm508_vm0, %v1556_v46 }
  0x72   :  { %651 = vmatprep.mubr.bf16.mxu0 %v1557_v47  ;;  %1443 = vmatprep.mubr.msk.bf16.mxu1 %vm508_vm0, %v1559_v48 }
  0x79   :  { %652 = vmatmul.mubr.bf16.gmra.mrb[28].mxu0 %v1560_v49  ;;  %1444 = vmatmul.mubr.msk.bf16.gmra.mrb[28].mxu1 %vm508_vm0, %v1561_v50 }
  0x7a   :  { %659 = vmatprep.mubr.bf16.mxu0 %v1562_v51  ;;  %1447 = vmatprep.mubr.msk.bf16.mxu1 %vm508_vm0, %v1564_v52 }
  0x81   :  { %660 = vmatmul.mubr.bf16.gmra.mrb[32].mxu0 %v1565_v53  ;;  %1448 = vmatmul.mubr.msk.bf16.gmra.mrb[32].mxu1 %vm508_vm0, %v1566_v54 }
  0x82   :  { %667 = vmatprep.mubr.bf16.mxu0 %v1567_v55  ;;  %1451 = vmatprep.mubr.msk.bf16.mxu1 %vm508_vm0, %v1569_v56 }
  0x89   :  { %668 = vmatmul.mubr.bf16.gmra.mrb[36].mxu0 %v1570_v57  ;;  %1452 = vmatmul.mubr.msk.bf16.gmra.mrb[36].mxu1 %vm508_vm0, %v1571_v58 }
  0x8a   :  { %675 = vmatprep.mubr.bf16.mxu0 %v1572_v59  ;;  %1455 = vmatprep.mubr.msk.bf16.mxu1 %vm508_vm0, %v1574_v60 }
  0x91   :  { %676 = vmatmul.mubr.bf16.gmra.mrb[40].mxu0 %v1575_v61  ;;  %1456 = vmatmul.mubr.msk.bf16.gmra.mrb[40].mxu1 %vm508_vm0, %v1576_v62 }
  0x92   :  { %683 = vmatprep.mubr.bf16.mxu0 %v1577_v63  ;;  %1459 = vmatprep.mubr.msk.bf16.mxu1 %vm508_vm0, %v1579_v0 }
  0x99   :  { %684 = vmatmul.mubr.bf16.gmra.mrb[44].mxu0 %v1580_v1  ;;  %1460 = vmatmul.mubr.msk.bf16.gmra.mrb[44].mxu1 %vm508_vm0, %v1581_v2 }
  0x9a   :  { %691 = vmatprep.mubr.bf16.mxu0 %v1582_v3  ;;  %1463 = vmatprep.mubr.msk.bf16.mxu1 %vm508_vm0, %v1584_v4 }
  0xa1   :  { %692 = vmatmul.mubr.bf16.gmra.mrb[48].mxu0 %v1585_v5  ;;  %1464 = vmatmul.mubr.msk.bf16.gmra.mrb[48].mxu1 %vm508_vm0, %v1586_v6 }
  0xa2   :  { %699 = vmatprep.mubr.bf16.mxu0 %v1587_v7 }
  0xa9   :  { %700 = vmatmul.mubr.bf16.gmra.mrb[52].mxu0 %v1589_v8 }
 0x114   :  { %v597_v9 = vpop.f32.mrb[0].mxu0  ;;  %v1877_v10 = vpop.f32.mrb[0].mxu1 }
 0x115   :  { %v599_v11 = vpop.f32.mrb[1].mxu0  ;;  %v711_v12 = vpop.f32.mrb[1].mxu1  ;;  %v598_v43 = vadd.f32 %v1896_v41, %v597_v9 }
 0x116   :  { %v600_v13 = vpop.f32.mrb[2].mxu0  ;;  %v1879_v14 = vpop.f32.mrb[2].mxu1 }
 0x117   :  { %v602_v15 = vpop.f32.mrb[3].mxu0  ;;  %v714_v16 = vpop.f32.mrb[3].mxu1  ;;  %v601_v50 = vadd.f32 %v1896_v41, %v600_v13 }
 0x11c   :  { %v605_v17 = vpop.f32.mrb[4].mxu0  ;;  %v1881_v18 = vpop.f32.mrb[4].mxu1 }
 0x11d   :  { %v607_v19 = vpop.f32.mrb[5].mxu0  ;;  %v719_v20 = vpop.f32.mrb[5].mxu1  ;;  %v606_v42 = vadd.f32 %v1896_v41, %v605_v17 }
 0x11e   :  { %v608_v21 = vpop.f32.mrb[6].mxu0  ;;  %v1883_v22 = vpop.f32.mrb[6].mxu1 }
 0x11f   :  { %v610_v23 = vpop.f32.mrb[7].mxu0  ;;  %v722_v24 = vpop.f32.mrb[7].mxu1  ;;  %v609_v46 = vadd.f32 %v1896_v41, %v608_v21 }
 0x124   :  { %v613_v25 = vpop.f32.mrb[8].mxu0  ;;  %v1885_v26 = vpop.f32.mrb[8].mxu1 }
 0x125   :  { %v615_v27 = vpop.f32.mrb[9].mxu0  ;;  %v727_v28 = vpop.f32.mrb[9].mxu1  ;;  %v614_v0 = vadd.f32 %v1896_v41, %v613_v25 }
 0x126   :  { %v616_v29 = vpop.f32.mrb[10].mxu0  ;;  %v1887_v30 = vpop.f32.mrb[10].mxu1 }
 0x127   :  { %v618_v31 = vpop.f32.mrb[11].mxu0  ;;  %v730_v32 = vpop.f32.mrb[11].mxu1  ;;  %v617_v8 = vadd.f32 %v1896_v41, %v616_v29 }
 0x12c   :  { %v621_v33 = vpop.f32.mrb[12].mxu0  ;;  %v1889_v34 = vpop.f32.mrb[12].mxu1 }
 0x12d   :  { %v623_v35 = vpop.f32.mrb[13].mxu0  ;;  %v735_v36 = vpop.f32.mrb[13].mxu1  ;;  %v622_v62 = vadd.f32 %v1896_v41, %v621_v33 }
 0x12e   :  { %v624_v37 = vpop.f32.mrb[14].mxu0  ;;  %v1891_v38 = vpop.f32.mrb[14].mxu1 }
 0x12f   :  { %v626_v39 = vpop.f32.mrb[15].mxu0  ;;  %v738_v40 = vpop.f32.mrb[15].mxu1  ;;  %v625_v4 = vadd.f32 %v1896_v41, %v624_v37 }
 0x134   :  { %v629_v44 = vpop.f32.mrb[16].mxu0  ;;  %v1433_v45 = vpop.f32.mrb[16].mxu1 }
 0x135   :  { %v783_v47 = vadd.f32 %v1433_v45, %v606_v42  ;;  %v631_v48 = vpop.f32.mrb[17].mxu0  ;;  %v774_v49 = vpop.f32.mrb[17].mxu1  ;;  %v630_v27 = vadd.f32 %v1896_v41, %v629_v44 }
 0x136   :  { %v775_v51 = vadd.f32 %v774_v49, %v598_v43  ;;  %v632_v52 = vpop.f32.mrb[18].mxu0  ;;  %v1434_v53 = vpop.f32.mrb[18].mxu1 }
 0x137   :  { %v786_v54 = vadd.f32 %v1434_v53, %v609_v46  ;;  %v634_v55 = vpop.f32.mrb[19].mxu0  ;;  %v777_v56 = vpop.f32.mrb[19].mxu1  ;;  %v919_v58 = vmax.f32 %v783_v47, 0.0  ;;  %v633_v37 = vadd.f32 %v1896_v41, %v632_v52 }
 0x138   :  { %v778_v57 = vadd.f32 %v777_v56, %v601_v50  ;;  %v917_v60 = vmax.f32 %v775_v51, 0.0 }
 0x139   :  { %v920_v59 = vmax.f32 %v786_v54, 0.0 }
 0x13a   :  { %v918_v61 = vmax.f32 %v778_v57, 0.0 }
 0x13b   :  { %v1308_v63 = vpack.c.bf16 %v920_v59, %v919_v58 }
 0x13c   :  { %v1303_v1 = vpack.c.bf16 %v918_v61, %v917_v60  ;;  %v637_v2 = vpop.f32.mrb[20].mxu0  ;;  %v1437_v3 = vpop.f32.mrb[20].mxu1 }
 0x13d   :  { %1390 = vst [vmem:[%s2005_s3 + $0x8] sm:$0xff] %v1308_v63   ;;  %v799_v5 = vadd.f32 %v1437_v3, %v622_v62  ;;  %v639_v6 = vpop.f32.mrb[21].mxu0  ;;  %v790_v7 = vpop.f32.mrb[21].mxu1  ;;  %v638_v24 = vadd.f32 %v1896_v41, %v637_v2 }
 0x13e   :  { %1304 = vst [vmem:[%s2005_s3] sm:$0xff] %v1303_v1   ;;  %v791_v9 = vadd.f32 %v790_v7, %v614_v0  ;;  %v640_v11 = vpop.f32.mrb[22].mxu0  ;;  %v1438_v12 = vpop.f32.mrb[22].mxu1 }
 0x13f   :  { %v802_v13 = vadd.f32 %v1438_v12, %v625_v4  ;;  %v642_v15 = vpop.f32.mrb[23].mxu0  ;;  %v793_v16 = vpop.f32.mrb[23].mxu1  ;;  %v923_v19 = vmax.f32 %v799_v5, 0.0  ;;  %v641_v32 = vadd.f32 %v1896_v41, %v640_v11 }
 0x140   :  { %v794_v17 = vadd.f32 %v793_v16, %v617_v8  ;;  %v921_v21 = vmax.f32 %v791_v9, 0.0 }
 0x141   :  { %v924_v20 = vmax.f32 %v802_v13, 0.0 }
 0x142   :  { %v922_v23 = vmax.f32 %v794_v17, 0.0 }
 0x143   :  { %v1318_v25 = vpack.c.bf16 %v924_v20, %v923_v19 }
 0x144   :  { %v1313_v28 = vpack.c.bf16 %v922_v23, %v921_v21  ;;  %v645_v29 = vpop.f32.mrb[24].mxu0  ;;  %v1441_v31 = vpop.f32.mrb[24].mxu1 }
 0x145   :  { %1392 = vst [vmem:[%s2005_s3 + $0x18] sm:$0xff] %v1318_v25   ;;  %v815_v33 = vadd.f32 %v1441_v31, %v638_v24  ;;  %v647_v35 = vpop.f32.mrb[25].mxu0  ;;  %v806_v36 = vpop.f32.mrb[25].mxu1  ;;  %v646_v53 = vadd.f32 %v1896_v41, %v645_v29 }
 0x146   :  { %1391 = vst [vmem:[%s2005_s3 + $0x10] sm:$0xff] %v1313_v28   ;;  %v807_v39 = vadd.f32 %v806_v36, %v630_v27  ;;  %v648_v40 = vpop.f32.mrb[26].mxu0  ;;  %v1442_v42 = vpop.f32.mrb[26].mxu1 }
 0x147   :  { %v818_v43 = vadd.f32 %v1442_v42, %v641_v32  ;;  %v650_v44 = vpop.f32.mrb[27].mxu0  ;;  %v809_v45 = vpop.f32.mrb[27].mxu1  ;;  %v927_v47 = vmax.f32 %v815_v33, 0.0  ;;  %v649_v59 = vadd.f32 %v1896_v41, %v648_v40 }
 0x148   :  { %v810_v46 = vadd.f32 %v809_v45, %v633_v37  ;;  %v925_v49 = vmax.f32 %v807_v39, 0.0 }
 0x149   :  { %v928_v48 = vmax.f32 %v818_v43, 0.0 }
 0x14a   :  { %v926_v50 = vmax.f32 %v810_v46, 0.0 }
 0x14b   :  { %v1328_v51 = vpack.c.bf16 %v928_v48, %v927_v47 }
 0x14c   :  { %v1323_v54 = vpack.c.bf16 %v926_v50, %v925_v49  ;;  %v653_v52 = vpop.f32.mrb[28].mxu0  ;;  %v1445_v55 = vpop.f32.mrb[28].mxu1 }
 0x14d   :  { %1394 = vst [vmem:[%s2005_s3 + $0x28] sm:$0xff] %v1328_v51   ;;  %v654_v56 = vadd.f32 %v1896_v41, %v653_v52  ;;  %v655_v57 = vpop.f32.mrb[29].mxu0  ;;  %v822_v58 = vpop.f32.mrb[29].mxu1 }
 0x14e   :  { %1393 = vst [vmem:[%s2005_s3 + $0x20] sm:$0xff] %v1323_v54   ;;  %v823_v60 = vadd.f32 %v822_v58, %v646_v53  ;;  %v656_v61 = vpop.f32.mrb[30].mxu0  ;;  %v1446_v62 = vpop.f32.mrb[30].mxu1 }
 0x14f   :  { %v831_v63 = vadd.f32 %v1445_v55, %v654_v56  ;;  %v657_v0 = vadd.f32 %v1896_v41, %v656_v61  ;;  %v658_v1 = vpop.f32.mrb[31].mxu0  ;;  %v825_v2 = vpop.f32.mrb[31].mxu1 }
 0x150   :  { %v826_v3 = vadd.f32 %v825_v2, %v649_v59  ;;  %v929_v5 = vmax.f32 %v823_v60, 0.0  ;;  %v710_v1 = vadd.f32 %v1896_v41, %v1877_v10 }
 0x151   :  { %v834_v4 = vadd.f32 %v1446_v62, %v657_v0  ;;  %v931_v7 = vmax.f32 %v831_v63, 0.0  ;;  %v718_v62 = vadd.f32 %v1896_v41, %v1881_v18 }
 0x152   :  { %v930_v6 = vmax.f32 %v826_v3, 0.0 }
 0x153   :  { %v932_v8 = vmax.f32 %v834_v4, 0.0  ;;  %v721_v4 = vadd.f32 %v1896_v41, %v1883_v22 }
 0x154   :  { %v1333_v9 = vpack.c.bf16 %v930_v6, %v929_v5  ;;  %v661_v11 = vpop.f32.mrb[32].mxu0  ;;  %v1449_v12 = vpop.f32.mrb[32].mxu1 }
 0x155   :  { %v1338_v13 = vpack.c.bf16 %v932_v8, %v931_v7  ;;  %v662_v15 = vadd.f32 %v1896_v41, %v661_v11  ;;  %v663_v16 = vpop.f32.mrb[33].mxu0  ;;  %v838_v17 = vpop.f32.mrb[33].mxu1  ;;  %v713_v11 = vadd.f32 %v1896_v41, %v1879_v14  ;;  %v734_v14 = vadd.f32 %v1896_v41, %v1889_v34 }
 0x156   :  { %1395 = vst [vmem:[%s2005_s3 + $0x30] sm:$0xff] %v1333_v9   ;;  %v664_v19 = vpop.f32.mrb[34].mxu0  ;;  %v1450_v20 = vpop.f32.mrb[34].mxu1 }
 0x157   :  { %1396 = vst [vmem:[%s2005_s3 + $0x38] sm:$0xff] %v1338_v13   ;;  %v665_v21 = vadd.f32 %v1896_v41, %v664_v19  ;;  %v839_v23 = vadd.f32 %v838_v17, %v662_v15  ;;  %v666_v24 = vpop.f32.mrb[35].mxu0  ;;  %v841_v25 = vpop.f32.mrb[35].mxu1 }
 0x159   :  { %v842_v27 = vadd.f32 %v841_v25, %v665_v21  ;;  %v933_v28 = vmax.f32 %v839_v23, 0.0 }
 0x15b   :  { %v934_v29 = vmax.f32 %v842_v27, 0.0 }
 0x15c   :  { %v669_v31 = vpop.f32.mrb[36].mxu0  ;;  %v1453_v32 = vpop.f32.mrb[36].mxu1 }
 0x15d   :  { %v1343_v33 = vpack.c.bf16 %v934_v29, %v933_v28  ;;  %v670_v35 = vadd.f32 %v1896_v41, %v669_v31  ;;  %v671_v36 = vpop.f32.mrb[37].mxu0  ;;  %v854_v37 = vpop.f32.mrb[37].mxu1  ;;  %v726_v31 = vadd.f32 %v1896_v41, %v1885_v26 }
 0x15e   :  { %v672_v39 = vpop.f32.mrb[38].mxu0  ;;  %v1454_v40 = vpop.f32.mrb[38].mxu1  ;;  %v737_v36 = vadd.f32 %v1896_v41, %v1891_v38 }
 0x15f   :  { %1397 = vst [vmem:[%s2005_s3 + $0x40] sm:$0xff] %v1343_v33   ;;  %v847_v42 = vadd.f32 %v1449_v12, %v670_v35  ;;  %v673_v43 = vadd.f32 %v1896_v41, %v672_v39  ;;  %v674_v44 = vpop.f32.mrb[39].mxu0  ;;  %v857_v45 = vpop.f32.mrb[39].mxu1 }
 0x161   :  { %v850_v46 = vadd.f32 %v1450_v20, %v673_v43  ;;  %v935_v47 = vmax.f32 %v847_v42, 0.0  ;;  %v729_v43 = vadd.f32 %v1896_v41, %v1887_v30 }
 0x163   :  { %v936_v48 = vmax.f32 %v850_v46, 0.0 }
 0x164   :  { %v677_v49 = vpop.f32.mrb[40].mxu0  ;;  %v1945_v50 = vpop.f32.mrb[40].mxu1 }
 0x165   :  { %v1348_v51 = vpack.c.bf16 %v936_v48, %v935_v47  ;;  %v678_v53 = vadd.f32 %v1896_v41, %v677_v49  ;;  %v679_v54 = vpop.f32.mrb[41].mxu0  ;;  %v870_v52 = vpop.f32.mrb[41].mxu1 }
 0x166   :  { %v680_v55 = vpop.f32.mrb[42].mxu0  ;;  %v1948_v56 = vpop.f32.mrb[42].mxu1 }
 0x167   :  { %1398 = vst [vmem:[%s2005_s3 + $0x48] sm:$0xff] %v1348_v51   ;;  %v855_v57 = vadd.f32 %v854_v37, %v678_v53  ;;  %v681_v58 = vadd.f32 %v1896_v41, %v680_v55  ;;  %v682_v59 = vpop.f32.mrb[43].mxu0  ;;  %v873_v60 = vpop.f32.mrb[43].mxu1 }
 0x169   :  { %v858_v61 = vadd.f32 %v857_v45, %v681_v58  ;;  %v937_v63 = vmax.f32 %v855_v57, 0.0 }
 0x16b   :  { %v938_v0 = vmax.f32 %v858_v61, 0.0 }
 0x16c   :  { %v685_v2 = vpop.f32.mrb[44].mxu0  ;;  %v1461_v3 = vpop.f32.mrb[44].mxu1 }
 0x16d   :  { %v1353_v5 = vpack.c.bf16 %v938_v0, %v937_v63  ;;  %v686_v6 = vadd.f32 %v1896_v41, %v685_v2  ;;  %v895_v7 = vadd.f32 %v1461_v3, %v718_v62  ;;  %v687_v8 = vpop.f32.mrb[45].mxu0  ;;  %v886_v9 = vpop.f32.mrb[45].mxu1 }
 0x16e   :  { %v887_v18 = vadd.f32 %v886_v9, %v710_v1  ;;  %v688_v12 = vpop.f32.mrb[46].mxu0  ;;  %v1462_v13 = vpop.f32.mrb[46].mxu1 }
 0x16f   :  { %1399 = vst [vmem:[%s2005_s3 + $0x50] sm:$0xff] %v1353_v5   ;;  %v863_v10 = vadd.f32 %v1453_v32, %v686_v6  ;;  %v689_v15 = vadd.f32 %v1896_v41, %v688_v12  ;;  %v898_v22 = vadd.f32 %v1462_v13, %v721_v4  ;;  %v690_v16 = vpop.f32.mrb[47].mxu0  ;;  %v889_v17 = vpop.f32.mrb[47].mxu1  ;;  %v947_v20 = vmax.f32 %v895_v7, 0.0 }
 0x170   :  { %v890_v19 = vadd.f32 %v889_v17, %v713_v11  ;;  %v945_v24 = vmax.f32 %v887_v18, 0.0 }
 0x171   :  { %v866_v21 = vadd.f32 %v1454_v40, %v689_v15  ;;  %v948_v23 = vmax.f32 %v898_v22, 0.0  ;;  %v939_v27 = vmax.f32 %v863_v10, 0.0 }
 0x172   :  { %v946_v25 = vmax.f32 %v890_v19, 0.0 }
 0x173   :  { %v940_v28 = vmax.f32 %v866_v21, 0.0  ;;  %v1378_v29 = vpack.c.bf16 %v948_v23, %v947_v20 }
 0x174   :  { %v1373_v32 = vpack.c.bf16 %v946_v25, %v945_v24  ;;  %v693_v33 = vpop.f32.mrb[48].mxu0  ;;  %v1465_v35 = vpop.f32.mrb[48].mxu1 }
 0x175   :  { %v1358_v37 = vpack.c.bf16 %v940_v28, %v939_v27  ;;  %1404 = vst [vmem:[%s2005_s3 + $0x78] sm:$0xff] %v1378_v29   ;;  %v694_v39 = vadd.f32 %v1896_v41, %v693_v33  ;;  %v911_v34 = vadd.f32 %v1465_v35, %v734_v14  ;;  %v695_v40 = vpop.f32.mrb[49].mxu0  ;;  %v902_v42 = vpop.f32.mrb[49].mxu1 }
 0x176   :  { %1403 = vst [vmem:[%s2005_s3 + $0x70] sm:$0xff] %v1373_v32   ;;  %v903_v26 = vadd.f32 %v902_v42, %v726_v31  ;;  %v696_v44 = vpop.f32.mrb[50].mxu0  ;;  %v1466_v38 = vpop.f32.mrb[50].mxu1 }
 0x177   :  { %1400 = vst [vmem:[%s2005_s3 + $0x58] sm:$0xff] %v1358_v37   ;;  %v871_v45 = vadd.f32 %v870_v52, %v694_v39  ;;  %v697_v46 = vadd.f32 %v1896_v41, %v696_v44  ;;  %v914_v47 = vadd.f32 %v1466_v38, %v737_v36  ;;  %v698_v48 = vpop.f32.mrb[51].mxu0  ;;  %v905_v49 = vpop.f32.mrb[51].mxu1  ;;  %v951_v53 = vmax.f32 %v911_v34, 0.0 }
 0x178   :  { %v906_v51 = vadd.f32 %v905_v49, %v729_v43  ;;  %v949_v55 = vmax.f32 %v903_v26, 0.0 }
 0x179   :  { %v874_v30 = vadd.f32 %v873_v60, %v697_v46  ;;  %v952_v54 = vmax.f32 %v914_v47, 0.0  ;;  %v941_v58 = vmax.f32 %v871_v45, 0.0 }
 0x17a   :  { %v950_v57 = vmax.f32 %v906_v51, 0.0 }
 0x17b   :  { %v942_v59 = vmax.f32 %v874_v30, 0.0  ;;  %v1388_v61 = vpack.c.bf16 %v952_v54, %v951_v53 }
 0x17c   :  { %v1383_v62 = vpack.c.bf16 %v950_v57, %v949_v55  ;;  %v701_v63 = vpop.f32.mrb[52].mxu0 }
 0x17d   :  { %v1363_v0 = vpack.c.bf16 %v942_v59, %v941_v58  ;;  %1406 = vst [vmem:[%s2005_s3 + $0x88] sm:$0xff] %v1388_v61   ;;  %v702_v52 = vadd.f32 %v1896_v41, %v701_v63  ;;  %v703_v1 = vpop.f32.mrb[53].mxu0 }
 0x17e   :  { %1405 = vst [vmem:[%s2005_s3 + $0x80] sm:$0xff] %v1383_v62   ;;  %v704_v60 = vpop.f32.mrb[54].mxu0 }
 0x17f   :  { %1401 = vst [vmem:[%s2005_s3 + $0x60] sm:$0xff] %v1363_v0   ;;  %v879_v2 = vadd.f32 %v1945_v50, %v702_v52  ;;  %v705_v3 = vadd.f32 %v1896_v41, %v704_v60  ;;  %v706_v4 = vpop.f32.mrb[55].mxu0 }
 0x181   :  { %v882_v5 = vadd.f32 %v1948_v56, %v705_v3  ;;  %v943_v6 = vmax.f32 %v879_v2, 0.0 }
 0x183   :  { %v944_v7 = vmax.f32 %v882_v5, 0.0 }
 0x185   :  { %v1368_v8 = vpack.c.bf16 %v944_v7, %v943_v6 }
 0x187   :  { %1402 = vst [vmem:[%s2005_s3 + $0x68] sm:$0xff] %v1368_v8  }

// kernel: _lambda_.11
= control target key start
LH: loop header
LB: loop body
LE: loop exit
PB: predicated region body
PF: predicated region fallthrough
CT: control target
= control target key end

     0   :  { %s1632_s1 = inlined_call_operand.vmem [shape: bf16[1152,128], index: 1, kind: input, shape index: {}]   ;;  %s1633_s0 = inlined_call_operand.vmem [shape: bf16[32,1152], index: 0, kind: input, shape index: {}]   ;;  %s1634_s2 = inlined_call_operand.vmem [shape: f32[1,128], index: 2, kind: input, shape index: {}]   ;;  %s1635_s3 = inlined_call_operand.vmem [shape: bf16[32,128], index: 3, kind: output, shape index: {}]  }
   0x1   :  { %v1235_v0 = vld [vmem:[%s1632_s1 + $0x40] sm:$0xff]   ;;  %v1239_v4 = vld [vmem:[%s1632_s1 + $0x48] sm:$0xff]   ;;  %v1243_v8 = vld [vmem:[%s1632_s1 + $0x50] sm:$0xff]  }
   0x2   :  { %v1236_v1 = vld [vmem:[%s1632_s1] sm:$0xff]   ;;  %1093 = vmatprep.subr.bf16.mxu0 %v1235_v0  ;;  %v1240_v5 = vld [vmem:[%s1632_s1 + $0x8] sm:$0xff]   ;;  %v1244_v9 = vld [vmem:[%s1632_s1 + $0x10] sm:$0xff]  }
   0x3   :  { %v1237_v2 = vld [vmem:[%s1632_s1 + $0xc0] sm:$0xff]   ;;  %1094 = vmatpush3.bf16.msra.mxu0 %v1236_v1  ;;  %v1241_v6 = vld [vmem:[%s1632_s1 + $0xc8] sm:$0xff]   ;;  %v1245_v10 = vld [vmem:[%s1632_s1 + $0xd0] sm:$0xff]  }
   0x4   :  { %v1238_v3 = vld [vmem:[%s1632_s1 + $0x80] sm:$0xff]   ;;  %1121 = vmatprep.subr.bf16.mxu1 %v1237_v2  ;;  %1095 = vmatprep.subr.bf16.mxu0 %v1239_v4  ;;  %v1242_v7 = vld [vmem:[%s1632_s1 + $0x88] sm:$0xff]   ;;  %v1246_v11 = vld [vmem:[%s1632_s1 + $0x90] sm:$0xff]  }
   0x5   :  { %1122 = vmatpush3.bf16.msra.mxu1 %v1238_v3  ;;  %v1247_v12 = vld [vmem:[%s1632_s1 + $0x58] sm:$0xff]   ;;  %v1251_v16 = vld [vmem:[%s1632_s1 + $0x60] sm:$0xff]   ;;  %v1255_v20 = vld [vmem:[%s1632_s1 + $0x68] sm:$0xff]  }
   0x6   :  { %1123 = vmatprep.subr.bf16.mxu1 %v1241_v6  ;;  %v1248_v13 = vld [vmem:[%s1632_s1 + $0x18] sm:$0xff]   ;;  %v1252_v17 = vld [vmem:[%s1632_s1 + $0x20] sm:$0xff]   ;;  %v1256_v21 = vld [vmem:[%s1632_s1 + $0x28] sm:$0xff]  }
   0x7   :  { %1096 = vmatpush3.bf16.msra.mxu0 %v1240_v5  ;;  %v1249_v14 = vld [vmem:[%s1632_s1 + $0xd8] sm:$0xff]   ;;  %v1253_v18 = vld [vmem:[%s1632_s1 + $0xe0] sm:$0xff]   ;;  %v1257_v22 = vld [vmem:[%s1632_s1 + $0xe8] sm:$0xff]  }
   0x8   :  { %1097 = vmatprep.subr.bf16.mxu0 %v1243_v8  ;;  %v1250_v15 = vld [vmem:[%s1632_s1 + $0x98] sm:$0xff]   ;;  %v1254_v19 = vld [vmem:[%s1632_s1 + $0xa0] sm:$0xff]   ;;  %v1258_v23 = vld [vmem:[%s1632_s1 + $0xa8] sm:$0xff]  }
   0x9   :  { %1124 = vmatpush3.bf16.msra.mxu1 %v1242_v7  ;;  %v1259_v24 = vld [vmem:[%s1632_s1 + $0x70] sm:$0xff]   ;;  %v1263_v28 = vld [vmem:[%s1632_s1 + $0x78] sm:$0xff]   ;;  %v1266_v31 = vld [vmem:[%s1633_s0] ss:$36 sps:$4 sm:$0xff]  }
   0xa   :  { %1125 = vmatprep.subr.bf16.mxu1 %v1245_v10  ;;  %v1260_v25 = vld [vmem:[%s1632_s1 + $0x30] sm:$0xff]   ;;  %v1264_v29 = vld [vmem:[%s1632_s1 + $0x38] sm:$0xff]   ;;  %v1268_v32 = vld [vmem:[%s1633_s0 + $0x4] ss:$36 sps:$4 sm:$0xff]  }
   0xb   :  { %1098 = vmatpush3.bf16.msra.mxu0 %v1244_v9  ;;  %v1261_v26 = vld [vmem:[%s1632_s1 + $0xf0] sm:$0xff]   ;;  %v1265_v30 = vld [vmem:[%s1632_s1 + $0xf8] sm:$0xff]   ;;  %742 = vmatprep.mubr.bf16.mxu0 %v1268_v32  ;;  %v1270_v34 = vld [vmem:[%s1632_s1 + $0x140] sm:$0xff]  }
   0xc   :  { %1099 = vmatprep.subr.bf16.mxu0 %v1247_v12  ;;  %v1262_v27 = vld [vmem:[%s1632_s1 + $0xb0] sm:$0xff]   ;;  %v1269_v33 = vld [vmem:[%s1632_s1 + $0xb8] sm:$0xff]   ;;  %v1271_v35 = vld [vmem:[%s1633_s0 + $0x8] ss:$36 sps:$4 sm:$0xff]  }
   0xd   :  { %1126 = vmatpush3.bf16.msra.mxu1 %v1246_v11  ;;  %v1273_v36 = vld [vmem:[%s1633_s0 + $0xc] ss:$36 sps:$4 sm:$0xff]   ;;  %v1274_v37 = vld [vmem:[%s1632_s1 + $0x100] sm:$0xff]   ;;  %v1285_v48 = vld [vmem:[%s1632_s1 + $0x158] sm:$0xff]  }
   0xe   :  { %1127 = vmatprep.subr.bf16.mxu1 %v1249_v14  ;;  %791 = vmatprep.mubr.bf16.mxu1 %v1273_v36  ;;  %v1275_v38 = vld [vmem:[%s1632_s1 + $0x1c0] sm:$0xff]   ;;  %v1277_v40 = vld [vmem:[%s1632_s1 + $0x148] sm:$0xff]   ;;  %v1281_v44 = vld [vmem:[%s1632_s1 + $0x150] sm:$0xff]  }
   0xf   :  { %1100 = vmatpush3.bf16.msra.mxu0 %v1248_v13  ;;  %v1276_v39 = vld [vmem:[%s1632_s1 + $0x180] sm:$0xff]   ;;  %v1278_v41 = vld [vmem:[%s1632_s1 + $0x108] sm:$0xff]   ;;  %v1282_v45 = vld [vmem:[%s1632_s1 + $0x110] sm:$0xff]  }
  0x10   :  { %1101 = vmatprep.subr.bf16.mxu0 %v1251_v16  ;;  %v1279_v42 = vld [vmem:[%s1632_s1 + $0x1c8] sm:$0xff]   ;;  %v1283_v46 = vld [vmem:[%s1632_s1 + $0x1d0] sm:$0xff]   ;;  %v1286_v49 = vld [vmem:[%s1632_s1 + $0x118] sm:$0xff]  }
  0x11   :  { %1128 = vmatpush3.bf16.msra.mxu1 %v1250_v15  ;;  %v1280_v43 = vld [vmem:[%s1632_s1 + $0x188] sm:$0xff]   ;;  %v1284_v47 = vld [vmem:[%s1632_s1 + $0x190] sm:$0xff]   ;;  %v1287_v50 = vld [vmem:[%s1632_s1 + $0x1d8] sm:$0xff]  }
  0x12   :  { %1129 = vmatprep.subr.bf16.mxu1 %v1253_v18  ;;  %v1288_v51 = vld [vmem:[%s1632_s1 + $0x198] sm:$0xff]   ;;  %v1289_v52 = vld [vmem:[%s1632_s1 + $0x160] sm:$0xff]   ;;  %v1293_v56 = vld [vmem:[%s1632_s1 + $0x168] sm:$0xff]  }
  0x13   :  { %1102 = vmatpush3.bf16.msra.mxu0 %v1252_v17  ;;  %v1290_v53 = vld [vmem:[%s1632_s1 + $0x120] sm:$0xff]   ;;  %v1294_v57 = vld [vmem:[%s1633_s0 + $0x4c] ss:$36 sps:$4 sm:$0xff]   ;;  %v1299_v61 = vld [vmem:[%s1633_s0 + $0x54] ss:$36 sps:$4 sm:$0xff]  }
  0x14   :  { %1103 = vmatprep.subr.bf16.mxu0 %v1255_v20  ;;  %v1291_v54 = vld [vmem:[%s1632_s1 + $0x1e0] sm:$0xff]   ;;  %v1296_v58 = vld [vmem:[%s1632_s1 + $0x128] sm:$0xff]   ;;  %v1302_v63 = vld [vmem:[%s1633_s0 + $0x50] ss:$36 sps:$4 sm:$0xff]  }
  0x15   :  { %1130 = vmatpush3.bf16.msra.mxu1 %v1254_v19  ;;  %v1292_v55 = vld [vmem:[%s1632_s1 + $0x1a0] sm:$0xff]   ;;  %v1297_v59 = vld [vmem:[%s1633_s0 + $0x48] ss:$36 sps:$4 sm:$0xff]   ;;  %v1303_v0 = vld [vmem:[%s1632_s1 + $0x170] sm:$0xff]  }
  0x16   :  { %1131 = vmatprep.subr.bf16.mxu1 %v1257_v22  ;;  %v1298_v60 = vld [vmem:[%s1632_s1 + $0x1e8] sm:$0xff]   ;;  %v1304_v1 = vld [vmem:[%s1632_s1 + $0x130] sm:$0xff]   ;;  %v1307_v4 = vld [vmem:[%s1632_s1 + $0x178] sm:$0xff]  }
  0x17   :  { %1104 = vmatpush3.bf16.msra.mxu0 %v1256_v21  ;;  %v1301_v62 = vld [vmem:[%s1632_s1 + $0x1a8] sm:$0xff]   ;;  %v1305_v2 = vld [vmem:[%s1632_s1 + $0x1f0] sm:$0xff]   ;;  %v1308_v5 = vld [vmem:[%s1632_s1 + $0x138] sm:$0xff]  }
  0x18   :  { %1105 = vmatprep.subr.bf16.mxu0 %v1259_v24  ;;  %v1306_v3 = vld [vmem:[%s1632_s1 + $0x1b0] sm:$0xff]   ;;  %v1309_v6 = vld [vmem:[%s1632_s1 + $0x1f8] sm:$0xff]   ;;  %v1314_v10 = vld [vmem:[%s1632_s1 + $0x200] sm:$0xff]  }
  0x19   :  { %1132 = vmatpush3.bf16.msra.mxu1 %v1258_v23  ;;  %v1310_v7 = vld [vmem:[%s1633_s0 + $0x10] ss:$36 sps:$4 sm:$0xff]   ;;  %v1313_v9 = vld [vmem:[%s1632_s1 + $0x1b8] sm:$0xff]   ;;  %v1318_v13 = vld [vmem:[%s1632_s1 + $0x208] sm:$0xff]  }
  0x1a   :  { %1133 = vmatprep.subr.bf16.mxu1 %v1261_v26  ;;  %v1312_v8 = vld [vmem:[%s1633_s0 + $0x14] ss:$36 sps:$4 sm:$0xff]   ;;  %v1317_v12 = vld [vmem:[%s1633_s0 + $0x1c] ss:$36 sps:$4 sm:$0xff]   ;;  %v1323_v17 = vld [vmem:[%s1633_s0 + $0x64] ss:$36 sps:$4 sm:$0xff]  }
  0x1b   :  { %1106 = vmatpush3.bf16.msra.mxu0 %v1260_v25  ;;  %v1315_v11 = vld [vmem:[%s1633_s0 + $0x18] ss:$36 sps:$4 sm:$0xff]   ;;  %v1322_v16 = vld [vmem:[%s1632_s1 + $0x210] sm:$0xff]   ;;  %v1325_v18 = vld [vmem:[%s1633_s0 + $0x60] ss:$36 sps:$4 sm:$0xff]  }
  0x1c   :  { %1107 = vmatprep.subr.bf16.mxu0 %v1263_v28  ;;  %v1319_v14 = vld [vmem:[%s1633_s0 + $0x5c] ss:$36 sps:$4 sm:$0xff]   ;;  %v1328_v22 = vld [vmem:[%s1632_s1 + $0x228] sm:$0xff]   ;;  %v1329_v23 = vld [vmem:[%s1632_s1 + $0x230] sm:$0xff]  }
  0x1d   :  { %1134 = vmatpush3.bf16.msra.mxu1 %v1262_v27  ;;  %v1321_v15 = vld [vmem:[%s1633_s0 + $0x58] ss:$36 sps:$4 sm:$0xff]   ;;  %v1327_v20 = vld [vmem:[%s1632_s1 + $0x220] sm:$0xff]   ;;  %v1332_v25 = vld [vmem:[%s1633_s0 + $0x68] ss:$36 sps:$4 sm:$0xff]  }
  0x1e   :  { %1135 = vmatprep.subr.bf16.mxu1 %v1265_v30  ;;  %v1326_v19 = vld [vmem:[%s1632_s1 + $0x218] sm:$0xff]   ;;  %v1331_v21 = vld [vmem:[%s1633_s0 + $0x20] ss:$36 sps:$4 sm:$0xff]  }
  0x1f   :  { %1108 = vmatpush3.bf16.msra.mxu0 %v1264_v29  ;;  %v1330_v24 = vld [vmem:[%s1632_s1 + $0x238] sm:$0xff]   ;;  %v983_v27 = vld [vmem:[%s1634_s2] ss:$0 sm:$0xff] }
  0x20   :  { %1149 = vmatprep.subr.bf16.mxu0 %v1270_v34 }
  0x21   :  { %1136 = vmatpush3.bf16.msra.mxu1 %v1269_v33 }
  0x22   :  { %743 = vmatmul.mubr.bf16.vlgmr.msra.gmra.mrb[0].mxu0 %v1266_v31  ;;  %1177 = vmatprep.subr.bf16.mxu1 %v1275_v38 }
  0x23   :  { %1150 = vmatpush3.bf16.msra.mxu0 %v1274_v37  ;;  %750 = vmatprep.mubr.bf16.mxu0 %v1294_v57 }
  0x24   :  { %792 = vmatmul.mubr.bf16.vlgmr.msra.gmra.mrb[0].mxu1 %v1271_v35  ;;  %1151 = vmatprep.subr.bf16.mxu0 %v1277_v40 }
  0x25   :  { %1178 = vmatpush3.bf16.msra.mxu1 %v1276_v39  ;;  %799 = vmatprep.mubr.bf16.mxu1 %v1299_v61 }
  0x26   :  { %1179 = vmatprep.subr.bf16.mxu1 %v1279_v42 }
  0x27   :  { %1152 = vmatpush3.bf16.msra.mxu0 %v1278_v41 }
  0x28   :  { %1153 = vmatprep.subr.bf16.mxu0 %v1281_v44 }
  0x29   :  { %1180 = vmatpush3.bf16.msra.mxu1 %v1280_v43 }
  0x2a   :  { %1181 = vmatprep.subr.bf16.mxu1 %v1283_v46  ;;  %751 = vmatmul.mubr.bf16.gmra.mrb[4].mxu0 %v1297_v59 }
  0x2b   :  { %1154 = vmatpush3.bf16.msra.mxu0 %v1282_v45  ;;  %840 = vmatprep.mubr.bf16.mxu0 %v1312_v8 }
  0x2c   :  { %1155 = vmatprep.subr.bf16.mxu0 %v1285_v48  ;;  %800 = vmatmul.mubr.bf16.gmra.mrb[4].mxu1 %v1302_v63 }
  0x2d   :  { %1182 = vmatpush3.bf16.msra.mxu1 %v1284_v47  ;;  %889 = vmatprep.mubr.bf16.mxu1 %v1317_v12 }
  0x2e   :  { %1183 = vmatprep.subr.bf16.mxu1 %v1287_v50 }
  0x2f   :  { %1156 = vmatpush3.bf16.msra.mxu0 %v1286_v49 }
  0x30   :  { %1157 = vmatprep.subr.bf16.mxu0 %v1289_v52 }
  0x31   :  { %1184 = vmatpush3.bf16.msra.mxu1 %v1288_v51 }
  0x32   :  { %1185 = vmatprep.subr.bf16.mxu1 %v1291_v54 }
  0x33   :  { %1158 = vmatpush3.bf16.msra.mxu0 %v1290_v53 }
  0x34   :  { %1159 = vmatprep.subr.bf16.mxu0 %v1293_v56 }
  0x35   :  { %1186 = vmatpush3.bf16.msra.mxu1 %v1292_v55 }
  0x36   :  { %1187 = vmatprep.subr.bf16.mxu1 %v1298_v60 }
  0x37   :  { %1160 = vmatpush3.bf16.msra.mxu0 %v1296_v58 }
  0x38   :  { %1161 = vmatprep.subr.bf16.mxu0 %v1303_v0 }
  0x39   :  { %1188 = vmatpush3.bf16.msra.mxu1 %v1301_v62 }
  0x3a   :  { %1189 = vmatprep.subr.bf16.mxu1 %v1305_v2 }
  0x3b   :  { %1162 = vmatpush3.bf16.msra.mxu0 %v1304_v1 }
  0x3c   :  { %1163 = vmatprep.subr.bf16.mxu0 %v1307_v4 }
  0x3d   :  { %1190 = vmatpush3.bf16.msra.mxu1 %v1306_v3 }
  0x3e   :  { %1191 = vmatprep.subr.bf16.mxu1 %v1309_v6 }
  0x3f   :  { %1164 = vmatpush3.bf16.msra.mxu0 %v1308_v5 }
  0x40   :  { %1215 = vmatprep.subr.bf16.mxu0 %v1314_v10 }
  0x41   :  { %1192 = vmatpush3.bf16.msra.mxu1 %v1313_v9 }
  0x42   :  { %841 = vmatmul.mubr.bf16.vlgmr.msra.gmra.mrb[8].mxu0 %v1310_v7 }
  0x43   :  { %1216 = vmatpush3.bf16.msra.mxu0 %v1314_v10  ;;  %848 = vmatprep.mubr.bf16.mxu0 %v1319_v14 }
  0x44   :  { %890 = vmatmul.mubr.bf16.vlgmr.msra.gmra.mrb[8].mxu1 %v1315_v11  ;;  %1217 = vmatprep.subr.bf16.mxu0 %v1318_v13 }
  0x45   :  { %897 = vmatprep.mubr.bf16.mxu1 %v1323_v17 }
  0x47   :  { %1218 = vmatpush3.bf16.msra.mxu0 %v1318_v13 }
  0x48   :  { %1219 = vmatprep.subr.bf16.mxu0 %v1322_v16 }
  0x4a   :  { %849 = vmatmul.mubr.bf16.gmra.mrb[12].mxu0 %v1321_v15 }
  0x4b   :  { %1220 = vmatpush3.bf16.msra.mxu0 %v1322_v16  ;;  %1231 = vmatprep.mubr.bf16.mxu0 %v1331_v21 }
  0x4c   :  { %898 = vmatmul.mubr.bf16.gmra.mrb[12].mxu1 %v1325_v18  ;;  %1221 = vmatprep.subr.bf16.mxu0 %v1326_v19 }
  0x4f   :  { %1222 = vmatpush3.bf16.msra.mxu0 %v1326_v19 }
  0x50   :  { %1223 = vmatprep.subr.bf16.mxu0 %v1327_v20 }
  0x53   :  { %1224 = vmatpush3.bf16.msra.mxu0 %v1327_v20 }
  0x54   :  { %1225 = vmatprep.subr.bf16.mxu0 %v1328_v22 }
  0x57   :  { %1226 = vmatpush3.bf16.msra.mxu0 %v1328_v22 }
  0x58   :  { %1227 = vmatprep.subr.bf16.mxu0 %v1329_v23 }
  0x5b   :  { %1228 = vmatpush3.bf16.msra.mxu0 %v1329_v23 }
  0x5c   :  { %1229 = vmatprep.subr.bf16.mxu0 %v1330_v24 }
  0x5f   :  { %1230 = vmatpush3.bf16.msra.mxu0 %v1330_v24 }
  0x62   :  { %1232 = vmatmul.mubr.bf16.vlgmr.msra.gmra.mrb[16].mxu0 %v1332_v25 }
  0xf5   :  { %v1109_v26 = vpop.f32.mrb[0].mxu0 }
  0xf6   :  { %v1110_v28 = vpop.f32.mrb[1].mxu0 }
  0xf7   :  { %v1111_v29 = vadd.f32 %v1110_v28, %v1109_v26  ;;  %v1112_v30 = vpop.f32.mrb[2].mxu0  ;;  %v1137_v31 = vpop.f32.mrb[0].mxu1 }
  0xf8   :  { %v1113_v32 = vpop.f32.mrb[3].mxu0  ;;  %v1138_v35 = vpop.f32.mrb[1].mxu1 }
  0xf9   :  { %v745_v33 = vadd.f32 %v1111_v29, %v983_v27  ;;  %v1114_v34 = vadd.f32 %v1113_v32, %v1112_v30  ;;  %v1139_v36 = vadd.f32 %v1138_v35, %v1137_v31  ;;  %v1140_v37 = vpop.f32.mrb[2].mxu1 }
  0xfa   :  { %v1141_v39 = vpop.f32.mrb[3].mxu1 }
  0xfb   :  { %v748_v38 = vadd.f32 %v1114_v34, %v983_v27  ;;  %v794_v40 = vadd.f32 %v1139_v36, %v745_v33  ;;  %v1142_v41 = vadd.f32 %v1141_v39, %v1140_v37 }
  0xfd   :  { %v797_v42 = vadd.f32 %v1142_v41, %v748_v38  ;;  %v1115_v43 = vpop.f32.mrb[4].mxu0 }
  0xfe   :  { %v1116_v44 = vpop.f32.mrb[5].mxu0 }
  0xff   :  { %v1117_v45 = vadd.f32 %v1116_v44, %v1115_v43  ;;  %v1118_v46 = vpop.f32.mrb[6].mxu0  ;;  %v1143_v47 = vpop.f32.mrb[4].mxu1 }
 0x100   :  { %v1119_v48 = vpop.f32.mrb[7].mxu0  ;;  %v1144_v51 = vpop.f32.mrb[5].mxu1 }
 0x101   :  { %v753_v49 = vadd.f32 %v1117_v45, %v983_v27  ;;  %v1120_v50 = vadd.f32 %v1119_v48, %v1118_v46  ;;  %v1145_v52 = vadd.f32 %v1144_v51, %v1143_v47  ;;  %v1146_v53 = vpop.f32.mrb[6].mxu1 }
 0x102   :  { %v1147_v55 = vpop.f32.mrb[7].mxu1 }
 0x103   :  { %v756_v54 = vadd.f32 %v1120_v50, %v983_v27  ;;  %v802_v56 = vadd.f32 %v1145_v52, %v753_v49  ;;  %v1148_v57 = vadd.f32 %v1147_v55, %v1146_v53 }
 0x105   :  { %v805_v58 = vadd.f32 %v1148_v57, %v756_v54 }
 0x115   :  { %v1165_v59 = vpop.f32.mrb[8].mxu0 }
 0x116   :  { %v1166_v60 = vpop.f32.mrb[9].mxu0 }
 0x117   :  { %v1167_v61 = vadd.f32 %v1166_v60, %v1165_v59  ;;  %v1168_v62 = vpop.f32.mrb[10].mxu0  ;;  %v1193_v63 = vpop.f32.mrb[8].mxu1 }
 0x118   :  { %v1169_v0 = vpop.f32.mrb[11].mxu0  ;;  %v1194_v3 = vpop.f32.mrb[9].mxu1 }
 0x119   :  { %v843_v1 = vadd.f32 %v1167_v61, %v794_v40  ;;  %v1170_v2 = vadd.f32 %v1169_v0, %v1168_v62  ;;  %v1195_v4 = vadd.f32 %v1194_v3, %v1193_v63  ;;  %v1196_v5 = vpop.f32.mrb[10].mxu1 }
 0x11a   :  { %v1197_v7 = vpop.f32.mrb[11].mxu1 }
 0x11b   :  { %v846_v6 = vadd.f32 %v1170_v2, %v797_v42  ;;  %v1198_v8 = vadd.f32 %v1197_v7, %v1196_v5  ;;  %v892_v9 = vadd.f32 %v1195_v4, %v843_v1 }
 0x11d   :  { %v1171_v10 = vpop.f32.mrb[12].mxu0  ;;  %v895_v12 = vadd.f32 %v1198_v8, %v846_v6 }
 0x11e   :  { %v1172_v11 = vpop.f32.mrb[13].mxu0 }
 0x11f   :  { %v1173_v13 = vadd.f32 %v1172_v11, %v1171_v10  ;;  %v1174_v14 = vpop.f32.mrb[14].mxu0  ;;  %v1199_v15 = vpop.f32.mrb[12].mxu1 }
 0x120   :  { %v1175_v16 = vpop.f32.mrb[15].mxu0  ;;  %v1200_v19 = vpop.f32.mrb[13].mxu1 }
 0x121   :  { %v851_v17 = vadd.f32 %v1173_v13, %v802_v56  ;;  %v1176_v18 = vadd.f32 %v1175_v16, %v1174_v14  ;;  %v1201_v20 = vadd.f32 %v1200_v19, %v1199_v15  ;;  %v1202_v21 = vpop.f32.mrb[14].mxu1 }
 0x122   :  { %v1203_v23 = vpop.f32.mrb[15].mxu1 }
 0x123   :  { %v854_v22 = vadd.f32 %v1176_v18, %v805_v58  ;;  %v1204_v24 = vadd.f32 %v1203_v23, %v1202_v21  ;;  %v900_v25 = vadd.f32 %v1201_v20, %v851_v17 }
 0x125   :  { %v903_v26 = vadd.f32 %v1204_v24, %v854_v22 }
 0x135   :  { %v1233_v27 = vpop.f32.mrb[16].mxu0 }
 0x136   :  { %v949_v28 = vadd.f32 %v1233_v27, %v900_v25  ;;  %v940_v29 = vpop.f32.mrb[17].mxu0 }
 0x137   :  { %v941_v30 = vadd.f32 %v940_v29, %v892_v9  ;;  %v1234_v31 = vpop.f32.mrb[18].mxu0 }
 0x138   :  { %v952_v32 = vadd.f32 %v1234_v31, %v903_v26  ;;  %v943_v33 = vpop.f32.mrb[19].mxu0  ;;  %v957_v35 = vmax.f32 %v949_v28, 0.0 }
 0x139   :  { %v944_v34 = vadd.f32 %v943_v33, %v895_v12  ;;  %v955_v37 = vmax.f32 %v941_v30, 0.0 }
 0x13a   :  { %v958_v36 = vmax.f32 %v952_v32, 0.0 }
 0x13b   :  { %v956_v38 = vmax.f32 %v944_v34, 0.0 }
 0x13c   :  { %v1090_v39 = vpack.c.bf16 %v958_v36, %v957_v35 }
 0x13d   :  { %v1085_v40 = vpack.c.bf16 %v956_v38, %v955_v37 }
 0x13e   :  { %1092 = vst [vmem:[%s1635_s3 + $0x8] sm:$0xff] %v1090_v39  }
 0x13f   :  { %1086 = vst [vmem:[%s1635_s3] sm:$0xff] %v1085_v40  }

// kernel: _lambda_.12
= control target key start
LH: loop header
LB: loop body
LE: loop exit
PB: predicated region body
PF: predicated region fallthrough
CT: control target
= control target key end

     0   :  { %s2031_s1 = inlined_call_operand.vmem [shape: bf16[1152,256], index: 1, kind: input, shape index: {}]   ;;  %s2032_s0 = inlined_call_operand.vmem [shape: bf16[8,1152], index: 0, kind: input, shape index: {}]   ;;  %s2033_s2 = inlined_call_operand.vmem [shape: f32[1,256], index: 2, kind: input, shape index: {}]   ;;  %s2034_s3 = inlined_call_operand.vmem [shape: bf16[8,256], index: 3, kind: output, shape index: {}]  }
   0x1   :  { %v1320_v0 = vld [vmem:[%s2031_s1 + $0x4] ss:$8 sps:$4 sm:$0xff]   ;;  %v1324_v2 = vld [vmem:[%s2031_s1] ss:$8 sps:$4 sm:$0xff]   ;;  %v1326_v4 = vld [vmem:[%s2031_s1 + $0x14] ss:$8 sps:$4 sm:$0xff]  }
   0x2   :  { %v1322_v1 = vld [vmem:[%s2031_s1 + $0x204] ss:$8 sps:$4 sm:$0xff]   ;;  %928 = vmatprep.subr.bf16.mxu1 %v1320_v0  ;;  %v1325_v3 = vld [vmem:[%s2031_s1 + $0x200] ss:$8 sps:$4 sm:$0xff]   ;;  %v1328_v5 = vld [vmem:[%s2031_s1 + $0x214] ss:$8 sps:$4 sm:$0xff]  }
   0x3   :  { %1010 = vmatprep.subr.bf16.mxu0 %v1322_v1  ;;  %929 = vmatpush1.bf16.msra.mxu1 %v1324_v2  ;;  %v1330_v6 = vld [vmem:[%s2031_s1 + $0x10] ss:$8 sps:$4 sm:$0xff]   ;;  %v1332_v8 = vld [vmem:[%s2031_s1 + $0x24] ss:$8 sps:$4 sm:$0xff]   ;;  %v1336_v10 = vld [vmem:[%s2031_s1 + $0x20] ss:$8 sps:$4 sm:$0xff]  }
   0x4   :  { %1011 = vmatpush1.bf16.msra.mxu0 %v1325_v3  ;;  %930 = vmatprep.subr.bf16.mxu1 %v1326_v4  ;;  %v1331_v7 = vld [vmem:[%s2031_s1 + $0x210] ss:$8 sps:$4 sm:$0xff]   ;;  %v1334_v9 = vld [vmem:[%s2031_s1 + $0x224] ss:$8 sps:$4 sm:$0xff]   ;;  %v1337_v11 = vld [vmem:[%s2031_s1 + $0x220] ss:$8 sps:$4 sm:$0xff]  }
   0x5   :  { %1012 = vmatprep.subr.bf16.mxu0 %v1328_v5  ;;  %v1338_v12 = vld [vmem:[%s2031_s1 + $0x34] ss:$8 sps:$4 sm:$0xff]   ;;  %v1342_v14 = vld [vmem:[%s2031_s1 + $0x30] ss:$8 sps:$4 sm:$0xff]   ;;  %v1344_v16 = vld [vmem:[%s2031_s1 + $0x44] ss:$8 sps:$4 sm:$0xff]  }
   0x6   :  { %v1340_v13 = vld [vmem:[%s2031_s1 + $0x234] ss:$8 sps:$4 sm:$0xff]   ;;  %v1343_v15 = vld [vmem:[%s2031_s1 + $0x230] ss:$8 sps:$4 sm:$0xff]   ;;  %v1346_v17 = vld [vmem:[%s2031_s1 + $0x244] ss:$8 sps:$4 sm:$0xff]  }
   0x7   :  { %931 = vmatpush1.bf16.msra.mxu1 %v1330_v6  ;;  %v1348_v18 = vld [vmem:[%s2031_s1 + $0x40] ss:$8 sps:$4 sm:$0xff]   ;;  %v1350_v20 = vld [vmem:[%s2031_s1 + $0x54] ss:$8 sps:$4 sm:$0xff]   ;;  %v1354_v22 = vld [vmem:[%s2031_s1 + $0x50] ss:$8 sps:$4 sm:$0xff]  }
   0x8   :  { %1013 = vmatpush1.bf16.msra.mxu0 %v1331_v7  ;;  %932 = vmatprep.subr.bf16.mxu1 %v1332_v8  ;;  %v1349_v19 = vld [vmem:[%s2031_s1 + $0x240] ss:$8 sps:$4 sm:$0xff]   ;;  %v1352_v21 = vld [vmem:[%s2031_s1 + $0x254] ss:$8 sps:$4 sm:$0xff]   ;;  %v1355_v23 = vld [vmem:[%s2031_s1 + $0x250] ss:$8 sps:$4 sm:$0xff]  }
   0x9   :  { %1014 = vmatprep.subr.bf16.mxu0 %v1334_v9  ;;  %v1356_v24 = vld [vmem:[%s2031_s1 + $0x64] ss:$8 sps:$4 sm:$0xff]   ;;  %v1360_v26 = vld [vmem:[%s2031_s1 + $0x60] ss:$8 sps:$4 sm:$0xff]   ;;  %v1362_v28 = vld [vmem:[%s2031_s1 + $0x74] ss:$8 sps:$4 sm:$0xff]  }
   0xa   :  { %v1358_v25 = vld [vmem:[%s2031_s1 + $0x264] ss:$8 sps:$4 sm:$0xff]   ;;  %v1361_v27 = vld [vmem:[%s2031_s1 + $0x260] ss:$8 sps:$4 sm:$0xff]   ;;  %v1364_v29 = vld [vmem:[%s2031_s1 + $0x274] ss:$8 sps:$4 sm:$0xff]  }
   0xb   :  { %933 = vmatpush1.bf16.msra.mxu1 %v1336_v10  ;;  %v1366_v30 = vld [vmem:[%s2031_s1 + $0x70] ss:$8 sps:$4 sm:$0xff]   ;;  %v1368_v32 = vld [vmem:[%s2031_s1 + $0x84] ss:$8 sps:$4 sm:$0xff]   ;;  %v1372_v34 = vld [vmem:[%s2031_s1 + $0x80] ss:$8 sps:$4 sm:$0xff]  }
   0xc   :  { %1015 = vmatpush1.bf16.msra.mxu0 %v1337_v11  ;;  %934 = vmatprep.subr.bf16.mxu1 %v1338_v12  ;;  %v1367_v31 = vld [vmem:[%s2031_s1 + $0x270] ss:$8 sps:$4 sm:$0xff]   ;;  %v1370_v33 = vld [vmem:[%s2031_s1 + $0x284] ss:$8 sps:$4 sm:$0xff]   ;;  %v1373_v35 = vld [vmem:[%s2031_s1 + $0x280] ss:$8 sps:$4 sm:$0xff]  }
   0xd   :  { %1016 = vmatprep.subr.bf16.mxu0 %v1340_v13  ;;  %v1374_v36 = vld [vmem:[%s2031_s1 + $0x94] ss:$8 sps:$4 sm:$0xff]   ;;  %v1378_v38 = vld [vmem:[%s2031_s1 + $0x90] ss:$8 sps:$4 sm:$0xff]   ;;  %v1380_v40 = vld [vmem:[%s2031_s1 + $0xa4] ss:$8 sps:$4 sm:$0xff]  }
   0xe   :  { %v1376_v37 = vld [vmem:[%s2031_s1 + $0x294] ss:$8 sps:$4 sm:$0xff]   ;;  %v1379_v39 = vld [vmem:[%s2031_s1 + $0x290] ss:$8 sps:$4 sm:$0xff]   ;;  %v1382_v41 = vld [vmem:[%s2031_s1 + $0x2a4] ss:$8 sps:$4 sm:$0xff]  }
   0xf   :  { %935 = vmatpush1.bf16.msra.mxu1 %v1342_v14  ;;  %v1384_v42 = vld [vmem:[%s2031_s1 + $0xa0] ss:$8 sps:$4 sm:$0xff]   ;;  %v1386_v44 = vld [vmem:[%s2031_s1 + $0xb4] ss:$8 sps:$4 sm:$0xff]   ;;  %v1390_v47 = vld [vmem:[%s2031_s1 + $0xb0] ss:$8 sps:$4 sm:$0xff]  }
  0x10   :  { %1017 = vmatpush1.bf16.msra.mxu0 %v1343_v15  ;;  %936 = vmatprep.subr.bf16.mxu1 %v1344_v16  ;;  %v1385_v43 = vld [vmem:[%s2031_s1 + $0x2a0] ss:$8 sps:$4 sm:$0xff]   ;;  %v1388_v45 = vld [vmem:[%s2031_s1 + $0x2b4] ss:$8 sps:$4 sm:$0xff]   ;;  %v1391_v49 = vld [vmem:[%s2031_s1 + $0x2b0] ss:$8 sps:$4 sm:$0xff]  }
  0x11   :  { %1018 = vmatprep.subr.bf16.mxu0 %v1346_v17  ;;  %v15_v46 = vld [vmem:[%s2032_s0] sm:$0xff]  ;;  %v17_v50 = vld [vmem:[%s2032_s0 + $0x10] sm:$0xff] }
  0x12   :  { %v1149_v48 = vcombine.high %v15_v46, %v15_v46  ;;  %v1392_v51 = vld [vmem:[%s2031_s1 + $0xc4] ss:$8 sps:$4 sm:$0xff]   ;;  %v1153_v53 = vcombine.high %v17_v50, %v17_v50  ;;  %v1396_v54 = vld [vmem:[%s2031_s1 + $0xc0] ss:$8 sps:$4 sm:$0xff]   ;;  %v1398_v56 = vld [vmem:[%s2031_s1 + $0xd4] ss:$8 sps:$4 sm:$0xff]   ;;  %v1148_v6 = vcombine.low %v15_v46, %v15_v46  ;;  %v1152_v7 = vcombine.low %v17_v50, %v17_v50 }
  0x13   :  { %937 = vmatpush1.bf16.msra.mxu1 %v1348_v18  ;;  %v1394_v52 = vld [vmem:[%s2031_s1 + $0x2c4] ss:$8 sps:$4 sm:$0xff]   ;;  %v1397_v55 = vld [vmem:[%s2031_s1 + $0x2c0] ss:$8 sps:$4 sm:$0xff]   ;;  %v1400_v57 = vld [vmem:[%s2031_s1 + $0x2d4] ss:$8 sps:$4 sm:$0xff]  }
  0x14   :  { %1019 = vmatpush1.bf16.msra.mxu0 %v1349_v19  ;;  %938 = vmatprep.subr.bf16.mxu1 %v1350_v20  ;;  %v1402_v58 = vld [vmem:[%s2031_s1 + $0xd0] ss:$8 sps:$4 sm:$0xff]   ;;  %v1404_v60 = vld [vmem:[%s2031_s1 + $0xe4] ss:$8 sps:$4 sm:$0xff]   ;;  %v1408_v62 = vld [vmem:[%s2031_s1 + $0xe0] ss:$8 sps:$4 sm:$0xff]  }
  0x15   :  { %1020 = vmatprep.subr.bf16.mxu0 %v1352_v21  ;;  %960 = vmatprep.mubr.bf16.mxu1 %v1149_v48  ;;  %v1403_v59 = vld [vmem:[%s2031_s1 + $0x2d0] ss:$8 sps:$4 sm:$0xff]   ;;  %v1406_v61 = vld [vmem:[%s2031_s1 + $0x2e4] ss:$8 sps:$4 sm:$0xff]   ;;  %v1409_v63 = vld [vmem:[%s2031_s1 + $0x2e0] ss:$8 sps:$4 sm:$0xff]  }
  0x16   :  { %1042 = vmatprep.mubr.bf16.mxu0 %v1153_v53  ;;  %v1410_v0 = vld [vmem:[%s2031_s1 + $0xf4] ss:$8 sps:$4 sm:$0xff]   ;;  %v1414_v2 = vld [vmem:[%s2031_s1 + $0xf0] ss:$8 sps:$4 sm:$0xff]   ;;  %v1420_v4 = vld [vmem:[%s2031_s1 + $0x104] ss:$8 sps:$4 sm:$0xff]  }
  0x17   :  { %939 = vmatpush1.bf16.msra.mxu1 %v1354_v22  ;;  %v1412_v1 = vld [vmem:[%s2031_s1 + $0x2f4] ss:$8 sps:$4 sm:$0xff]   ;;  %v1415_v3 = vld [vmem:[%s2031_s1 + $0x2f0] ss:$8 sps:$4 sm:$0xff]   ;;  %v1425_v5 = vld [vmem:[%s2031_s1 + $0x304] ss:$8 sps:$4 sm:$0xff]  }
  0x18   :  { %1021 = vmatpush1.bf16.msra.mxu0 %v1355_v23  ;;  %940 = vmatprep.subr.bf16.mxu1 %v1356_v24  ;;  %v1418_v8 = vld [vmem:[%s2031_s1 + $0x100] ss:$8 sps:$4 sm:$0xff]   ;;  %v1428_v10 = vld [vmem:[%s2031_s1 + $0x114] ss:$8 sps:$4 sm:$0xff]   ;;  %v1426_v12 = vld [vmem:[%s2031_s1 + $0x110] ss:$8 sps:$4 sm:$0xff]  }
  0x19   :  { %1022 = vmatprep.subr.bf16.mxu0 %v1358_v25  ;;  %v1423_v9 = vld [vmem:[%s2031_s1 + $0x300] ss:$8 sps:$4 sm:$0xff]   ;;  %v1431_v11 = vld [vmem:[%s2031_s1 + $0x314] ss:$8 sps:$4 sm:$0xff]   ;;  %v1429_v13 = vld [vmem:[%s2031_s1 + $0x310] ss:$8 sps:$4 sm:$0xff]  }
  0x1a   :  { %v1434_v14 = vld [vmem:[%s2031_s1 + $0x124] ss:$8 sps:$4 sm:$0xff]   ;;  %v1432_v16 = vld [vmem:[%s2031_s1 + $0x120] ss:$8 sps:$4 sm:$0xff]   ;;  %v1440_v18 = vld [vmem:[%s2031_s1 + $0x134] ss:$8 sps:$4 sm:$0xff]  }
  0x1b   :  { %941 = vmatpush1.bf16.msra.mxu1 %v1360_v26  ;;  %v1437_v15 = vld [vmem:[%s2031_s1 + $0x324] ss:$8 sps:$4 sm:$0xff]   ;;  %v1435_v17 = vld [vmem:[%s2031_s1 + $0x320] ss:$8 sps:$4 sm:$0xff]   ;;  %v1443_v19 = vld [vmem:[%s2031_s1 + $0x334] ss:$8 sps:$4 sm:$0xff]  }
  0x1c   :  { %1023 = vmatpush1.bf16.msra.mxu0 %v1361_v27  ;;  %942 = vmatprep.subr.bf16.mxu1 %v1362_v28  ;;  %v1438_v20 = vld [vmem:[%s2031_s1 + $0x130] ss:$8 sps:$4 sm:$0xff]   ;;  %v1446_v22 = vld [vmem:[%s2031_s1 + $0x144] ss:$8 sps:$4 sm:$0xff]   ;;  %v1444_v24 = vld [vmem:[%s2031_s1 + $0x140] ss:$8 sps:$4 sm:$0xff]  }
  0x1d   :  { %1024 = vmatprep.subr.bf16.mxu0 %v1364_v29  ;;  %v1441_v21 = vld [vmem:[%s2031_s1 + $0x330] ss:$8 sps:$4 sm:$0xff]   ;;  %v1449_v23 = vld [vmem:[%s2031_s1 + $0x344] ss:$8 sps:$4 sm:$0xff]   ;;  %v1447_v25 = vld [vmem:[%s2031_s1 + $0x340] ss:$8 sps:$4 sm:$0xff]  }
  0x1e   :  { %v1452_v26 = vld [vmem:[%s2031_s1 + $0x154] ss:$8 sps:$4 sm:$0xff]   ;;  %v1450_v28 = vld [vmem:[%s2031_s1 + $0x150] ss:$8 sps:$4 sm:$0xff]   ;;  %v1482_v50 = vld [vmem:[%s2031_s1 + $0x1a4] ss:$8 sps:$4 sm:$0xff]  }
  0x1f   :  { %943 = vmatpush1.bf16.msra.mxu1 %v1366_v30  ;;  %v1455_v27 = vld [vmem:[%s2031_s1 + $0x354] ss:$8 sps:$4 sm:$0xff]   ;;  %v1453_v29 = vld [vmem:[%s2031_s1 + $0x350] ss:$8 sps:$4 sm:$0xff]   ;;  %v1458_v30 = vld [vmem:[%s2031_s1 + $0x164] ss:$8 sps:$4 sm:$0xff]  }
  0x20   :  { %1025 = vmatpush1.bf16.msra.mxu0 %v1367_v31  ;;  %944 = vmatprep.subr.bf16.mxu1 %v1368_v32  ;;  %v1461_v31 = vld [vmem:[%s2031_s1 + $0x364] ss:$8 sps:$4 sm:$0xff]   ;;  %v1476_v46 = vld [vmem:[%s2031_s1 + $0x194] ss:$8 sps:$4 sm:$0xff]   ;;  %v1474_v48 = vld [vmem:[%s2031_s1 + $0x190] ss:$8 sps:$4 sm:$0xff]  }
  0x21   :  { %1026 = vmatprep.subr.bf16.mxu0 %v1370_v33  ;;  %v1845_v32 = vld [vmem:[%s2032_s0 + $0x8] sm:$0xff]  ;;  %v1850_v33 = vld [vmem:[%s2032_s0 + $0x18] sm:$0xff] }
  0x22   :  { %v1483_v53 = vld [vmem:[%s2031_s1 + $0x3a0] ss:$8 sps:$4 sm:$0xff]  }
  0x23   :  { %945 = vmatpush1.bf16.msra.mxu1 %v1372_v34  ;;  %v1456_v34 = vld [vmem:[%s2031_s1 + $0x160] ss:$8 sps:$4 sm:$0xff]  }
  0x24   :  { %1027 = vmatpush1.bf16.msra.mxu0 %v1373_v35  ;;  %946 = vmatprep.subr.bf16.mxu1 %v1374_v36  ;;  %v1459_v35 = vld [vmem:[%s2031_s1 + $0x360] ss:$8 sps:$4 sm:$0xff]   ;;  %v1151_v36 = vcombine.high %v1845_v32, %v1845_v32 }
  0x25   :  { %1028 = vmatprep.subr.bf16.mxu0 %v1376_v37  ;;  %v1155_v37 = vcombine.high %v1850_v33, %v1850_v33 }
  0x27   :  { %947 = vmatpush1.bf16.msra.mxu1 %v1378_v38  ;;  %v1464_v38 = vld [vmem:[%s2031_s1 + $0x174] ss:$8 sps:$4 sm:$0xff]  }
  0x28   :  { %1029 = vmatpush1.bf16.msra.mxu0 %v1379_v39  ;;  %948 = vmatprep.subr.bf16.mxu1 %v1380_v40  ;;  %v1467_v39 = vld [vmem:[%s2031_s1 + $0x374] ss:$8 sps:$4 sm:$0xff]   ;;  %v1462_v40 = vld [vmem:[%s2031_s1 + $0x170] ss:$8 sps:$4 sm:$0xff]  }
  0x29   :  { %1030 = vmatprep.subr.bf16.mxu0 %v1382_v41  ;;  %v1465_v41 = vld [vmem:[%s2031_s1 + $0x370] ss:$8 sps:$4 sm:$0xff]  }
  0x2b   :  { %949 = vmatpush1.bf16.msra.mxu1 %v1384_v42  ;;  %v1470_v42 = vld [vmem:[%s2031_s1 + $0x184] ss:$8 sps:$4 sm:$0xff]  }
  0x2c   :  { %1031 = vmatpush1.bf16.msra.mxu0 %v1385_v43  ;;  %950 = vmatprep.subr.bf16.mxu1 %v1386_v44  ;;  %v1473_v43 = vld [vmem:[%s2031_s1 + $0x384] ss:$8 sps:$4 sm:$0xff]   ;;  %v1468_v44 = vld [vmem:[%s2031_s1 + $0x180] ss:$8 sps:$4 sm:$0xff]  }
  0x2d   :  { %1032 = vmatprep.subr.bf16.mxu0 %v1388_v45  ;;  %v1471_v45 = vld [vmem:[%s2031_s1 + $0x380] ss:$8 sps:$4 sm:$0xff]  }
  0x2f   :  { %951 = vmatpush1.bf16.msra.mxu1 %v1390_v47  ;;  %v1479_v47 = vld [vmem:[%s2031_s1 + $0x394] ss:$8 sps:$4 sm:$0xff]  }
  0x30   :  { %1033 = vmatpush1.bf16.msra.mxu0 %v1391_v49  ;;  %952 = vmatprep.subr.bf16.mxu1 %v1392_v51  ;;  %v1477_v49 = vld [vmem:[%s2031_s1 + $0x390] ss:$8 sps:$4 sm:$0xff]   ;;  %v1485_v51 = vld [vmem:[%s2031_s1 + $0x3a4] ss:$8 sps:$4 sm:$0xff]  }
  0x31   :  { %1034 = vmatprep.subr.bf16.mxu0 %v1394_v52  ;;  %v1480_v52 = vld [vmem:[%s2031_s1 + $0x1a0] ss:$8 sps:$4 sm:$0xff]  }
  0x33   :  { %953 = vmatpush1.bf16.msra.mxu1 %v1396_v54  ;;  %v1488_v54 = vld [vmem:[%s2031_s1 + $0x1b4] ss:$8 sps:$4 sm:$0xff]  }
  0x34   :  { %1035 = vmatpush1.bf16.msra.mxu0 %v1397_v55  ;;  %954 = vmatprep.subr.bf16.mxu1 %v1398_v56  ;;  %v1491_v55 = vld [vmem:[%s2031_s1 + $0x3b4] ss:$8 sps:$4 sm:$0xff]   ;;  %v1486_v56 = vld [vmem:[%s2031_s1 + $0x1b0] ss:$8 sps:$4 sm:$0xff]  }
  0x35   :  { %1036 = vmatprep.subr.bf16.mxu0 %v1400_v57  ;;  %v1489_v57 = vld [vmem:[%s2031_s1 + $0x3b0] ss:$8 sps:$4 sm:$0xff]  }
  0x37   :  { %955 = vmatpush1.bf16.msra.mxu1 %v1402_v58  ;;  %v1494_v58 = vld [vmem:[%s2031_s1 + $0x1c4] ss:$8 sps:$4 sm:$0xff]  }
  0x38   :  { %1037 = vmatpush1.bf16.msra.mxu0 %v1403_v59  ;;  %956 = vmatprep.subr.bf16.mxu1 %v1404_v60  ;;  %v1497_v59 = vld [vmem:[%s2031_s1 + $0x3c4] ss:$8 sps:$4 sm:$0xff]   ;;  %v1492_v60 = vld [vmem:[%s2031_s1 + $0x1c0] ss:$8 sps:$4 sm:$0xff]  }
  0x39   :  { %1038 = vmatprep.subr.bf16.mxu0 %v1406_v61  ;;  %v1495_v61 = vld [vmem:[%s2031_s1 + $0x3c0] ss:$8 sps:$4 sm:$0xff]  }
  0x3b   :  { %957 = vmatpush1.bf16.msra.mxu1 %v1408_v62  ;;  %v1500_v62 = vld [vmem:[%s2031_s1 + $0x1d4] ss:$8 sps:$4 sm:$0xff]  }
  0x3c   :  { %1039 = vmatpush1.bf16.msra.mxu0 %v1409_v63  ;;  %958 = vmatprep.subr.bf16.mxu1 %v1410_v0  ;;  %v1503_v63 = vld [vmem:[%s2031_s1 + $0x3d4] ss:$8 sps:$4 sm:$0xff]   ;;  %v1498_v0 = vld [vmem:[%s2031_s1 + $0x1d0] ss:$8 sps:$4 sm:$0xff]  }
  0x3d   :  { %1040 = vmatprep.subr.bf16.mxu0 %v1412_v1  ;;  %v1501_v1 = vld [vmem:[%s2031_s1 + $0x3d0] ss:$8 sps:$4 sm:$0xff]  }
  0x3f   :  { %959 = vmatpush1.bf16.msra.mxu1 %v1414_v2  ;;  %v1506_v2 = vld [vmem:[%s2031_s1 + $0x1e4] ss:$8 sps:$4 sm:$0xff]  }
  0x40   :  { %1041 = vmatpush1.bf16.msra.mxu0 %v1415_v3  ;;  %969 = vmatprep.subr.bf16.mxu1 %v1420_v4  ;;  %v1509_v3 = vld [vmem:[%s2031_s1 + $0x3e4] ss:$8 sps:$4 sm:$0xff]   ;;  %v1504_v4 = vld [vmem:[%s2031_s1 + $0x1e0] ss:$8 sps:$4 sm:$0xff]  }
  0x41   :  { %1051 = vmatprep.subr.bf16.mxu0 %v1425_v5  ;;  %v1507_v5 = vld [vmem:[%s2031_s1 + $0x3e0] ss:$8 sps:$4 sm:$0xff]  }
  0x42   :  { %961 = vmatmul.mubr.bf16.vlgmr.msra.gmra.mrb[0].mxu1 %v1148_v6  ;;  %v1512_v6 = vld [vmem:[%s2031_s1 + $0x1f4] ss:$8 sps:$4 sm:$0xff]  }
  0x43   :  { %1043 = vmatmul.mubr.bf16.vlgmr.msra.gmra.mrb[0].mxu0 %v1152_v7  ;;  %970 = vmatpush1.bf16.msra.mxu1 %v1418_v8  ;;  %v1515_v7 = vld [vmem:[%s2031_s1 + $0x3f4] ss:$8 sps:$4 sm:$0xff]   ;;  %v1510_v8 = vld [vmem:[%s2031_s1 + $0x1f0] ss:$8 sps:$4 sm:$0xff]  }
  0x44   :  { %1052 = vmatpush1.bf16.msra.mxu0 %v1423_v9  ;;  %971 = vmatprep.subr.bf16.mxu1 %v1428_v10  ;;  %v1513_v9 = vld [vmem:[%s2031_s1 + $0x3f0] ss:$8 sps:$4 sm:$0xff]   ;;  %v1522_v10 = vld [vmem:[%s2031_s1 + $0x404] ss:$8 sps:$4 sm:$0xff]  }
  0x45   :  { %1053 = vmatprep.subr.bf16.mxu0 %v1431_v11  ;;  %1001 = vmatprep.mubr.bf16.mxu1 %v1151_v36  ;;  %v1150_v11 = vcombine.low %v1845_v32, %v1845_v32 }
  0x46   :  { %1083 = vmatprep.mubr.bf16.mxu0 %v1155_v37  ;;  %v164_v37 = vld [vmem:[%s2033_s2] sm:$0x3] }
  0x47   :  { %972 = vmatpush1.bf16.msra.mxu1 %v1426_v12  ;;  %v1154_v12 = vcombine.low %v1850_v33, %v1850_v33 }
  0x48   :  { %1054 = vmatpush1.bf16.msra.mxu0 %v1429_v13  ;;  %973 = vmatprep.subr.bf16.mxu1 %v1434_v14  ;;  %v1520_v13 = vld [vmem:[%s2031_s1 + $0x400] ss:$8 sps:$4 sm:$0xff]   ;;  %v1525_v14 = vld [vmem:[%s2031_s1 + $0x414] ss:$8 sps:$4 sm:$0xff]  }
  0x49   :  { %1055 = vmatprep.subr.bf16.mxu0 %v1437_v15  ;;  %v1523_v15 = vld [vmem:[%s2031_s1 + $0x410] ss:$8 sps:$4 sm:$0xff]  }
  0x4b   :  { %974 = vmatpush1.bf16.msra.mxu1 %v1432_v16  ;;  %v1545_v16 = vmov 0  }
  0x4c   :  { %1056 = vmatpush1.bf16.msra.mxu0 %v1435_v17  ;;  %975 = vmatprep.subr.bf16.mxu1 %v1440_v18  ;;  %v1528_v17 = vld [vmem:[%s2031_s1 + $0x424] ss:$8 sps:$4 sm:$0xff]   ;;  %v1526_v18 = vld [vmem:[%s2031_s1 + $0x420] ss:$8 sps:$4 sm:$0xff]  }
  0x4d   :  { %1057 = vmatprep.subr.bf16.mxu0 %v1443_v19  ;;  %v1531_v19 = vld [vmem:[%s2031_s1 + $0x434] ss:$8 sps:$4 sm:$0xff]  }
  0x4f   :  { %976 = vmatpush1.bf16.msra.mxu1 %v1438_v20  ;;  %v1529_v20 = vld [vmem:[%s2031_s1 + $0x430] ss:$8 sps:$4 sm:$0xff]  }
  0x50   :  { %1058 = vmatpush1.bf16.msra.mxu0 %v1441_v21  ;;  %977 = vmatprep.subr.bf16.mxu1 %v1446_v22  ;;  %v1534_v21 = vld [vmem:[%s2031_s1 + $0x444] ss:$8 sps:$4 sm:$0xff]   ;;  %v1532_v22 = vld [vmem:[%s2031_s1 + $0x440] ss:$8 sps:$4 sm:$0xff]  }
  0x51   :  { %1059 = vmatprep.subr.bf16.mxu0 %v1449_v23  ;;  %v1537_v23 = vld [vmem:[%s2031_s1 + $0x454] ss:$8 sps:$4 sm:$0xff]  }
  0x53   :  { %978 = vmatpush1.bf16.msra.mxu1 %v1444_v24  ;;  %v1535_v24 = vld [vmem:[%s2031_s1 + $0x450] ss:$8 sps:$4 sm:$0xff]  }
  0x54   :  { %1060 = vmatpush1.bf16.msra.mxu0 %v1447_v25  ;;  %979 = vmatprep.subr.bf16.mxu1 %v1452_v26  ;;  %v1540_v25 = vld [vmem:[%s2031_s1 + $0x464] ss:$8 sps:$4 sm:$0xff]   ;;  %v1538_v26 = vld [vmem:[%s2031_s1 + $0x460] ss:$8 sps:$4 sm:$0xff]  }
  0x55   :  { %1061 = vmatprep.subr.bf16.mxu0 %v1455_v27  ;;  %v1543_v27 = vld [vmem:[%s2031_s1 + $0x474] ss:$8 sps:$4 sm:$0xff]  }
  0x57   :  { %980 = vmatpush1.bf16.msra.mxu1 %v1450_v28  ;;  %v1541_v28 = vld [vmem:[%s2031_s1 + $0x470] ss:$8 sps:$4 sm:$0xff]  }
  0x58   :  { %1062 = vmatpush1.bf16.msra.mxu0 %v1453_v29  ;;  %981 = vmatprep.subr.bf16.mxu1 %v1458_v30  ;;  %v1544_v29 = vld [vmem:[%s2032_s0 + $0x20] ss:$0 sps:$4 sm:$0xff]  }
  0x59   :  { %1063 = vmatprep.subr.bf16.mxu0 %v1461_v31 }
  0x5b   :  { %982 = vmatpush1.bf16.msra.mxu1 %v1456_v34  ;;  %v166_v34 = vlaneseq }
  0x5c   :  { %1064 = vmatpush1.bf16.msra.mxu0 %v1459_v35  ;;  %983 = vmatprep.subr.bf16.mxu1 %v1464_v38 }
  0x5d   :  { %1065 = vmatprep.subr.bf16.mxu0 %v1467_v39  ;;  %v167_v35 = vshrl.u32 %v166_v34, 7 }
  0x5f   :  { %984 = vmatpush1.bf16.msra.mxu1 %v1462_v40  ;;  %v168_v36 = vsub.s32 0, %v167_v35  ;;  %v172_v38 = vsub.s32 1, %v167_v35 }
  0x60   :  { %1066 = vmatpush1.bf16.msra.mxu0 %v1465_v41  ;;  %985 = vmatprep.subr.bf16.mxu1 %v1470_v42 }
  0x61   :  { %1067 = vmatprep.subr.bf16.mxu0 %v1473_v43  ;;  %v169_v39 = vrot.slane %v164_v37, %v168_v36  ;;  %v173_v40 = vrot.slane %v164_v37, %v172_v38 }
  0x63   :  { %986 = vmatpush1.bf16.msra.mxu1 %v1468_v44 }
  0x64   :  { %1068 = vmatpush1.bf16.msra.mxu0 %v1471_v45  ;;  %987 = vmatprep.subr.bf16.mxu1 %v1476_v46 }
  0x65   :  { %1069 = vmatprep.subr.bf16.mxu0 %v1479_v47 }
  0x67   :  { %988 = vmatpush1.bf16.msra.mxu1 %v1474_v48 }
  0x68   :  { %1070 = vmatpush1.bf16.msra.mxu0 %v1477_v49  ;;  %989 = vmatprep.subr.bf16.mxu1 %v1482_v50 }
  0x69   :  { %1071 = vmatprep.subr.bf16.mxu0 %v1485_v51 }
  0x6b   :  { %990 = vmatpush1.bf16.msra.mxu1 %v1480_v52 }
  0x6c   :  { %1072 = vmatpush1.bf16.msra.mxu0 %v1483_v53  ;;  %991 = vmatprep.subr.bf16.mxu1 %v1488_v54 }
  0x6d   :  { %1073 = vmatprep.subr.bf16.mxu0 %v1491_v55 }
  0x6f   :  { %992 = vmatpush1.bf16.msra.mxu1 %v1486_v56 }
  0x70   :  { %1074 = vmatpush1.bf16.msra.mxu0 %v1489_v57  ;;  %993 = vmatprep.subr.bf16.mxu1 %v1494_v58 }
  0x71   :  { %1075 = vmatprep.subr.bf16.mxu0 %v1497_v59 }
  0x73   :  { %994 = vmatpush1.bf16.msra.mxu1 %v1492_v60 }
  0x74   :  { %1076 = vmatpush1.bf16.msra.mxu0 %v1495_v61  ;;  %995 = vmatprep.subr.bf16.mxu1 %v1500_v62 }
  0x75   :  { %1077 = vmatprep.subr.bf16.mxu0 %v1503_v63 }
  0x77   :  { %996 = vmatpush1.bf16.msra.mxu1 %v1498_v0 }
  0x78   :  { %1078 = vmatpush1.bf16.msra.mxu0 %v1501_v1  ;;  %997 = vmatprep.subr.bf16.mxu1 %v1506_v2 }
  0x79   :  { %1079 = vmatprep.subr.bf16.mxu0 %v1509_v3 }
  0x7b   :  { %998 = vmatpush1.bf16.msra.mxu1 %v1504_v4 }
  0x7c   :  { %1080 = vmatpush1.bf16.msra.mxu0 %v1507_v5  ;;  %999 = vmatprep.subr.bf16.mxu1 %v1512_v6 }
  0x7d   :  { %1081 = vmatprep.subr.bf16.mxu0 %v1515_v7 }
  0x7f   :  { %1000 = vmatpush1.bf16.msra.mxu1 %v1510_v8 }
  0x80   :  { %1082 = vmatpush1.bf16.msra.mxu0 %v1513_v9 }
  0x81   :  { %1092 = vmatprep.subr.bf16.mxu0 %v1522_v10 }
  0x82   :  { %1002 = vmatmul.mubr.bf16.vlgmr.msra.gmra.mrb[0].mxu1 %v1150_v11 }
  0x83   :  { %1084 = vmatmul.mubr.bf16.vlgmr.msra.gmra.mrb[0].mxu0 %v1154_v12 }
  0x84   :  { %1093 = vmatpush1.bf16.msra.mxu0 %v1520_v13  ;;  %1124 = vmatprep.mubr.bf16.mxu0 %v1545_v16 }
  0x85   :  { %1094 = vmatprep.subr.bf16.mxu0 %v1525_v14 }
  0x88   :  { %1095 = vmatpush1.bf16.msra.mxu0 %v1523_v15 }
  0x89   :  { %1096 = vmatprep.subr.bf16.mxu0 %v1528_v17 }
  0x8c   :  { %1097 = vmatpush1.bf16.msra.mxu0 %v1526_v18 }
  0x8d   :  { %1098 = vmatprep.subr.bf16.mxu0 %v1531_v19 }
  0x90   :  { %1099 = vmatpush1.bf16.msra.mxu0 %v1529_v20 }
  0x91   :  { %1100 = vmatprep.subr.bf16.mxu0 %v1534_v21 }
  0x94   :  { %1101 = vmatpush1.bf16.msra.mxu0 %v1532_v22 }
  0x95   :  { %1102 = vmatprep.subr.bf16.mxu0 %v1537_v23 }
  0x98   :  { %1103 = vmatpush1.bf16.msra.mxu0 %v1535_v24 }
  0x99   :  { %1104 = vmatprep.subr.bf16.mxu0 %v1540_v25 }
  0x9c   :  { %1105 = vmatpush1.bf16.msra.mxu0 %v1538_v26 }
  0x9d   :  { %1106 = vmatprep.subr.bf16.mxu0 %v1543_v27 }
  0xa0   :  { %1107 = vmatpush1.bf16.msra.mxu0 %v1541_v28 }
  0xa3   :  { %1125 = vmatmul.mubr.bf16.vlgmr.msra.gmra.mrb[0].mxu0 %v1544_v29 }
 0x155   :  { %v1003_v30 = vpop.f32.mrb[0].mxu1 }
 0x156   :  { %v1005_v31 = vpop.f32.mrb[1].mxu1  ;;  %v1303_v41 = vadd.f32 %v1003_v30, %v169_v39 }
 0x157   :  { %v1007_v32 = vpop.f32.mrb[2].mxu1  ;;  %v1305_v42 = vadd.f32 %v1005_v31, %v173_v40 }
 0x158   :  { %v1008_v33 = vpop.f32.mrb[3].mxu1 }
 0x176   :  { %v1126_v43 = vpop.f32.mrb[0].mxu0 }
 0x177   :  { %v1304_v44 = vadd.f32 %v1303_v41, %v1126_v43  ;;  %v1128_v45 = vpop.f32.mrb[1].mxu0 }
 0x178   :  { %v1306_v46 = vadd.f32 %v1305_v42, %v1128_v45  ;;  %v1130_v47 = vpop.f32.mrb[2].mxu0 }
 0x179   :  { %v1133_v48 = vmax.f32 %v1304_v44, 0.0  ;;  %v1131_v49 = vpop.f32.mrb[3].mxu0 }
 0x17a   :  { %v1134_v50 = vmax.f32 %v1306_v46, 0.0 }
 0x17c   :  { %v1302_v51 = vpack.c.bf16 %v1134_v50, %v1133_v48 }
 0x17e   :  { %1143 = vst [vmem:[%s2034_s3] sm:$0xff] %v1302_v51 }

// kernel: _lambda_.13
= control target key start
LH: loop header
LB: loop body
LE: loop exit
PB: predicated region body
PF: predicated region fallthrough
CT: control target
= control target key end

     0   :  { %v157_v28 = vlaneseq  ;;  %v1014_v36 = vmov 1966171168   ;;  %s1259_s0 = inlined_call_operand.vmem [shape: bf16[2,1024], index: 0, kind: input, shape index: {}]   ;;  %s1260_s1 = inlined_call_operand.vmem [shape: bf16[1024,128], index: 1, kind: input, shape index: {}]   ;;  %s1261_s2 = inlined_call_operand.vmem [shape: f32[1,128], index: 2, kind: input, shape index: {}]   ;;  %s1262_s3 = inlined_call_operand.hbm [shape: f32[2,128], index: 3, kind: output, shape index: {}]  }
   0x1   :  { %v925_v0 = vld [vmem:[%s1260_s1 + $0x40] sm:$0xff]   ;;  %v929_v4 = vld [vmem:[%s1260_s1 + $0x48] sm:$0xff]   ;;  %v933_v8 = vld [vmem:[%s1260_s1 + $0x50] sm:$0xff]   ;;  %v155_v37 = vunpack.c.l.s4 %v1014_v36 }
   0x2   :  { %v926_v1 = vld [vmem:[%s1260_s1 + $0xc0] sm:$0xff]   ;;  %835 = vmatprep.subr.bf16.mxu0 %v925_v0  ;;  %v930_v5 = vld [vmem:[%s1260_s1 + $0xc8] sm:$0xff]   ;;  %v934_v9 = vld [vmem:[%s1260_s1 + $0xd0] sm:$0xff]   ;;  %v158_v33 = vshrl.u32 %v157_v28, 7 }
   0x3   :  { %v927_v2 = vld [vmem:[%s1260_s1] sm:$0xff]   ;;  %857 = vmatprep.subr.bf16.mxu1 %v926_v1  ;;  %v931_v6 = vld [vmem:[%s1260_s1 + $0x8] sm:$0xff]   ;;  %v935_v10 = vld [vmem:[%s1260_s1 + $0x10] sm:$0xff]   ;;  %v156_v40 = vunpack.c.0.s8 %v155_v37 }
   0x4   :  { %v928_v3 = vld [vmem:[%s1260_s1 + $0x80] sm:$0xff]   ;;  %836 = vmatpush3.bf16.msra.mxu0 %v927_v2  ;;  %v932_v7 = vld [vmem:[%s1260_s1 + $0x88] sm:$0xff]   ;;  %v936_v11 = vld [vmem:[%s1260_s1 + $0x90] sm:$0xff]  }
   0x5   :  { %858 = vmatpush3.bf16.msra.mxu1 %v928_v3  ;;  %837 = vmatprep.subr.bf16.mxu0 %v929_v4  ;;  %v937_v12 = vld [vmem:[%s1260_s1 + $0x58] sm:$0xff]   ;;  %v941_v16 = vld [vmem:[%s1260_s1 + $0x60] sm:$0xff]   ;;  %v945_v20 = vld [vmem:[%s1260_s1 + $0x68] sm:$0xff]   ;;  %v1141_v41 = vsub.s32 %v156_v40, %v158_v33 }
   0x6   :  { %859 = vmatprep.subr.bf16.mxu1 %v930_v5  ;;  %v938_v13 = vld [vmem:[%s1260_s1 + $0xd8] sm:$0xff]   ;;  %v942_v17 = vld [vmem:[%s1260_s1 + $0xe0] sm:$0xff]   ;;  %v946_v21 = vld [vmem:[%s1260_s1 + $0xe8] sm:$0xff]  }
   0x7   :  { %v939_v14 = vld [vmem:[%s1260_s1 + $0x18] sm:$0xff]   ;;  %v943_v18 = vld [vmem:[%s1260_s1 + $0x20] sm:$0xff]   ;;  %v947_v22 = vld [vmem:[%s1260_s1 + $0x28] sm:$0xff]  }
   0x8   :  { %838 = vmatpush3.bf16.msra.mxu0 %v931_v6  ;;  %v940_v15 = vld [vmem:[%s1260_s1 + $0x98] sm:$0xff]   ;;  %v944_v19 = vld [vmem:[%s1260_s1 + $0xa0] sm:$0xff]   ;;  %v948_v23 = vld [vmem:[%s1260_s1 + $0xa8] sm:$0xff]  }
   0x9   :  { %860 = vmatpush3.bf16.msra.mxu1 %v932_v7  ;;  %839 = vmatprep.subr.bf16.mxu0 %v933_v8  ;;  %v949_v24 = vld [vmem:[%s1260_s1 + $0x70] sm:$0xff]   ;;  %v953_v29 = vld [vmem:[%s1260_s1 + $0x78] sm:$0xff]   ;;  %v16_v34 = vld [vmem:[%s1259_s0] sm:$0xff] }
   0xa   :  { %861 = vmatprep.subr.bf16.mxu1 %v934_v9  ;;  %v950_v25 = vld [vmem:[%s1260_s1 + $0xf0] sm:$0xff]   ;;  %v954_v30 = vld [vmem:[%s1260_s1 + $0xf8] sm:$0xff]   ;;  %v958_v35 = vld [vmem:[%s1260_s1 + $0x140] sm:$0xff]   ;;  %v153_v39 = vcombine.high %v16_v34, %v16_v34  ;;  %v160_v42 = vrot.slane %v16_v34, %v1141_v41 }
   0xb   :  { %v951_v26 = vld [vmem:[%s1260_s1 + $0x30] sm:$0xff]   ;;  %v955_v31 = vld [vmem:[%s1260_s1 + $0x38] sm:$0xff]   ;;  %v959_v38 = vld [vmem:[%s1260_s1 + $0x1c0] sm:$0xff]  }
   0xc   :  { %840 = vmatpush3.bf16.msra.mxu0 %v935_v10  ;;  %v952_v27 = vld [vmem:[%s1260_s1 + $0xb0] sm:$0xff]   ;;  %v956_v32 = vld [vmem:[%s1260_s1 + $0xb8] sm:$0xff]   ;;  %v1145_v43 = vrot.slane %v153_v39, %v1141_v41  ;;  %v168_v44 = vcombine.high %v160_v42, %v160_v42  ;;  %v176_v45 = vrot.slane %v160_v42, %v1141_v41  ;;  %v960_v48 = vld [vmem:[%s1260_s1 + $0x100] sm:$0xff]  }
   0xd   :  { %862 = vmatpush3.bf16.msra.mxu1 %v936_v11  ;;  %841 = vmatprep.subr.bf16.mxu0 %v937_v12  ;;  %v962_v51 = vld [vmem:[%s1260_s1 + $0x148] sm:$0xff]   ;;  %v961_v53 = vld [vmem:[%s1260_s1 + $0x180] sm:$0xff]   ;;  %v966_v57 = vld [vmem:[%s1260_s1 + $0x150] sm:$0xff]  }
   0xe   :  { %863 = vmatprep.subr.bf16.mxu1 %v938_v13  ;;  %v169_v46 = vcombine.high %v1145_v43, %v1145_v43  ;;  %v190_v47 = vrot.slane %v168_v44, %v1141_v41  ;;  %v198_v50 = vcombine.high %v176_v45, %v176_v45  ;;  %v963_v54 = vld [vmem:[%s1260_s1 + $0x1c8] sm:$0xff]   ;;  %v967_v59 = vld [vmem:[%s1260_s1 + $0x1d0] sm:$0xff]   ;;  %v970_v61 = vld [vmem:[%s1260_s1 + $0x158] sm:$0xff]  }
   0xf   :  { %v964_v56 = vld [vmem:[%s1260_s1 + $0x108] sm:$0xff]   ;;  %v968_v60 = vld [vmem:[%s1260_s1 + $0x110] sm:$0xff]   ;;  %v971_v63 = vld [vmem:[%s1260_s1 + $0x1d8] sm:$0xff]  }
  0x10   :  { %842 = vmatpush3.bf16.msra.mxu0 %v939_v14  ;;  %v197_v49 = vrot.slane %v169_v46, %v1141_v41  ;;  %626 = vmatprep.mubr.bf16.mxu0 %v190_v47  ;;  %v200_v52 = vcombine.high %v190_v47, %v190_v47  ;;  %v965_v58 = vld [vmem:[%s1260_s1 + $0x188] sm:$0xff]   ;;  %v969_v62 = vld [vmem:[%s1260_s1 + $0x190] sm:$0xff]   ;;  %v972_v0 = vld [vmem:[%s1260_s1 + $0x118] sm:$0xff]  }
  0x11   :  { %864 = vmatpush3.bf16.msra.mxu1 %v940_v15  ;;  %843 = vmatprep.subr.bf16.mxu0 %v941_v16  ;;  %v974_v1 = vld [vmem:[%s1260_s1 + $0x160] sm:$0xff]   ;;  %v973_v2 = vld [vmem:[%s1260_s1 + $0x198] sm:$0xff]   ;;  %v978_v5 = vld [vmem:[%s1260_s1 + $0x168] sm:$0xff]  }
  0x12   :  { %865 = vmatprep.subr.bf16.mxu1 %v942_v17  ;;  %v201_v55 = vcombine.high %v197_v49, %v197_v49  ;;  %666 = vmatprep.mubr.bf16.mxu1 %v200_v52  ;;  %v975_v3 = vld [vmem:[%s1260_s1 + $0x1e0] sm:$0xff]   ;;  %v979_v7 = vld [vmem:[%s1260_s1 + $0x1e8] sm:$0xff]   ;;  %v982_v9 = vld [vmem:[%s1260_s1 + $0x170] sm:$0xff]  }
  0x13   :  { %v976_v4 = vld [vmem:[%s1260_s1 + $0x120] sm:$0xff]   ;;  %v980_v8 = vld [vmem:[%s1260_s1 + $0x128] sm:$0xff]  }
  0x14   :  { %844 = vmatpush3.bf16.msra.mxu0 %v943_v18  ;;  %v977_v6 = vld [vmem:[%s1260_s1 + $0x1a0] sm:$0xff]  }
  0x15   :  { %866 = vmatpush3.bf16.msra.mxu1 %v944_v19  ;;  %845 = vmatprep.subr.bf16.mxu0 %v945_v20 }
  0x16   :  { %867 = vmatprep.subr.bf16.mxu1 %v946_v21 }
  0x18   :  { %846 = vmatpush3.bf16.msra.mxu0 %v947_v22 }
  0x19   :  { %868 = vmatpush3.bf16.msra.mxu1 %v948_v23  ;;  %847 = vmatprep.subr.bf16.mxu0 %v949_v24 }
  0x1a   :  { %869 = vmatprep.subr.bf16.mxu1 %v950_v25 }
  0x1c   :  { %848 = vmatpush3.bf16.msra.mxu0 %v951_v26 }
  0x1d   :  { %870 = vmatpush3.bf16.msra.mxu1 %v952_v27  ;;  %849 = vmatprep.subr.bf16.mxu0 %v953_v29 }
  0x1e   :  { %871 = vmatprep.subr.bf16.mxu1 %v954_v30 }
  0x20   :  { %850 = vmatpush3.bf16.msra.mxu0 %v955_v31 }
  0x21   :  { %872 = vmatpush3.bf16.msra.mxu1 %v956_v32  ;;  %879 = vmatprep.subr.bf16.mxu0 %v958_v35 }
  0x22   :  { %901 = vmatprep.subr.bf16.mxu1 %v959_v38 }
  0x23   :  { %627 = vmatmul.mubr.bf16.vlgmr.msra.gmra.mrb[0].mxu0 %v176_v45 }
  0x24   :  { %880 = vmatpush3.bf16.msra.mxu0 %v960_v48  ;;  %667 = vmatmul.mubr.bf16.vlgmr.msra.gmra.mrb[0].mxu1 %v198_v50 }
  0x25   :  { %881 = vmatprep.subr.bf16.mxu0 %v962_v51  ;;  %902 = vmatpush3.bf16.msra.mxu1 %v961_v53 }
  0x26   :  { %706 = vmatprep.mubr.bf16.mxu0 %v197_v49  ;;  %903 = vmatprep.subr.bf16.mxu1 %v963_v54 }
  0x27   :  { %746 = vmatprep.mubr.bf16.mxu1 %v201_v55 }
  0x28   :  { %882 = vmatpush3.bf16.msra.mxu0 %v964_v56 }
  0x29   :  { %883 = vmatprep.subr.bf16.mxu0 %v966_v57  ;;  %904 = vmatpush3.bf16.msra.mxu1 %v965_v58 }
  0x2a   :  { %905 = vmatprep.subr.bf16.mxu1 %v967_v59 }
  0x2c   :  { %884 = vmatpush3.bf16.msra.mxu0 %v968_v60 }
  0x2d   :  { %885 = vmatprep.subr.bf16.mxu0 %v970_v61  ;;  %906 = vmatpush3.bf16.msra.mxu1 %v969_v62 }
  0x2e   :  { %907 = vmatprep.subr.bf16.mxu1 %v971_v63 }
  0x30   :  { %886 = vmatpush3.bf16.msra.mxu0 %v972_v0 }
  0x31   :  { %887 = vmatprep.subr.bf16.mxu0 %v974_v1  ;;  %908 = vmatpush3.bf16.msra.mxu1 %v973_v2 }
  0x32   :  { %909 = vmatprep.subr.bf16.mxu1 %v975_v3 }
  0x34   :  { %888 = vmatpush3.bf16.msra.mxu0 %v976_v4 }
  0x35   :  { %889 = vmatprep.subr.bf16.mxu0 %v978_v5 }
  0x36   :  { %8 = vsyncpa [#allocation3], 0  ;;  %910 = vmatpush3.bf16.msra.mxu1 %v977_v6  ;;  %v981_v10 = vld [vmem:[%s1260_s1 + $0x1a8] sm:$0xff]   ;;  %v983_v11 = vld [vmem:[%s1260_s1 + $0x1f0] sm:$0xff]   ;;  %v183_v17 = vrot.slane %v1145_v43, %v1141_v41 }
  0x37   :  { %911 = vmatprep.subr.bf16.mxu1 %v979_v7  ;;  %v984_v12 = vld [vmem:[%s1260_s1 + $0x130] sm:$0xff]   ;;  %v986_v13 = vld [vmem:[%s1260_s1 + $0x178] sm:$0xff]   ;;  %v770_v21 = vld [vmem:[%s1261_s2] ss:$0 sm:$0xff] }
  0x38   :  { %890 = vmatpush3.bf16.msra.mxu0 %v980_v8  ;;  %v985_v14 = vld [vmem:[%s1260_s1 + $0x1b0] sm:$0xff]   ;;  %v987_v15 = vld [vmem:[%s1260_s1 + $0x1f8] sm:$0xff]   ;;  %v199_v19 = vcombine.high %v183_v17, %v183_v17 }
  0x39   :  { %891 = vmatprep.subr.bf16.mxu0 %v982_v9  ;;  %v988_v16 = vld [vmem:[%s1260_s1 + $0x138] sm:$0xff]  }
  0x3a   :  { %912 = vmatpush3.bf16.msra.mxu1 %v981_v10  ;;  %v989_v18 = vld [vmem:[%s1260_s1 + $0x1b8] sm:$0xff]   ;;  %s1015_s1 = smov [#allocation2]  }
  0x3b   :  { %913 = vmatprep.subr.bf16.mxu1 %v983_v11  ;;  %s762_s2 = sshll.u32 %s1015_s1, 4  ;;  %s763_s2 = int_to_ptr.vmem [resolvable:$true] %s762_s2 }
  0x3c   :  { %892 = vmatpush3.bf16.msra.mxu0 %v984_v12  ;;  %s990_s6 = scalar_lea.vmem %s763_s2, 32  ;;  %p995_p1 = scmp.lt.s32.totalorder %s763_s2, %s763_s2 }
  0x3d   :  { %893 = vmatprep.subr.bf16.mxu0 %v986_v13  ;;  %p991_p0 = scmp.ne.s32.totalorder %s763_s2, %s990_s6  ;;  %p996_p2 = scmp.lt.s32.totalorder %s990_s6, %s990_s6 }
  0x3e   :  { %914 = vmatpush3.bf16.msra.mxu1 %v985_v14 }
  0x3f   :  { %915 = vmatprep.subr.bf16.mxu1 %v987_v15  ;;  %p997_p3 = por %p996_p2, %p995_p1 }
  0x40   :  { %894 = vmatpush3.bf16.msra.mxu0 %v988_v16 }
  0x41   :  { %p998_p4 = pnand %p997_p3, %p991_p0 }
  0x42   :  { %916 = vmatpush3.bf16.msra.mxu1 %v989_v18 }
  0x43   :  { %707 = vmatmul.mubr.bf16.vlgmr.msra.gmra.mrb[4].mxu0 %v183_v17 }
  0x45   :  { %747 = vmatmul.mubr.bf16.vlgmr.msra.gmra.mrb[4].mxu1 %v199_v19 }
  0xf6   :  { %v851_v20 = vpop.f32.mrb[0].mxu0 }
  0xf7   :  { %v852_v22 = vpop.f32.mrb[1].mxu0  ;;  %v873_v23 = vpop.f32.mrb[0].mxu1 }
  0xf8   :  { %v853_v24 = vadd.f32 %v852_v22, %v851_v20  ;;  %v854_v25 = vpop.f32.mrb[2].mxu0  ;;  %v874_v26 = vpop.f32.mrb[1].mxu1 }
  0xf9   :  { %v855_v27 = vpop.f32.mrb[3].mxu0  ;;  %v875_v29 = vadd.f32 %v874_v26, %v873_v23  ;;  %v876_v30 = vpop.f32.mrb[2].mxu1 }
  0xfa   :  { %v629_v28 = vadd.f32 %v853_v24, %v770_v21  ;;  %v877_v31 = vpop.f32.mrb[3].mxu1 }
  0xfc   :  { %v669_v32 = vadd.f32 %v875_v29, %v629_v28 }
 0x116   :  { %v895_v33 = vpop.f32.mrb[4].mxu0 }
 0x117   :  { %v896_v34 = vpop.f32.mrb[5].mxu0 }
 0x118   :  { %v917_v35 = vpop.f32.mrb[4].mxu1  ;;  %v897_v36 = vadd.f32 %v896_v34, %v895_v33  ;;  %v898_v37 = vpop.f32.mrb[6].mxu0 }
 0x119   :  { %v918_v38 = vpop.f32.mrb[5].mxu1  ;;  %v899_v39 = vpop.f32.mrb[7].mxu0 }
 0x11a   :  { %v709_v40 = vadd.f32 %v897_v36, %v669_v32  ;;  %v919_v41 = vadd.f32 %v918_v38, %v917_v35  ;;  %v920_v42 = vpop.f32.mrb[6].mxu1 }
 0x11b   :  { %v921_v43 = vpop.f32.mrb[7].mxu1 }
 0x11c   :  { %v749_v44 = vadd.f32 %v919_v41, %v709_v40 }
 0x11e   :  { %v754_v45 = vmax.f32 %v749_v44, 0.0 }
 0x120   :  { %755 = vst [vmem:[#allocation2] sm:$0x3] %v754_v45 }
 0x121   :  { %1001 = shalt.err (!%p998_p4)
}
 0x122   :  { %s1002_s9 = scalar_lea.hbm %s1262_s3, 32 }
 0x123   :  { %p1003_p5 = scmp.ne.s32.totalorder %s1262_s3, %s1002_s9  ;;  %p1006_p6 = scmp.lt.u32.totalorder %s1002_s9, %s1262_s3 }
 0x125   :  { %p1008_p7 = pnand %p1006_p6, %p1003_p5 }
 0x127   :  { %1011 = shalt.err (!%p1008_p7)
}
 0x128   :  { %765 = dma.vmem_to_hbm [thread:$0]  %s763_s2, 32, %s1262_s3, [#allocation3]  }
 0x129   :  { %1012 = dma.done.wait [#allocation3], 32  }
 0x12a   :  { %1013 = vsyncadd [#allocation3], 4294967264 }
 0x12b   :  { %769 = vsyncpa [#allocation3], 1 }

</bundles_post_ra>
